<compile_context>
chip_gen: v7x
topology: tpu7x:2x2x1
jax: 0.10.0
libtpu: 0.0.40
codegen_flags: <defaults>
</compile_context>

<pallas_src>
import jax
import jax.numpy as jnp
from jax.experimental import pallas as pl
from jax.experimental.pallas import tpu as pltpu


# Cin below this threshold -> one big-K im2col matmul; at/above it -> per-tap
# accumulation (K = Cin already fills the MXU, and no 9*Cin slab lives in VMEM).
_IM2COL_MAX_CIN = 128


# ----------------------------------------------------------------------------
# small math helpers (kernel-side)
# ----------------------------------------------------------------------------
def _sigmoid(x):
    # numerically stable sigmoid; tanh rides the EUP slot (no f32 VALU divide)
    return 0.5 * jnp.tanh(0.5 * x) + 0.5


def _elu(x):
    # exp on min(x, 0) avoids inf intermediates on the unselected branch
    return jnp.where(x > 0, x, jnp.exp(jnp.minimum(x, 0.0)) - 1.0)


def _taps3x3(x):
    """Returns tap(dh, dw): x shifted by (dh-1, dw-1) with zero padding.

    Row (dh) shifts = leading-dim slices + zero-row concat (cheap).
    Column (dw) shifts = pltpu.roll on the sublane axis (XLU) + a small
    (1,1,W,1) border mask that broadcasts in the multiply.
    Tap order dh*3+dw matches conv weights reshaped from (9, Cin, Cout).
    """
    BB, H, W, Cin = x.shape
    zero_row = jnp.zeros((BB, 1, W, Cin), x.dtype)
    rows = [
        jnp.concatenate([zero_row, x[:, :H - 1]], axis=1),   # dh=0 -> x[h-1]
        x,                                                    # dh=1
        jnp.concatenate([x[:, 1:], zero_row], axis=1),        # dh=2 -> x[h+1]
    ]
    wi = jax.lax.broadcasted_iota(jnp.int32, (1, 1, W, 1), 2)
    m_first = jnp.minimum(wi, 1).astype(x.dtype)              # 0 at w == 0
    m_last = jnp.minimum((W - 1) - wi, 1).astype(x.dtype)     # 0 at w == W-1

    def tap(dh, dw):
        xs = rows[dh]
        if dw == 1:
            return xs
        rolled = pltpu.roll(xs, shift=(1 - dw) % W, axis=2)
        return rolled * (m_first if dw == 0 else m_last)

    return tap


def _conv3x3_mxu(x, w_ref, bias=None):
    """3x3 SAME conv on the MXU: bf16 operands, f32 accumulation.

    x: (BB,H,W,Cin) f32.  w_ref: (9*Cin, Cout) bf16 ref with tap-major rows.
    Returns (BB*H*W, Cout) f32.
    """
    BB, H, W, Cin = x.shape
    M = BB * H * W
    cout = w_ref.shape[-1]
    tap = _taps3x3(x)
    taps = [(dh, dw) for dh in range(3) for dw in range(3)]
    if Cin < _IM2COL_MAX_CIN:
        # small Cin: one big-K matmul keeps the MXU K-dim full
        slab = jnp.concatenate([tap(dh, dw) for dh, dw in taps], axis=-1)
        slab = slab.astype(jnp.bfloat16).reshape(M, 9 * Cin)
        acc = jnp.dot(slab, w_ref[...], preferred_element_type=jnp.float32)
    else:
        # large Cin: per-tap accumulation, no 9*Cin slab in VMEM
        acc = jnp.zeros((M, cout), jnp.float32)
        for t_idx, (dh, dw) in enumerate(taps):
            patch = tap(dh, dw).astype(jnp.bfloat16).reshape(M, Cin)
            acc = acc + jnp.dot(patch, w_ref[t_idx * Cin:(t_idx + 1) * Cin, :],
                                preferred_element_type=jnp.float32)
    if bias is not None:
        acc = acc + bias
    return acc


def _conv3x3_vpu_cout1(x, w_flat, bias):
    """Cout==1 3x3 conv on the VPU: multiply by flattened taps + lane-reduce."""
    BB, H, W, Cin = x.shape
    tap = _taps3x3(x)
    slab = jnp.concatenate([tap(dh, dw) for dh in range(3) for dw in range(3)],
                           axis=-1)                            # (BB,H,W,9*Cin) f32
    m = (slab * w_flat.reshape(1, 1, 1, 9 * Cin)).sum(axis=-1, keepdims=True)
    return m + bias


# ----------------------------------------------------------------------------
# Pallas kernel: one block of BB samples per grid step
# ----------------------------------------------------------------------------
def urasc_kernel(feat_ref,
                 ga_w1a_ref, ga_w1b_ref, ga_b1_ref, ga_w2_ref, ga_b2_ref,
                 sa_w1_ref, sa_b1_ref, sa_w2_ref, sa_b2_ref,
                 blb_w1_ref, blb_s1_ref, blb_t1_ref,
                 blb_w2_ref, blb_s2_ref, blb_t2_ref,
                 out_ref):
    x = feat_ref[...]                                   # (BB, H, W, C) f32
    BB, H, W, C = x.shape
    Cr = sa_w1_ref.shape[-1]
    C2 = blb_w1_ref.shape[-1]

    # ---- Global attention (background / mixed / spliced), all on the VPU ----
    xr = x.reshape(BB, H * W, C)
    avg = jnp.mean(xr, axis=1, keepdims=True)[:, :, None, :]    # (BB,1,1,C)
    mxp = jnp.max(xr, axis=1, keepdims=True)[:, :, None, :]     # (BB,1,1,C)
    h = (avg * ga_w1a_ref[...][None]).sum(axis=-1)               # (BB,3,Cr)
    h = h + (mxp * ga_w1b_ref[...][None]).sum(axis=-1)
    h = jnp.maximum(h + ga_b1_ref[...][None], 0.0)
    y = (h[:, :, :, None] * ga_w2_ref[...][None]).sum(axis=2)    # (BB,3,C)
    scale = _sigmoid(y + ga_b2_ref[...][None])                   # (BB,3,C)
    s_bg = scale[:, 0:1, :][:, :, None, :]                       # (BB,1,1,C)
    s_mix = scale[:, 1:2, :][:, :, None, :]
    s_sp = scale[:, 2:3, :][:, :, None, :]

    # ---- spatial attention mask (done first so its slab dies before BLB) ----
    a1 = _conv3x3_mxu(x, sa_w1_ref, bias=sa_b1_ref[...])         # (M,Cr) f32
    a1 = jnp.maximum(a1, 0.0).reshape(BB, H, W, Cr)
    mask = _sigmoid(_conv3x3_vpu_cout1(a1, sa_w2_ref[...], sa_b2_ref[...]))

    # ---- BasicLearningBlock(spliced_feature), GA scale folded into the input -
    x_sp = x * s_sp                                              # (BB,H,W,C)
    t = _conv3x3_mxu(x_sp, blb_w1_ref)                           # (M,C2) f32
    # TODO(synk): BatchNorm folded into scale/shift (eval mode, running stats);
    #             training-mode batch statistics would need a cross-block reduce.
    t = _elu(t * blb_s1_ref[...] + blb_t1_ref[...]).reshape(BB, H, W, C2)
    t2 = _conv3x3_mxu(t, blb_w2_ref)                             # (M,C) f32
    blb = _elu(t2 * blb_s2_ref[...] + blb_t2_ref[...]).reshape(BB, H, W, C)

    # ---- fused combine: out = x*(s_bg*(1-mask) + s_mix*mask) + blb*mask ----
    comb = s_bg * (1.0 - mask) + s_mix * mask
    out_ref[...] = (x * comb + blb * mask).astype(out_ref.dtype)


# ----------------------------------------------------------------------------
# sizing helpers (generation-aware)
# ----------------------------------------------------------------------------
def _vmem_capacity_bytes():
    try:
        info = pltpu.get_tpu_info()
        cap = int(getattr(info, "vmem_capacity_bytes", 0))
        if cap > 0:
            return cap
    except Exception:
        pass
    return 64 * 1024 * 1024            # conservative (v7x-sized) fallback


def _per_sample_live_bytes(H, W, C, C2, Cr):
    """Rough peak live VMEM per batch sample inside one grid step."""
    px = H * W
    f32, bf16 = 4, 2

    def conv_work(cin, cout):
        if cin < _IM2COL_MAX_CIN:
            # f32 slab + bf16 copy (transient) + f32 accumulator
            return px * (9 * cin * (f32 + bf16) + cout * f32)
        # three row-shifted f32 copies + one bf16 patch + f32 accumulator
        return px * (3 * cin * f32 + cin * bf16 + cout * f32)

    base = px * f32 * (2 * C            # x + x_sp
                       + C2             # t
                       + 2 * C          # blb + out block
                       + Cr + 9 * Cr    # a1 + a1 slab
                       + 2)             # mask etc.
    work = max(conv_work(C, Cr), conv_work(C, C2), conv_work(C2, C))
    return int((base + work) * 1.3)     # 30% slack for compiler temporaries


def _pick_block_batch(B, H, W, per_sample_bytes, budget_bytes, m_target=1024):
    """Largest divisor of B that fits the budget while keeping >=2 grid steps
    (>=4 when B allows) so both v7x TensorCores get work and the BlockSpec
    pipeline can overlap DMA with compute; stop growing once the conv M-dim
    (BB*H*W) is already well filled."""
    if B <= 1:
        return 1
    min_steps = min(4 if B >= 4 else 2, B)
    divisors = [d for d in range(1, B + 1) if B % d == 0]
    acceptable = [d for d in divisors
                  if B // d >= min_steps and d * per_sample_bytes <= budget_bytes]
    if not acceptable:
        return 1
    for d in acceptable:
        if d * H * W >= m_target:
            return d
    return acceptable[-1]


def _full_spec(shape):
    nd = len(shape)
    return pl.BlockSpec(shape, lambda b, _n=nd: (0,) * _n)


# ----------------------------------------------------------------------------
# wrapper
# ----------------------------------------------------------------------------
@jax.jit
def urasc_forward(feature_nchw, _m_unused, params):
    """feature_nchw: (B, C, H, W) f32; _m is unused (matches the torch signature)."""
    B, C, H, W = feature_nchw.shape
    # TODO(synk): drop these NCHW<->NHWC relayouts if the surrounding model is NHWC.
    x = jnp.transpose(feature_nchw, (0, 2, 3, 1))                # -> NHWC

    Cr = params['sa_w1'].shape[-1]
    C2 = params['blb_w1'].shape[-1]

    # repack weights into kernel-friendly layouts; conv weights in bf16 (MXU),
    # everything else (biases, BN scale/shift, GA MLP) stays f32.
    ga_w1a = jnp.transpose(params['ga_w1'][:, :C, :], (0, 2, 1))   # (3,Cr,C) avg half
    ga_w1b = jnp.transpose(params['ga_w1'][:, C:, :], (0, 2, 1))   # (3,Cr,C) max half
    weights = [
        ga_w1a, ga_w1b, params['ga_b1'], params['ga_w2'], params['ga_b2'],
        params['sa_w1'].reshape(9 * C, Cr).astype(jnp.bfloat16),
        params['sa_b1'],
        params['sa_w2'].reshape(1, 9 * Cr),
        params['sa_b2'],
        params['blb_w1'].reshape(9 * C, C2).astype(jnp.bfloat16),
        params['blb_s1'], params['blb_t1'],
        params['blb_w2'].reshape(9 * C2, C).astype(jnp.bfloat16),
        params['blb_s2'], params['blb_t2'],
    ]
    weight_bytes = sum(int(w.size) * w.dtype.itemsize for w in weights)

    capacity = _vmem_capacity_bytes()
    vmem_limit = int(capacity * 0.75)            # headroom: ~48 MiB v7x, ~96 MiB v5e/v6e
    per_sample = _per_sample_live_bytes(H, W, C, C2, Cr) + 4 * H * W * C * 4
    budget = vmem_limit - 2 * weight_bytes - (4 << 20)
    BB = _pick_block_batch(B, H, W, per_sample, budget)

    in_specs = [pl.BlockSpec((BB, H, W, C), lambda b: (b, 0, 0, 0))]
    in_specs += [_full_spec(w.shape) for w in weights]

    out = pl.pallas_call(
        urasc_kernel,
        out_shape=jax.ShapeDtypeStruct((B, H, W, C), jnp.float32),
        grid=(B // BB,),
        in_specs=in_specs,
        out_specs=pl.BlockSpec((BB, H, W, C), lambda b: (b, 0, 0, 0)),
        compiler_params=pltpu.CompilerParams(
            dimension_semantics=("parallel",),
            vmem_limit_bytes=int(vmem_limit)),
    )(x, *weights)

    return jnp.transpose(out, (0, 3, 1, 2))                      # back to NCHW


# ----------------------------------------------------------------------------
# parameters (layouts consistent with the torch modules; tap index = kh*3+kw)
# ----------------------------------------------------------------------------
def init_params(key, C, reduction=16):
    Cr = max(C // reduction, 1)
    C2 = 2 * C
    ks = jax.random.split(key, 10)

    def w(k, shape, fan_in):
        return jax.random.normal(k, shape, jnp.float32) / jnp.sqrt(float(fan_in))

    def b(k, shape, fan_in):
        bound = 1.0 / jnp.sqrt(float(fan_in))
        return jax.random.uniform(k, shape, jnp.float32, -bound, bound)

    bn_scale = float(1.0 / jnp.sqrt(jnp.float32(1.0 + 1e-5)))  # gamma=1, var=1 (eval)

    return {
        # 3 stacked GlobalAttentionModules: [background, mixed, spliced]
        'ga_w1': w(ks[0], (3, 2 * C, Cr), 2 * C),
        'ga_b1': b(ks[1], (3, Cr), 2 * C),
        'ga_w2': w(ks[2], (3, Cr, C), Cr),
        'ga_b2': b(ks[3], (3, C), Cr),
        # SpatialAttentionModule: conv3x3 -> relu -> conv3x3 -> sigmoid
        'sa_w1': w(ks[4], (9, C, Cr), 9 * C),
        'sa_b1': b(ks[5], (1, Cr), 9 * C),
        'sa_w2': w(ks[6], (9, Cr, 1), 9 * Cr),
        'sa_b2': b(ks[7], (1, 1), 9 * Cr),
        # BasicLearningBlock: (conv3x3 no-bias -> BN -> ELU) x 2, BN folded
        'blb_w1': w(ks[8], (9, C, C2), 9 * C),
        'blb_s1': jnp.full((1, C2), bn_scale, jnp.float32),
        'blb_t1': jnp.zeros((1, C2), jnp.float32),
        'blb_w2': w(ks[9], (9, C2, C), 9 * C2),
        'blb_s2': jnp.full((1, C), bn_scale, jnp.float32),
        'blb_t2': jnp.zeros((1, C), jnp.float32),
    }


# ----------------------------------------------------------------------------
# pure-JAX reference.  conv_dtype=bfloat16 matches the kernel's MXU precision
# (bf16 operands, f32 accumulation); conv_dtype=float32 is the full-precision
# PyTorch-equivalent semantics.
# ----------------------------------------------------------------------------
def urasc_reference(feature_nchw, params, conv_dtype=jnp.float32):
    hp = jax.lax.Precision.HIGHEST
    x = jnp.transpose(feature_nchw, (0, 2, 3, 1))
    B, H, W, C = x.shape

    def conv3x3(inp, w9, bias=None, dtype=conv_dtype):
        cin, cout = w9.shape[1], w9.shape[2]
        prec = hp if dtype == jnp.float32 else jax.lax.Precision.DEFAULT
        out = jax.lax.conv_general_dilated(
            inp.astype(dtype), w9.reshape(3, 3, cin, cout).astype(dtype),
            window_strides=(1, 1), padding='SAME',
            dimension_numbers=('NHWC', 'HWIO', 'NHWC'),
            preferred_element_type=jnp.float32, precision=prec)
        if bias is not None:
            out = out + bias.reshape(1, 1, 1, cout)
        return out

    xm = x.reshape(B, H * W, C)
    pooled = jnp.concatenate([jnp.mean(xm, axis=1), jnp.max(xm, axis=1)], axis=-1)

    def global_scale(g):
        h = jnp.maximum(jnp.matmul(pooled, params['ga_w1'][g], precision=hp)
                        + params['ga_b1'][g], 0.0)
        return jax.nn.sigmoid(jnp.matmul(h, params['ga_w2'][g], precision=hp)
                              + params['ga_b2'][g])

    s_bg = global_scale(0)[:, None, None, :]
    s_mix = global_scale(1)[:, None, None, :]
    s_sp = global_scale(2)[:, None, None, :]

    a1 = jnp.maximum(conv3x3(x, params['sa_w1'], params['sa_b1'][0]), 0.0)
    # the Cout=1 conv runs on the VPU in f32 inside the kernel -> keep it f32 here
    mask = jax.nn.sigmoid(conv3x3(a1, params['sa_w2'], params['sa_b2'][0],
                                  dtype=jnp.float32))
    sp = x * s_sp
    t = jax.nn.elu(conv3x3(sp, params['blb_w1']) * params['blb_s1'][0]
                   + params['blb_t1'][0])
    blb = jax.nn.elu(conv3x3(t, params['blb_w2']) * params['blb_s2'][0]
                     + params['blb_t2'][0])
    out = (x * s_bg) * (1.0 - mask) + (blb + x * s_mix) * mask
    return jnp.transpose(out, (0, 3, 1, 2))


if __name__ == "__main__":
    key = jax.random.PRNGKey(0)
    ks = jax.random.split(key, 6)

    def run_case(kf, km, kp, B, C, H, W, tag):
        feature = jax.random.normal(kf, (B, C, H, W), jnp.float32)   # NCHW like PyTorch
        _m = jax.random.uniform(km, (B, 1, H, W), jnp.float32)       # unused by forward
        params = init_params(kp, C, reduction=16)

        out = jax.block_until_ready(urasc_forward(feature, _m, params))
        assert out.shape == (B, C, H, W) and out.dtype == jnp.float32
        assert bool(jnp.all(jnp.isfinite(out)))

        # tight check vs matched-precision (bf16 MXU, f32 accumulate) reference
        ref_bf16 = jax.block_until_ready(
            urasc_reference(feature, params, conv_dtype=jnp.bfloat16))
        err = float(jnp.max(jnp.abs(out - ref_bf16)))
        assert err < 5e-3, f"[{tag}] max abs err vs matched-precision ref: {err}"

        # loose sanity check vs the full-f32 (PyTorch-equivalent) reference
        ref_f32 = jax.block_until_ready(
            urasc_reference(feature, params, conv_dtype=jnp.float32))
        err32 = float(jnp.max(jnp.abs(out - ref_f32)))
        assert err32 < 1e-1, f"[{tag}] max abs err vs f32 ref: {err32}"

    # small config: exercises the big-K im2col path (Cin < 128), grid of 2 steps
    run_case(ks[0], ks[1], ks[2], B=2, C=32, H=8, W=8, tag="C32")
    # larger-channel config: exercises the per-tap bf16 MXU path (Cin >= 128)
    run_case(ks[3], ks[4], ks[5], B=2, C=128, H=8, W=8, tag="C128")

    print("KERNEL_OK")
</pallas_src>

<mosaic_0001>
module attributes {stable_mosaic.version = 11 : i64} {
  func.func @urasc_kernel(%arg0: i32, %arg1: memref<1x8x8x32xf32, #tpu.memory_space<vmem>>, %arg2: memref<3x2x32xf32, #tpu.memory_space<vmem>>, %arg3: memref<3x2x32xf32, #tpu.memory_space<vmem>>, %arg4: memref<3x2xf32, #tpu.memory_space<vmem>>, %arg5: memref<3x2x32xf32, #tpu.memory_space<vmem>>, %arg6: memref<3x32xf32, #tpu.memory_space<vmem>>, %arg7: memref<288x2xbf16, #tpu.memory_space<vmem>>, %arg8: memref<1x2xf32, #tpu.memory_space<vmem>>, %arg9: memref<1x18xf32, #tpu.memory_space<vmem>>, %arg10: memref<1x1xf32, #tpu.memory_space<vmem>>, %arg11: memref<288x64xbf16, #tpu.memory_space<vmem>>, %arg12: memref<1x64xf32, #tpu.memory_space<vmem>>, %arg13: memref<1x64xf32, #tpu.memory_space<vmem>>, %arg14: memref<576x32xbf16, #tpu.memory_space<vmem>>, %arg15: memref<1x32xf32, #tpu.memory_space<vmem>>, %arg16: memref<1x32xf32, #tpu.memory_space<vmem>>, %arg17: memref<1x8x8x32xf32, #tpu.memory_space<vmem>>) attributes {dimension_semantics = [#tpu.dimension_semantics<parallel>], iteration_bounds = array<i64: 2>, scalar_prefetch = 0 : i64, scratch_operands = 0 : i64, tpu.core_type = #tpu.core_type<tc>, window_params = [{transform_indices = @transform_0, window_bounds = array<i64: 1, 8, 8, 32>}, {pipeline_mode = #tpu.pipeline_mode<synchronous>, transform_indices = @transform_1, window_bounds = array<i64: 3, 2, 32>}, {pipeline_mode = #tpu.pipeline_mode<synchronous>, transform_indices = @transform_2, window_bounds = array<i64: 3, 2, 32>}, {pipeline_mode = #tpu.pipeline_mode<synchronous>, transform_indices = @transform_3, window_bounds = array<i64: 3, 2>}, {pipeline_mode = #tpu.pipeline_mode<synchronous>, transform_indices = @transform_4, window_bounds = array<i64: 3, 2, 32>}, {pipeline_mode = #tpu.pipeline_mode<synchronous>, transform_indices = @transform_5, window_bounds = array<i64: 3, 32>}, {pipeline_mode = #tpu.pipeline_mode<synchronous>, transform_indices = @transform_6, window_bounds = array<i64: 288, 2>}, {pipeline_mode = #tpu.pipeline_mode<synchronous>, transform_indices = @transform_7, window_bounds = array<i64: 1, 2>}, {pipeline_mode = #tpu.pipeline_mode<synchronous>, transform_indices = @transform_8, window_bounds = array<i64: 1, 18>}, {pipeline_mode = #tpu.pipeline_mode<synchronous>, transform_indices = @transform_9, window_bounds = array<i64: 1, 1>}, {pipeline_mode = #tpu.pipeline_mode<synchronous>, transform_indices = @transform_10, window_bounds = array<i64: 288, 64>}, {pipeline_mode = #tpu.pipeline_mode<synchronous>, transform_indices = @transform_11, window_bounds = array<i64: 1, 64>}, {pipeline_mode = #tpu.pipeline_mode<synchronous>, transform_indices = @transform_12, window_bounds = array<i64: 1, 64>}, {pipeline_mode = #tpu.pipeline_mode<synchronous>, transform_indices = @transform_13, window_bounds = array<i64: 576, 32>}, {pipeline_mode = #tpu.pipeline_mode<synchronous>, transform_indices = @transform_14, window_bounds = array<i64: 1, 32>}, {pipeline_mode = #tpu.pipeline_mode<synchronous>, transform_indices = @transform_15, window_bounds = array<i64: 1, 32>}, {transform_indices = @transform_16, window_bounds = array<i64: 1, 8, 8, 32>}]} {
    %c0 = arith.constant 0 : index
    %c0_0 = arith.constant 0 : index
    %c0_1 = arith.constant 0 : index
    %c0_2 = arith.constant 0 : index
    %0 = vector.load %arg1[%c0, %c0_0, %c0_1, %c0_2] : memref<1x8x8x32xf32, #tpu.memory_space<vmem>>, vector<1x8x8x32xf32>
    %1 = vector.shape_cast %0 : vector<1x8x8x32xf32> to vector<1x64x32xf32>
    %cst = arith.constant dense<0.000000e+00> : vector<1x32xf32>
    %2 = vector.multi_reduction <add>, %1, %cst [1] : vector<1x64x32xf32> to vector<1x32xf32>
    %3 = vector.shape_cast %2 : vector<1x32xf32> to vector<1x1x32xf32>
    %cst_3 = arith.constant 6.400000e+01 : f32
    %4 = vector.broadcast %cst_3 : f32 to vector<1x1x32xf32>
    %5 = arith.divf %3, %4 : vector<1x1x32xf32>
    %6 = vector.shape_cast %5 : vector<1x1x32xf32> to vector<1x1x1x32xf32>
    %cst_4 = arith.constant dense<0xFF800000> : vector<1x32xf32>
    %7 = vector.multi_reduction <maximumf>, %1, %cst_4 [1] : vector<1x64x32xf32> to vector<1x32xf32>
    %8 = vector.shape_cast %7 : vector<1x32xf32> to vector<1x1x32xf32>
    %9 = vector.shape_cast %8 : vector<1x1x32xf32> to vector<1x1x1x32xf32>
    %c0_5 = arith.constant 0 : index
    %c0_6 = arith.constant 0 : index
    %c0_7 = arith.constant 0 : index
    %10 = vector.load %arg2[%c0_5, %c0_6, %c0_7] : memref<3x2x32xf32, #tpu.memory_space<vmem>>, vector<3x2x32xf32>
    %11 = vector.shape_cast %10 : vector<3x2x32xf32> to vector<1x3x2x32xf32>
    %12 = vector.broadcast %6 : vector<1x1x1x32xf32> to vector<1x3x2x32xf32>
    %13 = arith.mulf %12, %11 : vector<1x3x2x32xf32>
    %cst_8 = arith.constant dense<0.000000e+00> : vector<1x3x2xf32>
    %14 = vector.multi_reduction <add>, %13, %cst_8 [3] : vector<1x3x2x32xf32> to vector<1x3x2xf32>
    %c0_9 = arith.constant 0 : index
    %c0_10 = arith.constant 0 : index
    %c0_11 = arith.constant 0 : index
    %15 = vector.load %arg3[%c0_9, %c0_10, %c0_11] : memref<3x2x32xf32, #tpu.memory_space<vmem>>, vector<3x2x32xf32>
    %16 = vector.shape_cast %15 : vector<3x2x32xf32> to vector<1x3x2x32xf32>
    %17 = vector.broadcast %9 : vector<1x1x1x32xf32> to vector<1x3x2x32xf32>
    %18 = arith.mulf %17, %16 : vector<1x3x2x32xf32>
    %cst_12 = arith.constant dense<0.000000e+00> : vector<1x3x2xf32>
    %19 = vector.multi_reduction <add>, %18, %cst_12 [3] : vector<1x3x2x32xf32> to vector<1x3x2xf32>
    %20 = arith.addf %14, %19 : vector<1x3x2xf32>
    %c0_13 = arith.constant 0 : index
    %c0_14 = arith.constant 0 : index
    %21 = vector.load %arg4[%c0_13, %c0_14] : memref<3x2xf32, #tpu.memory_space<vmem>>, vector<3x2xf32>
    %22 = vector.shape_cast %21 : vector<3x2xf32> to vector<1x3x2xf32>
    %23 = arith.addf %20, %22 : vector<1x3x2xf32>
    %cst_15 = arith.constant 0.000000e+00 : f32
    %24 = vector.broadcast %cst_15 : f32 to vector<1x3x2xf32>
    %25 = arith.maximumf %23, %24 : vector<1x3x2xf32>
    %26 = vector.shape_cast %25 : vector<1x3x2xf32> to vector<1x3x2x1xf32>
    %c0_16 = arith.constant 0 : index
    %c0_17 = arith.constant 0 : index
    %c0_18 = arith.constant 0 : index
    %27 = vector.load %arg5[%c0_16, %c0_17, %c0_18] : memref<3x2x32xf32, #tpu.memory_space<vmem>>, vector<3x2x32xf32>
    %28 = vector.shape_cast %27 : vector<3x2x32xf32> to vector<1x3x2x32xf32>
    %29 = vector.broadcast %26 : vector<1x3x2x1xf32> to vector<1x3x2x32xf32>
    %30 = arith.mulf %29, %28 : vector<1x3x2x32xf32>
    %cst_19 = arith.constant dense<0.000000e+00> : vector<1x3x32xf32>
    %31 = vector.multi_reduction <add>, %30, %cst_19 [2] : vector<1x3x2x32xf32> to vector<1x3x32xf32>
    %c0_20 = arith.constant 0 : index
    %c0_21 = arith.constant 0 : index
    %32 = vector.load %arg6[%c0_20, %c0_21] : memref<3x32xf32, #tpu.memory_space<vmem>>, vector<3x32xf32>
    %33 = vector.shape_cast %32 : vector<3x32xf32> to vector<1x3x32xf32>
    %34 = arith.addf %31, %33 : vector<1x3x32xf32>
    %cst_22 = arith.constant 5.000000e-01 : f32
    %35 = vector.broadcast %cst_22 : f32 to vector<1x3x32xf32>
    %36 = arith.mulf %35, %34 : vector<1x3x32xf32>
    %37 = math.tanh %36 : vector<1x3x32xf32>
    %cst_23 = arith.constant 5.000000e-01 : f32
    %38 = vector.broadcast %cst_23 : f32 to vector<1x3x32xf32>
    %39 = arith.mulf %38, %37 : vector<1x3x32xf32>
    %cst_24 = arith.constant 5.000000e-01 : f32
    %40 = vector.broadcast %cst_24 : f32 to vector<1x3x32xf32>
    %41 = arith.addf %39, %40 : vector<1x3x32xf32>
    %42 = vector.extract_strided_slice %41 {offsets = [0, 0, 0], sizes = [1, 1, 32], strides = [1, 1, 1]} : vector<1x3x32xf32> to vector<1x1x32xf32>
    %43 = vector.shape_cast %42 : vector<1x1x32xf32> to vector<1x1x1x32xf32>
    %44 = vector.extract_strided_slice %41 {offsets = [0, 1, 0], sizes = [1, 1, 32], strides = [1, 1, 1]} : vector<1x3x32xf32> to vector<1x1x32xf32>
    %45 = vector.shape_cast %44 : vector<1x1x32xf32> to vector<1x1x1x32xf32>
    %46 = vector.extract_strided_slice %41 {offsets = [0, 2, 0], sizes = [1, 1, 32], strides = [1, 1, 1]} : vector<1x3x32xf32> to vector<1x1x32xf32>
    %47 = vector.shape_cast %46 : vector<1x1x32xf32> to vector<1x1x1x32xf32>
    %c0_25 = arith.constant 0 : index
    %c0_26 = arith.constant 0 : index
    %48 = vector.load %arg8[%c0_25, %c0_26] : memref<1x2xf32, #tpu.memory_space<vmem>>, vector<1x2xf32>
    %cst_27 = arith.constant 0.000000e+00 : f32
    %49 = vector.broadcast %cst_27 : f32 to vector<1x1x8x32xf32>
    %50 = vector.extract_strided_slice %0 {offsets = [0, 0, 0, 0], sizes = [1, 7, 8, 32], strides = [1, 1, 1, 1]} : vector<1x8x8x32xf32> to vector<1x7x8x32xf32>
    %51 = tpu.concatenate %49, %50 in 1 : vector<1x1x8x32xf32>, vector<1x7x8x32xf32> -> vector<1x8x8x32xf32>
    %52 = vector.extract_strided_slice %0 {offsets = [0, 1, 0, 0], sizes = [1, 7, 8, 32], strides = [1, 1, 1, 1]} : vector<1x8x8x32xf32> to vector<1x7x8x32xf32>
    %53 = tpu.concatenate %52, %49 in 1 : vector<1x7x8x32xf32>, vector<1x1x8x32xf32> -> vector<1x8x8x32xf32>
    %54 = tpu.iota {dimensions = array<i32: 2>} : vector<1x1x8x1xi32>
    %c1_i32 = arith.constant 1 : i32
    %55 = vector.broadcast %c1_i32 : i32 to vector<1x1x8x1xi32>
    %56 = arith.minsi %54, %55 : vector<1x1x8x1xi32>
    %57 = arith.sitofp %56 : vector<1x1x8x1xi32> to vector<1x1x8x1xf32>
    %c7_i32 = arith.constant 7 : i32
    %58 = vector.broadcast %c7_i32 : i32 to vector<1x1x8x1xi32>
    %59 = arith.subi %58, %54 : vector<1x1x8x1xi32>
    %c1_i32_28 = arith.constant 1 : i32
    %60 = vector.broadcast %c1_i32_28 : i32 to vector<1x1x8x1xi32>
    %61 = arith.minsi %59, %60 : vector<1x1x8x1xi32>
    %62 = arith.sitofp %61 : vector<1x1x8x1xi32> to vector<1x1x8x1xf32>
    %c1_i32_29 = arith.constant 1 : i32
    %63 = tpu.dynamic_rotate %51 by %c1_i32_29 dim 2 : vector<1x8x8x32xf32>, i32 -> vector<1x8x8x32xf32>
    %64 = vector.broadcast %57 : vector<1x1x8x1xf32> to vector<1x8x8x32xf32>
    %65 = arith.mulf %63, %64 : vector<1x8x8x32xf32>
    %c7_i32_30 = arith.constant 7 : i32
    %66 = tpu.dynamic_rotate %51 by %c7_i32_30 dim 2 : vector<1x8x8x32xf32>, i32 -> vector<1x8x8x32xf32>
    %67 = vector.broadcast %62 : vector<1x1x8x1xf32> to vector<1x8x8x32xf32>
    %68 = arith.mulf %66, %67 : vector<1x8x8x32xf32>
    %c1_i32_31 = arith.constant 1 : i32
    %69 = tpu.dynamic_rotate %0 by %c1_i32_31 dim 2 : vector<1x8x8x32xf32>, i32 -> vector<1x8x8x32xf32>
    %70 = vector.broadcast %57 : vector<1x1x8x1xf32> to vector<1x8x8x32xf32>
    %71 = arith.mulf %69, %70 : vector<1x8x8x32xf32>
    %c7_i32_32 = arith.constant 7 : i32
    %72 = tpu.dynamic_rotate %0 by %c7_i32_32 dim 2 : vector<1x8x8x32xf32>, i32 -> vector<1x8x8x32xf32>
    %73 = vector.broadcast %62 : vector<1x1x8x1xf32> to vector<1x8x8x32xf32>
    %74 = arith.mulf %72, %73 : vector<1x8x8x32xf32>
    %c1_i32_33 = arith.constant 1 : i32
    %75 = tpu.dynamic_rotate %53 by %c1_i32_33 dim 2 : vector<1x8x8x32xf32>, i32 -> vector<1x8x8x32xf32>
    %76 = vector.broadcast %57 : vector<1x1x8x1xf32> to vector<1x8x8x32xf32>
    %77 = arith.mulf %75, %76 : vector<1x8x8x32xf32>
    %c7_i32_34 = arith.constant 7 : i32
    %78 = tpu.dynamic_rotate %53 by %c7_i32_34 dim 2 : vector<1x8x8x32xf32>, i32 -> vector<1x8x8x32xf32>
    %79 = vector.broadcast %62 : vector<1x1x8x1xf32> to vector<1x8x8x32xf32>
    %80 = arith.mulf %78, %79 : vector<1x8x8x32xf32>
    %81 = tpu.concatenate %65, %51, %68, %71, %0, %74, %77, %53, %80 in 3 : vector<1x8x8x32xf32>, vector<1x8x8x32xf32>, vector<1x8x8x32xf32>, vector<1x8x8x32xf32>, vector<1x8x8x32xf32>, vector<1x8x8x32xf32>, vector<1x8x8x32xf32>, vector<1x8x8x32xf32>, vector<1x8x8x32xf32> -> vector<1x8x8x288xf32>
    %82 = arith.truncf %81 : vector<1x8x8x288xf32> to vector<1x8x8x288xbf16>
    %83 = vector.shape_cast %82 : vector<1x8x8x288xbf16> to vector<64x288xbf16>
    %c0_35 = arith.constant 0 : index
    %c0_36 = arith.constant 0 : index
    %84 = vector.load %arg7[%c0_35, %c0_36] : memref<288x2xbf16, #tpu.memory_space<vmem>>, vector<288x2xbf16>
    %cst_37 = arith.constant dense<0.000000e+00> : vector<64x2xf32>
    %85 = tpu.matmul %83, %84, %cst_37 {dimension_numbers = #tpu.dot_dimension_numbers<[1], [0], [0], [1], [0, 0, 1, 1], [], []>} : vector<64x288xbf16>, vector<288x2xbf16>, vector<64x2xf32> -> vector<64x2xf32>
    %86 = vector.broadcast %48 : vector<1x2xf32> to vector<64x2xf32>
    %87 = arith.addf %85, %86 : vector<64x2xf32>
    %cst_38 = arith.constant 0.000000e+00 : f32
    %88 = vector.broadcast %cst_38 : f32 to vector<64x2xf32>
    %89 = arith.maximumf %87, %88 : vector<64x2xf32>
    %90 = vector.shape_cast %89 : vector<64x2xf32> to vector<1x8x8x2xf32>
    %c0_39 = arith.constant 0 : index
    %c0_40 = arith.constant 0 : index
    %91 = vector.load %arg9[%c0_39, %c0_40] : memref<1x18xf32, #tpu.memory_space<vmem>>, vector<1x18xf32>
    %c0_41 = arith.constant 0 : index
    %c0_42 = arith.constant 0 : index
    %92 = vector.load %arg10[%c0_41, %c0_42] : memref<1x1xf32, #tpu.memory_space<vmem>>, vector<1x1xf32>
    %cst_43 = arith.constant 0.000000e+00 : f32
    %93 = vector.broadcast %cst_43 : f32 to vector<1x1x8x2xf32>
    %94 = vector.extract_strided_slice %90 {offsets = [0, 0, 0, 0], sizes = [1, 7, 8, 2], strides = [1, 1, 1, 1]} : vector<1x8x8x2xf32> to vector<1x7x8x2xf32>
    %95 = tpu.concatenate %93, %94 in 1 : vector<1x1x8x2xf32>, vector<1x7x8x2xf32> -> vector<1x8x8x2xf32>
    %96 = vector.extract_strided_slice %90 {offsets = [0, 1, 0, 0], sizes = [1, 7, 8, 2], strides = [1, 1, 1, 1]} : vector<1x8x8x2xf32> to vector<1x7x8x2xf32>
    %97 = tpu.concatenate %96, %93 in 1 : vector<1x7x8x2xf32>, vector<1x1x8x2xf32> -> vector<1x8x8x2xf32>
    %98 = tpu.iota {dimensions = array<i32: 2>} : vector<1x1x8x1xi32>
    %c1_i32_44 = arith.constant 1 : i32
    %99 = vector.broadcast %c1_i32_44 : i32 to vector<1x1x8x1xi32>
    %100 = arith.minsi %98, %99 : vector<1x1x8x1xi32>
    %101 = arith.sitofp %100 : vector<1x1x8x1xi32> to vector<1x1x8x1xf32>
    %c7_i32_45 = arith.constant 7 : i32
    %102 = vector.broadcast %c7_i32_45 : i32 to vector<1x1x8x1xi32>
    %103 = arith.subi %102, %98 : vector<1x1x8x1xi32>
    %c1_i32_46 = arith.constant 1 : i32
    %104 = vector.broadcast %c1_i32_46 : i32 to vector<1x1x8x1xi32>
    %105 = arith.minsi %103, %104 : vector<1x1x8x1xi32>
    %106 = arith.sitofp %105 : vector<1x1x8x1xi32> to vector<1x1x8x1xf32>
    %c1_i32_47 = arith.constant 1 : i32
    %107 = tpu.dynamic_rotate %95 by %c1_i32_47 dim 2 : vector<1x8x8x2xf32>, i32 -> vector<1x8x8x2xf32>
    %108 = vector.broadcast %101 : vector<1x1x8x1xf32> to vector<1x8x8x2xf32>
    %109 = arith.mulf %107, %108 : vector<1x8x8x2xf32>
    %c7_i32_48 = arith.constant 7 : i32
    %110 = tpu.dynamic_rotate %95 by %c7_i32_48 dim 2 : vector<1x8x8x2xf32>, i32 -> vector<1x8x8x2xf32>
    %111 = vector.broadcast %106 : vector<1x1x8x1xf32> to vector<1x8x8x2xf32>
    %112 = arith.mulf %110, %111 : vector<1x8x8x2xf32>
    %c1_i32_49 = arith.constant 1 : i32
    %113 = tpu.dynamic_rotate %90 by %c1_i32_49 dim 2 : vector<1x8x8x2xf32>, i32 -> vector<1x8x8x2xf32>
    %114 = vector.broadcast %101 : vector<1x1x8x1xf32> to vector<1x8x8x2xf32>
    %115 = arith.mulf %113, %114 : vector<1x8x8x2xf32>
    %c7_i32_50 = arith.constant 7 : i32
    %116 = tpu.dynamic_rotate %90 by %c7_i32_50 dim 2 : vector<1x8x8x2xf32>, i32 -> vector<1x8x8x2xf32>
    %117 = vector.broadcast %106 : vector<1x1x8x1xf32> to vector<1x8x8x2xf32>
    %118 = arith.mulf %116, %117 : vector<1x8x8x2xf32>
    %c1_i32_51 = arith.constant 1 : i32
    %119 = tpu.dynamic_rotate %97 by %c1_i32_51 dim 2 : vector<1x8x8x2xf32>, i32 -> vector<1x8x8x2xf32>
    %120 = vector.broadcast %101 : vector<1x1x8x1xf32> to vector<1x8x8x2xf32>
    %121 = arith.mulf %119, %120 : vector<1x8x8x2xf32>
    %c7_i32_52 = arith.constant 7 : i32
    %122 = tpu.dynamic_rotate %97 by %c7_i32_52 dim 2 : vector<1x8x8x2xf32>, i32 -> vector<1x8x8x2xf32>
    %123 = vector.broadcast %106 : vector<1x1x8x1xf32> to vector<1x8x8x2xf32>
    %124 = arith.mulf %122, %123 : vector<1x8x8x2xf32>
    %125 = tpu.concatenate %109, %95, %112, %115, %90, %118, %121, %97, %124 in 3 : vector<1x8x8x2xf32>, vector<1x8x8x2xf32>, vector<1x8x8x2xf32>, vector<1x8x8x2xf32>, vector<1x8x8x2xf32>, vector<1x8x8x2xf32>, vector<1x8x8x2xf32>, vector<1x8x8x2xf32>, vector<1x8x8x2xf32> -> vector<1x8x8x18xf32>
    %126 = vector.shape_cast %91 : vector<1x18xf32> to vector<1x1x1x18xf32>
    %127 = vector.broadcast %126 : vector<1x1x1x18xf32> to vector<1x8x8x18xf32>
    %128 = arith.mulf %125, %127 : vector<1x8x8x18xf32>
    %cst_53 = arith.constant dense<0.000000e+00> : vector<1x8x8xf32>
    %129 = vector.multi_reduction <add>, %128, %cst_53 [3] : vector<1x8x8x18xf32> to vector<1x8x8xf32>
    %130 = vector.shape_cast %129 : vector<1x8x8xf32> to vector<1x8x8x1xf32>
    %131 = vector.shape_cast %92 : vector<1x1xf32> to vector<1x1x1x1xf32>
    %132 = vector.broadcast %131 : vector<1x1x1x1xf32> to vector<1x8x8x1xf32>
    %133 = arith.addf %130, %132 : vector<1x8x8x1xf32>
    %cst_54 = arith.constant 5.000000e-01 : f32
    %134 = vector.broadcast %cst_54 : f32 to vector<1x8x8x1xf32>
    %135 = arith.mulf %134, %133 : vector<1x8x8x1xf32>
    %136 = math.tanh %135 : vector<1x8x8x1xf32>
    %cst_55 = arith.constant 5.000000e-01 : f32
    %137 = vector.broadcast %cst_55 : f32 to vector<1x8x8x1xf32>
    %138 = arith.mulf %137, %136 : vector<1x8x8x1xf32>
    %cst_56 = arith.constant 5.000000e-01 : f32
    %139 = vector.broadcast %cst_56 : f32 to vector<1x8x8x1xf32>
    %140 = arith.addf %138, %139 : vector<1x8x8x1xf32>
    %141 = vector.broadcast %47 : vector<1x1x1x32xf32> to vector<1x8x8x32xf32>
    %142 = arith.mulf %0, %141 : vector<1x8x8x32xf32>
    %cst_57 = arith.constant 0.000000e+00 : f32
    %143 = vector.broadcast %cst_57 : f32 to vector<1x1x8x32xf32>
    %144 = vector.extract_strided_slice %142 {offsets = [0, 0, 0, 0], sizes = [1, 7, 8, 32], strides = [1, 1, 1, 1]} : vector<1x8x8x32xf32> to vector<1x7x8x32xf32>
    %145 = tpu.concatenate %143, %144 in 1 : vector<1x1x8x32xf32>, vector<1x7x8x32xf32> -> vector<1x8x8x32xf32>
    %146 = vector.extract_strided_slice %142 {offsets = [0, 1, 0, 0], sizes = [1, 7, 8, 32], strides = [1, 1, 1, 1]} : vector<1x8x8x32xf32> to vector<1x7x8x32xf32>
    %147 = tpu.concatenate %146, %143 in 1 : vector<1x7x8x32xf32>, vector<1x1x8x32xf32> -> vector<1x8x8x32xf32>
    %148 = tpu.iota {dimensions = array<i32: 2>} : vector<1x1x8x1xi32>
    %c1_i32_58 = arith.constant 1 : i32
    %149 = vector.broadcast %c1_i32_58 : i32 to vector<1x1x8x1xi32>
    %150 = arith.minsi %148, %149 : vector<1x1x8x1xi32>
    %151 = arith.sitofp %150 : vector<1x1x8x1xi32> to vector<1x1x8x1xf32>
    %c7_i32_59 = arith.constant 7 : i32
    %152 = vector.broadcast %c7_i32_59 : i32 to vector<1x1x8x1xi32>
    %153 = arith.subi %152, %148 : vector<1x1x8x1xi32>
    %c1_i32_60 = arith.constant 1 : i32
    %154 = vector.broadcast %c1_i32_60 : i32 to vector<1x1x8x1xi32>
    %155 = arith.minsi %153, %154 : vector<1x1x8x1xi32>
    %156 = arith.sitofp %155 : vector<1x1x8x1xi32> to vector<1x1x8x1xf32>
    %c1_i32_61 = arith.constant 1 : i32
    %157 = tpu.dynamic_rotate %145 by %c1_i32_61 dim 2 : vector<1x8x8x32xf32>, i32 -> vector<1x8x8x32xf32>
    %158 = vector.broadcast %151 : vector<1x1x8x1xf32> to vector<1x8x8x32xf32>
    %159 = arith.mulf %157, %158 : vector<1x8x8x32xf32>
    %c7_i32_62 = arith.constant 7 : i32
    %160 = tpu.dynamic_rotate %145 by %c7_i32_62 dim 2 : vector<1x8x8x32xf32>, i32 -> vector<1x8x8x32xf32>
    %161 = vector.broadcast %156 : vector<1x1x8x1xf32> to vector<1x8x8x32xf32>
    %162 = arith.mulf %160, %161 : vector<1x8x8x32xf32>
    %c1_i32_63 = arith.constant 1 : i32
    %163 = tpu.dynamic_rotate %142 by %c1_i32_63 dim 2 : vector<1x8x8x32xf32>, i32 -> vector<1x8x8x32xf32>
    %164 = vector.broadcast %151 : vector<1x1x8x1xf32> to vector<1x8x8x32xf32>
    %165 = arith.mulf %163, %164 : vector<1x8x8x32xf32>
    %c7_i32_64 = arith.constant 7 : i32
    %166 = tpu.dynamic_rotate %142 by %c7_i32_64 dim 2 : vector<1x8x8x32xf32>, i32 -> vector<1x8x8x32xf32>
    %167 = vector.broadcast %156 : vector<1x1x8x1xf32> to vector<1x8x8x32xf32>
    %168 = arith.mulf %166, %167 : vector<1x8x8x32xf32>
    %c1_i32_65 = arith.constant 1 : i32
    %169 = tpu.dynamic_rotate %147 by %c1_i32_65 dim 2 : vector<1x8x8x32xf32>, i32 -> vector<1x8x8x32xf32>
    %170 = vector.broadcast %151 : vector<1x1x8x1xf32> to vector<1x8x8x32xf32>
    %171 = arith.mulf %169, %170 : vector<1x8x8x32xf32>
    %c7_i32_66 = arith.constant 7 : i32
    %172 = tpu.dynamic_rotate %147 by %c7_i32_66 dim 2 : vector<1x8x8x32xf32>, i32 -> vector<1x8x8x32xf32>
    %173 = vector.broadcast %156 : vector<1x1x8x1xf32> to vector<1x8x8x32xf32>
    %174 = arith.mulf %172, %173 : vector<1x8x8x32xf32>
    %175 = tpu.concatenate %159, %145, %162, %165, %142, %168, %171, %147, %174 in 3 : vector<1x8x8x32xf32>, vector<1x8x8x32xf32>, vector<1x8x8x32xf32>, vector<1x8x8x32xf32>, vector<1x8x8x32xf32>, vector<1x8x8x32xf32>, vector<1x8x8x32xf32>, vector<1x8x8x32xf32>, vector<1x8x8x32xf32> -> vector<1x8x8x288xf32>
    %176 = arith.truncf %175 : vector<1x8x8x288xf32> to vector<1x8x8x288xbf16>
    %177 = vector.shape_cast %176 : vector<1x8x8x288xbf16> to vector<64x288xbf16>
    %c0_67 = arith.constant 0 : index
    %c0_68 = arith.constant 0 : index
    %178 = vector.load %arg11[%c0_67, %c0_68] : memref<288x64xbf16, #tpu.memory_space<vmem>>, vector<288x64xbf16>
    %cst_69 = arith.constant dense<0.000000e+00> : vector<64x64xf32>
    %179 = tpu.matmul %177, %178, %cst_69 {dimension_numbers = #tpu.dot_dimension_numbers<[1], [0], [0], [1], [0, 0, 1, 1], [], []>} : vector<64x288xbf16>, vector<288x64xbf16>, vector<64x64xf32> -> vector<64x64xf32>
    %c0_70 = arith.constant 0 : index
    %c0_71 = arith.constant 0 : index
    %180 = vector.load %arg12[%c0_70, %c0_71] : memref<1x64xf32, #tpu.memory_space<vmem>>, vector<1x64xf32>
    %181 = vector.broadcast %180 : vector<1x64xf32> to vector<64x64xf32>
    %182 = arith.mulf %179, %181 : vector<64x64xf32>
    %c0_72 = arith.constant 0 : index
    %c0_73 = arith.constant 0 : index
    %183 = vector.load %arg13[%c0_72, %c0_73] : memref<1x64xf32, #tpu.memory_space<vmem>>, vector<1x64xf32>
    %184 = vector.broadcast %183 : vector<1x64xf32> to vector<64x64xf32>
    %185 = arith.addf %182, %184 : vector<64x64xf32>
    %cst_74 = arith.constant 0.000000e+00 : f32
    %186 = vector.broadcast %cst_74 : f32 to vector<64x64xf32>
    %187 = arith.cmpf ogt, %185, %186 : vector<64x64xf32>
    %cst_75 = arith.constant 0.000000e+00 : f32
    %188 = vector.broadcast %cst_75 : f32 to vector<64x64xf32>
    %189 = arith.minimumf %185, %188 : vector<64x64xf32>
    %190 = math.exp %189 : vector<64x64xf32>
    %cst_76 = arith.constant 1.000000e+00 : f32
    %191 = vector.broadcast %cst_76 : f32 to vector<64x64xf32>
    %192 = arith.subf %190, %191 : vector<64x64xf32>
    %193 = arith.select %187, %185, %192 : vector<64x64xi1>, vector<64x64xf32>
    %194 = vector.shape_cast %193 : vector<64x64xf32> to vector<1x8x8x64xf32>
    %cst_77 = arith.constant 0.000000e+00 : f32
    %195 = vector.broadcast %cst_77 : f32 to vector<1x1x8x64xf32>
    %196 = vector.extract_strided_slice %194 {offsets = [0, 0, 0, 0], sizes = [1, 7, 8, 64], strides = [1, 1, 1, 1]} : vector<1x8x8x64xf32> to vector<1x7x8x64xf32>
    %197 = tpu.concatenate %195, %196 in 1 : vector<1x1x8x64xf32>, vector<1x7x8x64xf32> -> vector<1x8x8x64xf32>
    %198 = vector.extract_strided_slice %194 {offsets = [0, 1, 0, 0], sizes = [1, 7, 8, 64], strides = [1, 1, 1, 1]} : vector<1x8x8x64xf32> to vector<1x7x8x64xf32>
    %199 = tpu.concatenate %198, %195 in 1 : vector<1x7x8x64xf32>, vector<1x1x8x64xf32> -> vector<1x8x8x64xf32>
    %200 = tpu.iota {dimensions = array<i32: 2>} : vector<1x1x8x1xi32>
    %c1_i32_78 = arith.constant 1 : i32
    %201 = vector.broadcast %c1_i32_78 : i32 to vector<1x1x8x1xi32>
    %202 = arith.minsi %200, %201 : vector<1x1x8x1xi32>
    %203 = arith.sitofp %202 : vector<1x1x8x1xi32> to vector<1x1x8x1xf32>
    %c7_i32_79 = arith.constant 7 : i32
    %204 = vector.broadcast %c7_i32_79 : i32 to vector<1x1x8x1xi32>
    %205 = arith.subi %204, %200 : vector<1x1x8x1xi32>
    %c1_i32_80 = arith.constant 1 : i32
    %206 = vector.broadcast %c1_i32_80 : i32 to vector<1x1x8x1xi32>
    %207 = arith.minsi %205, %206 : vector<1x1x8x1xi32>
    %208 = arith.sitofp %207 : vector<1x1x8x1xi32> to vector<1x1x8x1xf32>
    %c1_i32_81 = arith.constant 1 : i32
    %209 = tpu.dynamic_rotate %197 by %c1_i32_81 dim 2 : vector<1x8x8x64xf32>, i32 -> vector<1x8x8x64xf32>
    %210 = vector.broadcast %203 : vector<1x1x8x1xf32> to vector<1x8x8x64xf32>
    %211 = arith.mulf %209, %210 : vector<1x8x8x64xf32>
    %c7_i32_82 = arith.constant 7 : i32
    %212 = tpu.dynamic_rotate %197 by %c7_i32_82 dim 2 : vector<1x8x8x64xf32>, i32 -> vector<1x8x8x64xf32>
    %213 = vector.broadcast %208 : vector<1x1x8x1xf32> to vector<1x8x8x64xf32>
    %214 = arith.mulf %212, %213 : vector<1x8x8x64xf32>
    %c1_i32_83 = arith.constant 1 : i32
    %215 = tpu.dynamic_rotate %194 by %c1_i32_83 dim 2 : vector<1x8x8x64xf32>, i32 -> vector<1x8x8x64xf32>
    %216 = vector.broadcast %203 : vector<1x1x8x1xf32> to vector<1x8x8x64xf32>
    %217 = arith.mulf %215, %216 : vector<1x8x8x64xf32>
    %c7_i32_84 = arith.constant 7 : i32
    %218 = tpu.dynamic_rotate %194 by %c7_i32_84 dim 2 : vector<1x8x8x64xf32>, i32 -> vector<1x8x8x64xf32>
    %219 = vector.broadcast %208 : vector<1x1x8x1xf32> to vector<1x8x8x64xf32>
    %220 = arith.mulf %218, %219 : vector<1x8x8x64xf32>
    %c1_i32_85 = arith.constant 1 : i32
    %221 = tpu.dynamic_rotate %199 by %c1_i32_85 dim 2 : vector<1x8x8x64xf32>, i32 -> vector<1x8x8x64xf32>
    %222 = vector.broadcast %203 : vector<1x1x8x1xf32> to vector<1x8x8x64xf32>
    %223 = arith.mulf %221, %222 : vector<1x8x8x64xf32>
    %c7_i32_86 = arith.constant 7 : i32
    %224 = tpu.dynamic_rotate %199 by %c7_i32_86 dim 2 : vector<1x8x8x64xf32>, i32 -> vector<1x8x8x64xf32>
    %225 = vector.broadcast %208 : vector<1x1x8x1xf32> to vector<1x8x8x64xf32>
    %226 = arith.mulf %224, %225 : vector<1x8x8x64xf32>
    %227 = tpu.concatenate %211, %197, %214, %217, %194, %220, %223, %199, %226 in 3 : vector<1x8x8x64xf32>, vector<1x8x8x64xf32>, vector<1x8x8x64xf32>, vector<1x8x8x64xf32>, vector<1x8x8x64xf32>, vector<1x8x8x64xf32>, vector<1x8x8x64xf32>, vector<1x8x8x64xf32>, vector<1x8x8x64xf32> -> vector<1x8x8x576xf32>
    %228 = arith.truncf %227 : vector<1x8x8x576xf32> to vector<1x8x8x576xbf16>
    %229 = vector.shape_cast %228 : vector<1x8x8x576xbf16> to vector<64x576xbf16>
    %c0_87 = arith.constant 0 : index
    %c0_88 = arith.constant 0 : index
    %230 = vector.load %arg14[%c0_87, %c0_88] : memref<576x32xbf16, #tpu.memory_space<vmem>>, vector<576x32xbf16>
    %cst_89 = arith.constant dense<0.000000e+00> : vector<64x32xf32>
    %231 = tpu.matmul %229, %230, %cst_89 {dimension_numbers = #tpu.dot_dimension_numbers<[1], [0], [0], [1], [0, 0, 1, 1], [], []>} : vector<64x576xbf16>, vector<576x32xbf16>, vector<64x32xf32> -> vector<64x32xf32>
    %c0_90 = arith.constant 0 : index
    %c0_91 = arith.constant 0 : index
    %232 = vector.load %arg15[%c0_90, %c0_91] : memref<1x32xf32, #tpu.memory_space<vmem>>, vector<1x32xf32>
    %233 = vector.broadcast %232 : vector<1x32xf32> to vector<64x32xf32>
    %234 = arith.mulf %231, %233 : vector<64x32xf32>
    %c0_92 = arith.constant 0 : index
    %c0_93 = arith.constant 0 : index
    %235 = vector.load %arg16[%c0_92, %c0_93] : memref<1x32xf32, #tpu.memory_space<vmem>>, vector<1x32xf32>
    %236 = vector.broadcast %235 : vector<1x32xf32> to vector<64x32xf32>
    %237 = arith.addf %234, %236 : vector<64x32xf32>
    %cst_94 = arith.constant 0.000000e+00 : f32
    %238 = vector.broadcast %cst_94 : f32 to vector<64x32xf32>
    %239 = arith.cmpf ogt, %237, %238 : vector<64x32xf32>
    %cst_95 = arith.constant 0.000000e+00 : f32
    %240 = vector.broadcast %cst_95 : f32 to vector<64x32xf32>
    %241 = arith.minimumf %237, %240 : vector<64x32xf32>
    %242 = math.exp %241 : vector<64x32xf32>
    %cst_96 = arith.constant 1.000000e+00 : f32
    %243 = vector.broadcast %cst_96 : f32 to vector<64x32xf32>
    %244 = arith.subf %242, %243 : vector<64x32xf32>
    %245 = arith.select %239, %237, %244 : vector<64x32xi1>, vector<64x32xf32>
    %246 = vector.shape_cast %245 : vector<64x32xf32> to vector<1x8x8x32xf32>
    %cst_97 = arith.constant 1.000000e+00 : f32
    %247 = vector.broadcast %cst_97 : f32 to vector<1x8x8x1xf32>
    %248 = arith.subf %247, %140 : vector<1x8x8x1xf32>
    %249 = vector.broadcast %43 : vector<1x1x1x32xf32> to vector<1x8x8x32xf32>
    %250 = vector.broadcast %248 : vector<1x8x8x1xf32> to vector<1x8x8x32xf32>
    %251 = arith.mulf %249, %250 : vector<1x8x8x32xf32>
    %252 = vector.broadcast %45 : vector<1x1x1x32xf32> to vector<1x8x8x32xf32>
    %253 = vector.broadcast %140 : vector<1x8x8x1xf32> to vector<1x8x8x32xf32>
    %254 = arith.mulf %252, %253 : vector<1x8x8x32xf32>
    %255 = arith.addf %251, %254 : vector<1x8x8x32xf32>
    %256 = arith.mulf %0, %255 : vector<1x8x8x32xf32>
    %257 = vector.broadcast %140 : vector<1x8x8x1xf32> to vector<1x8x8x32xf32>
    %258 = arith.mulf %246, %257 : vector<1x8x8x32xf32>
    %259 = arith.addf %256, %258 : vector<1x8x8x32xf32>
    %c0_98 = arith.constant 0 : index
    %c0_99 = arith.constant 0 : index
    %c0_100 = arith.constant 0 : index
    %c0_101 = arith.constant 0 : index
    %260 = vector.load %arg17[%c0_98, %c0_99, %c0_100, %c0_101] : memref<1x8x8x32xf32, #tpu.memory_space<vmem>>, vector<1x8x8x32xf32>
    tpu.vector_store %arg17[%c0_98, %c0_99, %c0_100, %c0_101], %259 {strides = array<i32>} : memref<1x8x8x32xf32, #tpu.memory_space<vmem>>, vector<1x8x8x32xf32>,
    return
  }
  func.func @transform_0(%arg0: i32) -> (i32, i32, i32, i32) {
    %c0_i32 = arith.constant 0 : i32
    %c0_i32_0 = arith.constant 0 : i32
    %c0_i32_1 = arith.constant 0 : i32
    %c0_i32_2 = arith.constant 0 : i32
    return %arg0, %c0_i32, %c0_i32_0, %c0_i32_1 : i32, i32, i32, i32
  }
  func.func @transform_1(%arg0: i32) -> (i32, i32, i32) {
    %c0_i32 = arith.constant 0 : i32
    %c0_i32_0 = arith.constant 0 : i32
    %c0_i32_1 = arith.constant 0 : i32
    %c0_i32_2 = arith.constant 0 : i32
    return %c0_i32, %c0_i32_0, %c0_i32_1 : i32, i32, i32
  }
  func.func @transform_2(%arg0: i32) -> (i32, i32, i32) {
    %c0_i32 = arith.constant 0 : i32
    %c0_i32_0 = arith.constant 0 : i32
    %c0_i32_1 = arith.constant 0 : i32
    %c0_i32_2 = arith.constant 0 : i32
    return %c0_i32, %c0_i32_0, %c0_i32_1 : i32, i32, i32
  }
  func.func @transform_3(%arg0: i32) -> (i32, i32) {
    %c0_i32 = arith.constant 0 : i32
    %c0_i32_0 = arith.constant 0 : i32
    %c0_i32_1 = arith.constant 0 : i32
    return %c0_i32, %c0_i32_0 : i32, i32
  }
  func.func @transform_4(%arg0: i32) -> (i32, i32, i32) {
    %c0_i32 = arith.constant 0 : i32
    %c0_i32_0 = arith.constant 0 : i32
    %c0_i32_1 = arith.constant 0 : i32
    %c0_i32_2 = arith.constant 0 : i32
    return %c0_i32, %c0_i32_0, %c0_i32_1 : i32, i32, i32
  }
  func.func @transform_5(%arg0: i32) -> (i32, i32) {
    %c0_i32 = arith.constant 0 : i32
    %c0_i32_0 = arith.constant 0 : i32
    %c0_i32_1 = arith.constant 0 : i32
    return %c0_i32, %c0_i32_0 : i32, i32
  }
  func.func @transform_6(%arg0: i32) -> (i32, i32) {
    %c0_i32 = arith.constant 0 : i32
    %c0_i32_0 = arith.constant 0 : i32
    %c0_i32_1 = arith.constant 0 : i32
    return %c0_i32, %c0_i32_0 : i32, i32
  }
  func.func @transform_7(%arg0: i32) -> (i32, i32) {
    %c0_i32 = arith.constant 0 : i32
    %c0_i32_0 = arith.constant 0 : i32
    %c0_i32_1 = arith.constant 0 : i32
    return %c0_i32, %c0_i32_0 : i32, i32
  }
  func.func @transform_8(%arg0: i32) -> (i32, i32) {
    %c0_i32 = arith.constant 0 : i32
    %c0_i32_0 = arith.constant 0 : i32
    %c0_i32_1 = arith.constant 0 : i32
    return %c0_i32, %c0_i32_0 : i32, i32
  }
  func.func @transform_9(%arg0: i32) -> (i32, i32) {
    %c0_i32 = arith.constant 0 : i32
    %c0_i32_0 = arith.constant 0 : i32
    %c0_i32_1 = arith.constant 0 : i32
    return %c0_i32, %c0_i32_0 : i32, i32
  }
  func.func @transform_10(%arg0: i32) -> (i32, i32) {
    %c0_i32 = arith.constant 0 : i32
    %c0_i32_0 = arith.constant 0 : i32
    %c0_i32_1 = arith.constant 0 : i32
    return %c0_i32, %c0_i32_0 : i32, i32
  }
  func.func @transform_11(%arg0: i32) -> (i32, i32) {
    %c0_i32 = arith.constant 0 : i32
    %c0_i32_0 = arith.constant 0 : i32
    %c0_i32_1 = arith.constant 0 : i32
    return %c0_i32, %c0_i32_0 : i32, i32
  }
  func.func @transform_12(%arg0: i32) -> (i32, i32) {
    %c0_i32 = arith.constant 0 : i32
    %c0_i32_0 = arith.constant 0 : i32
    %c0_i32_1 = arith.constant 0 : i32
    return %c0_i32, %c0_i32_0 : i32, i32
  }
  func.func @transform_13(%arg0: i32) -> (i32, i32) {
    %c0_i32 = arith.constant 0 : i32
    %c0_i32_0 = arith.constant 0 : i32
    %c0_i32_1 = arith.constant 0 : i32
    return %c0_i32, %c0_i32_0 : i32, i32
  }
  func.func @transform_14(%arg0: i32) -> (i32, i32) {
    %c0_i32 = arith.constant 0 : i32
    %c0_i32_0 = arith.constant 0 : i32
    %c0_i32_1 = arith.constant 0 : i32
    return %c0_i32, %c0_i32_0 : i32, i32
  }
  func.func @transform_15(%arg0: i32) -> (i32, i32) {
    %c0_i32 = arith.constant 0 : i32
    %c0_i32_0 = arith.constant 0 : i32
    %c0_i32_1 = arith.constant 0 : i32
    return %c0_i32, %c0_i32_0 : i32, i32
  }
  func.func @transform_16(%arg0: i32) -> (i32, i32, i32, i32) {
    %c0_i32 = arith.constant 0 : i32
    %c0_i32_0 = arith.constant 0 : i32
    %c0_i32_1 = arith.constant 0 : i32
    %c0_i32_2 = arith.constant 0 : i32
    return %arg0, %c0_i32, %c0_i32_0, %c0_i32_1 : i32, i32, i32, i32
  }
}

</mosaic_0001>

<bundles_post_ra>
// kernel: urasc_forward.1
= control target key start
LH: loop header
LB: loop body
LE: loop exit
PB: predicated region body
PF: predicated region fallthrough
CT: control target
= control target key end

     0   :  { %s6369_s0 = inlined_call_operand.vmem [shape: f32[2,8,8,32], index: 0, kind: input, shape index: {}]   ;;  %s6370_s1 = inlined_call_operand.vmem [shape: f32[3,2,32], index: 1, kind: input, shape index: {}]   ;;  %s6371_s2 = inlined_call_operand.vmem [shape: f32[3,2,32], index: 2, kind: input, shape index: {}]   ;;  %s6372_s3 = inlined_call_operand.vmem [shape: f32[3,2], index: 3, kind: input, shape index: {}]   ;;  %s6373_s4 = inlined_call_operand.vmem [shape: f32[3,2,32], index: 4, kind: input, shape index: {}]   ;;  %s6374_s5 = inlined_call_operand.vmem [shape: f32[3,32], index: 5, kind: input, shape index: {}]   ;;  %s6375_s6 = inlined_call_operand.vmem [shape: bf16[288,2], index: 6, kind: input, shape index: {}]   ;;  %s6376_s7 = inlined_call_operand.vmem [shape: f32[1,2], index: 7, kind: input, shape index: {}]   ;;  %s6377_s8 = inlined_call_operand.vmem [shape: f32[1,18], index: 8, kind: input, shape index: {}]   ;;  %s6378_s9 = inlined_call_operand.<no memory space> [shape: f32[1,1], index: 9, kind: input, shape index: {}]   ;;  %s6379_s10 = inlined_call_operand.vmem [shape: bf16[288,64], index: 10, kind: input, shape index: {}]   ;;  %s6380_s11 = inlined_call_operand.vmem [shape: f32[1,64], index: 11, kind: input, shape index: {}]   ;;  %s6381_s12 = inlined_call_operand.vmem [shape: f32[1,64], index: 12, kind: input, shape index: {}]   ;;  %s6382_s13 = inlined_call_operand.vmem [shape: bf16[576,32], index: 13, kind: input, shape index: {}]   ;;  %s6383_s14 = inlined_call_operand.vmem [shape: f32[1,32], index: 14, kind: input, shape index: {}]   ;;  %s6384_s15 = inlined_call_operand.vmem [shape: f32[1,32], index: 15, kind: input, shape index: {}]   ;;  %s6385_s16 = inlined_call_operand.hbm [shape: f32[2,8,8,32], index: 16, kind: output, shape index: {}]  }
   0x1   :  { %6404 = sst [smem:[#allocation25_spill]] %s6369_s0  ;;  %v21_v0 = vstv %s6378_s9 }
   0x2   :  { %6405 = sst [smem:[#allocation26_spill]] %s6375_s6  ;;  %22 = vst [vmem:[#allocation2] sm:$0x1] %v21_v0 }
   0x3   :  { %23 = vsyncpa [#allocation4], 0 }
   0x4   :  { %25 = vsyncpa [#allocation4 + $0x1], 0  ;;  %s4620_s23 = smov 0   ;;  %s4622_s24 = smov 0  }
   0x5   :  { %s4624_s25 = smov 0   ;;  %s4626_s26 = smov 0  }
   0x6 LB: > { %6406 = sst [smem:[#allocation6_spill]] %s4503_s23  ;;  %s4641_s9 = sadd.s32 4294967295, %s4515_s26   ;;  %s4515_s26 = sphi %s4626_s26, %s6449_s26   ;;  %s4511_s25 = sphi %s4624_s25, %s6451_s25   ;;  %s4507_s24 = sphi %s4622_s24, %s6453_s24   ;;  %s4503_s23 = sphi %s4620_s23, %s6452_s23  }
   0x7   : > { %6407 = sst [smem:[#allocation7_spill]] %s4511_s25  ;;  %s3552_s27 = sadd.s32 4294967294, %s4515_s26  }
   0x8   : > { %6408 = sst [smem:[#allocation8_spill]] %s4515_s26  ;;  %s4645_s28 = sadd.s32 1, %s4515_s26  }
   0x9   : > { %6409 = sst [smem:[#allocation9_spill]] %s4645_s28  ;;  %s379_s29 = sadd.s32 1, %s4511_s25 }
   0xa   : > { %s376_s30 = ssub.s32 %s4515_s26, %s4645_s28  ;;  %p389_p0 = scmp.ne.s32.totalorder %s4511_s25, %s4507_s24 }
   0xb   : > { %p377_p1 = scmp.eq.s32.totalorder %s376_s30, 0  ;;  %p390_p2 = scmp.eq.s32.totalorder %s4641_s9, 1 }
   0xc   : > { %p395_p3 = scmp.ne.s32.totalorder %s4507_s24, %s4503_s23  ;;  %p396_p4 = scmp.eq.s32.totalorder %s3552_s27, 1 }
   0xd   : > { %s4656_s0 = scalar_select %p377_p1, %s4511_s25, %s379_s29  }
   0xe   : > { %p4658_p5 = por %p390_p2, %p389_p0  ;;  %p4662_p6 = por %p396_p4, %p395_p3 }
   0xf   : > { %6410 = sst [smem:[#allocation10_spill]] %s4656_s0  ;;  %p3555_p7 = scmp.ge.s32.totalorder %s4515_s26, 1 }
  0x10   : > { %s6412_s18 = scalar_select %p4662_p6, 1, 0 }
  0x11   : > { %p467_p8 = scmp.lt.s32.totalorder %s4515_s26, 3 }
  0x12   : > { %6413 = sst [smem:[#allocation11_spill]] %s6412_s18 }
  0x13   : > { %p468_p9 = pnand %p3555_p7, %p467_p8 }
  0x15   : > { %471 = sbr.rel (%p468_p9) target bundleno = 1336 (0x538), region = 84 }
  0x1c   : > { %p517_p10 = scmp.lt.s32.totalorder %s4641_s9, 1  ;;  %v612_v1 = vlaneseq  ;;  %v610_v2 = vld [vmem:[%s6372_s3] sm:$0x7]  ;;  %vm531_vm0 = vcmask 261120   ;;  %s6415_s30 = sld [smem:[#allocation25_spill]]  ;;  %vm582_vm1 = vcmask 254976  }
  0x1d   : > { %v594_v53 = vld [vmem:[%s6371_s2 + $0x4] sm:$0x3]  ;;  %v4517_v63 = vmov 0   ;;  %s6386_s27 = smov 32   ;;  %s6391_s29 = smov 64   ;;  %vm929_vm4 = vcmask 523264  }
  0x1e   : > { %s518_s21 = scalar_select %p517_p10, %s4641_s9, 1  ;;  %v4673_v3 = vshrl.u32 %v612_v1, 7  ;;  %v578_v57 = vld [vmem:[%s6370_s1 + $0x4] sm:$0x3]  ;;  %4028 = vset.pattern.permute.xlu1 %v4517_v63  ;;  %4314 = vset.pattern.permute.xlu0 %v4517_v63  ;;  %vm938_vm5 = vcmask 785408   ;;  %vm1613_vm6 = vcmask 15360  }
  0x1f   : > { %s6416_s6 = sld [smem:[#allocation26_spill]]  ;;  %s6417_s25 = smov 96   ;;  %vm1622_vm7 = vcmask 31744   ;;  %vm1631_vm8 = vcmask 48128  }
  0x20   : > { %6414 = vst [vmem:[#allocation12_spill] sm:$0xff] %v4673_v3  ;;  %s3712_s22 = sshll.u32 %s518_s21, 6  ;;  %v628_v4 = vsub.s32 2, %v4673_v3  ;;  %v712_v0 = vsub.s32 7, %v4673_v3  ;;  %vm709_vm3 = vcmp.lt.s32.totalorder %v4673_v3, 1  ;;  %s6418_s21 = smov 32  }
  0x21   : > { %s4523_s28 = smov 8   ;;  %s4525_s26 = smov 6  }
  0x22   : > { %s4679_s0 = scalar_lea.vmem %s6415_s30, %s3712_s22  ;;  %v629_v8 = vrot.slane %v610_v2, %v628_v4  ;;  %vm713_vm2 = vcmp.lt.s32.totalorder %v712_v0, 1  ;;  %s6388_s30 = smov 96  }
  0x23   : > { %v4682_v5 = vld [vmem:[%s4679_s0] sm:$0xff]  ;;  %v4685_v6 = vld [vmem:[%s4679_s0 + $0x8] sm:$0xff]  ;;  %v4688_v7 = vld [vmem:[%s4679_s0 + $0x10] sm:$0xff]  ;;  %v714_v1 = vsel %vm713_vm2, %v712_v0, 1  ;;  %v6398_v0 = vmov 0.0   ;;  %s4526_s23 = smov 10  }
  0x24   : > { %v4691_v9 = vld [vmem:[%s4679_s0 + $0x18] sm:$0xff]  ;;  %v4694_v10 = vld [vmem:[%s4679_s0 + $0x20] sm:$0xff]  ;;  %v4697_v11 = vld [vmem:[%s4679_s0 + $0x28] sm:$0xff]  ;;  %v532_v12 = vsel %vm531_vm0, %v4682_v5, 0.0  ;;  %v533_v13 = vsel %vm531_vm0, %v4685_v6, 0.0  ;;  %v535_v14 = vsel %vm531_vm0, %v4688_v7, 0.0  ;;  %v4752_v2 = vcvt.s32.f32 %v714_v1 }
  0x25   : > { %v4706_v15 = vld [vmem:[%s4679_s0 + $0x30] sm:$0xff]  ;;  %v534_v16 = vadd.f32 %v533_v13, %v532_v12  ;;  %v537_v17 = vsel %vm531_vm0, %v4691_v9, 0.0  ;;  %631 = vbcast.lane.b32.xlu1 %v629_v8, 256  ;;  %v539_v18 = vsel %vm531_vm0, %v4694_v10, 0.0  ;;  %v541_v19 = vsel %vm531_vm0, %v4697_v11, 0.0  ;;  %v4719_v22 = vld [vmem:[%s4679_s0 + $0x38] sm:$0xff] }
  0x26   : > { %v555_v20 = vsel %vm531_vm0, %v4682_v5, -inf  ;;  %v556_v21 = vsel %vm531_vm0, %v4685_v6, -inf  ;;  %v557_v24 = vsel %vm531_vm0, %v4688_v7, -inf  ;;  %v558_v25 = vsel %vm531_vm0, %v4691_v9, -inf  ;;  %v4319_v63 = vld [vmem:[%s6416_s6 + $0x50] sm:$0xff]   ;;  %s3754_s19 = sshll.u32 %s4641_s9, 10 }
  0x27   : > { %v536_v23 = vadd.f32 %v535_v14, %v534_v16  ;;  %v559_v26 = vsel %vm531_vm0, %v4694_v10, -inf  ;;  %v561_v28 = vsel %vm531_vm0, %v4697_v11, -inf  ;;  %v563_v29 = vsel %vm531_vm0, %v4706_v15, -inf }
  0x28   : > { %v560_v27 = vmax.f32 %v555_v20, %v559_v26  ;;  %v565_v30 = vsel %vm531_vm0, %v4719_v22, -inf  ;;  %v562_v32 = vmax.f32 %v556_v21, %v561_v28  ;;  %v564_v33 = vmax.f32 %v557_v24, %v563_v29 }
  0x29   : > { %v538_v31 = vadd.f32 %v537_v17, %v536_v23  ;;  %v566_v34 = vmax.f32 %v558_v25, %v565_v30  ;;  %v543_v35 = vsel %vm531_vm0, %v4706_v15, 0.0  ;;  %v545_v36 = vsel %vm531_vm0, %v4719_v22, 0.0 }
  0x2a   : > { %v567_v38 = vmax.f32 %v560_v27, %v562_v32  ;;  %v731_v4 = vrot.slane %v4682_v5, 1  ;;  %v732_v8 = vrot.slane %v4685_v6, 1  ;;  %v733_v16 = vrot.slane %v4688_v7, 1 }
  0x2b   : > { %v540_v37 = vadd.f32 %v539_v18, %v538_v31  ;;  %v568_v39 = vmax.f32 %v564_v33, %v566_v34  ;;  %v710_v17 = vsel %vm709_vm3, %v4673_v3, 1  ;;  %v4770_v18 = vpack.i.bf16 %v4688_v7, %v4685_v6 }
  0x2c   : > { %v4757_v12 = vmul.f32 %v731_v4, %v4752_v2  ;;  %v4760_v13 = vmul.f32 %v732_v8, %v4752_v2  ;;  %v718_v20 = vrot.slane %v4688_v7, 7  ;;  %v4776_v21 = vmul.f32 %v733_v16, %v4752_v2  ;;  %v4320_v8 = vld [vmem:[%s6416_s6 + $0x10] sm:$0xff]  }
  0x2d   : > { %v542_v40 = vadd.f32 %v541_v19, %v540_v37  ;;  %v569_v41 = vmax.f32 %v567_v38, %v568_v39  ;;  %v4772_v19 = vcvt.s32.f32 %v710_v17  ;;  %v719_v23 = vrot.slane %v4691_v9, 7 }
  0x2e   : > { %v4029_v14 = vpack.i.bf16 %v4760_v13, %v4757_v12  ;;  %v4074_v24 = vpack.i.bf16 %v4776_v21, %v4760_v13  ;;  %v734_v28 = vrot.slane %v4691_v9, 1  ;;  %v735_v29 = vrot.slane %v4694_v10, 1 }
  0x2f   : > { %v544_v42 = vadd.f32 %v543_v35, %v542_v40  ;;  %v570_v43 = vrot.slane %v569_v41, 4  ;;  %v4784_v25 = vmul.f32 %v718_v20, %v4772_v19  ;;  %v4787_v26 = vmul.f32 %v719_v23, %v4772_v19  ;;  %v4322_v20 = vld [vmem:[%s6416_s6 + $0x18] sm:$0xff]   ;;  %v4323_v23 = vld [vmem:[%s6416_s6 + $0x60] sm:$0xff]  }
  0x30   : > { %v4797_v30 = vpack.i.bf16 %v4694_v10, %v4691_v9  ;;  %v4800_v31 = vmul.f32 %v734_v28, %v4752_v2  ;;  %v720_v32 = vrot.slane %v4694_v10, 7  ;;  %v4804_v33 = vmul.f32 %v735_v29, %v4752_v2  ;;  %v4324_v28 = vld [vmem:[%s6416_s6 + $0x20] sm:$0xff]   ;;  %v4325_v29 = vld [vmem:[%s6416_s6 + $0x68] sm:$0xff]  }
  0x31   : > { %v546_v44 = vadd.f32 %v545_v36, %v544_v42  ;;  %v571_v45 = vmax.f32 %v569_v41, %v570_v43  ;;  %v4084_v27 = vpack.i.bf16 %v4787_v26, %v4784_v25  ;;  %v721_v34 = vrot.slane %v4697_v11, 7 }
  0x32   : > { %v4104_v35 = vpack.i.bf16 %v4804_v33, %v4800_v31  ;;  %v4812_v36 = vmul.f32 %v720_v32, %v4772_v19  ;;  %v736_v39 = vrot.slane %v4697_v11, 1  ;;  %v737_v40 = vrot.slane %v4706_v15, 1 }
  0x33   : > { %v547_v46 = vrot.slane %v546_v44, 4  ;;  %v572_v47 = vrot.slane %v571_v45, 2  ;;  %v4815_v37 = vmul.f32 %v721_v34, %v4772_v19  ;;  %v4825_v41 = vpack.i.bf16 %v4706_v15, %v4697_v11  ;;  %v4327_v34 = vld [vmem:[%s6416_s6 + $0x70] sm:$0xff]  }
  0x34   : > { %v4828_v42 = vmul.f32 %v736_v39, %v4752_v2  ;;  %v722_v43 = vrot.slane %v4706_v15, 7  ;;  %v4034_v1 = vpack.i.bf16 %v4682_v5, %v6398_v0  ;;  %v4880_v17 = vmul.f32 0.0, %v4752_v2  ;;  %v4329_v39 = vld [vmem:[%s6416_s6 + $0x78] sm:$0xff]  }
  0x35   : > { %v548_v48 = vadd.f32 %v547_v46, %v546_v44  ;;  %v573_v49 = vmax.f32 %v571_v45, %v572_v47  ;;  %v4114_v38 = vpack.i.bf16 %v4815_v37, %v4812_v36  ;;  %v4832_v44 = vmul.f32 %v737_v40, %v4752_v2  ;;  %v4330_v40 = vld [vmem:[%s6416_s6 + $0x80] sm:$0xff]  }
  0x36   : > { %v746_v45 = vrot.slane %v4719_v22, 7  ;;  %v4840_v47 = vmul.f32 %v722_v43, %v4772_v19  ;;  %v4331_v43 = vld [vmem:[%s6416_s6 + $0x38] sm:$0xff]   ;;  %3935 = vmatprep.subr.bf16.mxu1 %v4330_v40  ;;  %vm1640_vm3 = vcmask 64512  }
  0x37   : > { %v549_v50 = vrot.slane %v548_v48, 2  ;;  %v574_v51 = vrot.slane %v573_v49, 1  ;;  %v4134_v46 = vpack.i.bf16 %v4832_v44, %v4828_v42  ;;  %3936 = vmatpush3.bf16.msra.mxu1 %v4330_v40 }
  0x39   : > { %v550_v52 = vadd.f32 %v549_v50, %v548_v48  ;;  %v4740_v55 = vmax.f32 %v573_v49, %v574_v51  ;;  %v4843_v48 = vmul.f32 %v746_v45, %v4772_v19  ;;  %v4315_v50 = vld [vmem:[%s6416_s6 + $0x40] sm:$0xff]   ;;  %v4332_v45 = vld [vmem:[%s6416_s6 + $0x88] sm:$0xff]  }
  0x3a   : > { %v4316_v51 = vld [vmem:[%s6416_s6] sm:$0xff]   ;;  %3755 = vmatprep.subr.bf16.mxu0 %v4315_v50  ;;  %3937 = vmatprep.subr.bf16.mxu1 %v4332_v45  ;;  %v3718_v50 = vpack.c.bf16 %v4804_v33, %v4800_v31 }
  0x3b   : > { %v551_v54 = vrot.slane %v550_v52, 1  ;;  %v597_v59 = vmul.f32 %v594_v53, %v4740_v55  ;;  %v4144_v49 = vpack.i.bf16 %v4843_v48, %v4840_v47  ;;  %3756 = vmatpush3.bf16.msra.mxu0 %v4316_v51  ;;  %v4318_v53 = vld [vmem:[%s6416_s6 + $0x8] sm:$0xff]   ;;  %3938 = vmatpush3.bf16.msra.mxu1 %v4332_v45  ;;  %v4089_v51 = vpack.i.bf16 %v4828_v42, %v4804_v33 }
  0x3d   : > { %v552_v56 = vadd.f32 %v551_v54, %v550_v52  ;;  %v604_v62 = vsel %vm582_vm1, %v597_v59, 0.0  ;;  %v4317_v52 = vld [vmem:[%s6416_s6 + $0x48] sm:$0xff]  }
  0x3e   : > { %3757 = vmatprep.subr.bf16.mxu0 %v4317_v52 }
  0x3f   : > { %v4745_v58 = vmul.f32 0.015625, %v552_v56  ;;  %3758 = vmatpush3.bf16.msra.mxu0 %v4318_v53  ;;  %v4139_v53 = vpack.i.bf16 %v6398_v0, %v4719_v22 }
  0x40   : > { %3759 = vmatprep.subr.bf16.mxu0 %v4319_v63 }
  0x41   : > { %v581_v60 = vmul.f32 %v578_v57, %v4745_v58 }
  0x43   : > { %v589_v61 = vsel %vm582_vm1, %v581_v60, 0.0  ;;  %3760 = vmatpush3.bf16.msra.mxu0 %v4320_v8 }
  0x44   : > { %590 = vadd.xlane.f32.xlu0 %v589_v61  ;;  %v717_v61 = vrot.slane %v4685_v6, 7 }
  0x46   : > { %v4868_v4 = vmul.f32 %v717_v61, %v4772_v19  ;;  %v644_v61 = vld [vmem:[%s6373_s4 + $0x4] sm:$0x3] }
  0x48   : > { %605 = vadd.xlane.f32.xlu0 %v604_v62  ;;  %v4039_v16 = vpack.i.bf16 %v4784_v25, %v4868_v4 }
  0x5e   : > { %4030 = vrot.lane.b32.xlu0 %v4029_v14, %s6386_s27  ;;  %v4321_v14 = vld [vmem:[%s6416_s6 + $0x58] sm:$0xff]  }
  0x5f   : > { %3761 = vmatprep.subr.bf16.mxu0 %v4321_v14 }
  0x60   : > { %3762 = vmatpush3.bf16.msra.mxu0 %v4322_v20 }
  0x61   : > { %3763 = vmatprep.subr.bf16.mxu0 %v4323_v23 }
  0x62   : > { %4065 = vrot.lane.b32.xlu0 %v4770_v18, %s6386_s27 }
  0x64   : > { %3764 = vmatpush3.bf16.msra.mxu0 %v4324_v28 }
  0x65   : > { %3765 = vmatprep.subr.bf16.mxu0 %v4325_v29 }
  0x66   : > { %4075 = vrot.lane.b32.xlu0 %v4074_v24, %s6391_s29  ;;  %v4044_v24 = vpack.i.bf16 %v4757_v12, %v4880_v17  ;;  %v4326_v12 = vld [vmem:[%s6416_s6 + $0x28] sm:$0xff]  }
  0x68   : > { %3766 = vmatpush3.bf16.msra.mxu0 %v4326_v12 }
  0x69   : > { %3767 = vmatprep.subr.bf16.mxu0 %v4327_v34 }
  0x6a   : > { %4085 = vrot.lane.b32.xlu0 %v4084_v27, %s6388_s30  ;;  %v716_v27 = vrot.slane %v4682_v5, 7 }
  0x6c   : > { %v4900_v32 = vmul.f32 %v716_v27, %v4772_v19 }
  0x6e   : > { %4095 = vrot.lane.b32.xlu0 %v4797_v30, %s6386_s27 }
  0x72   : > { %4105 = vrot.lane.b32.xlu0 %v4104_v35, %s6391_s29  ;;  %v4054_v35 = vpack.i.bf16 %v4868_v4, %v4900_v32 }
  0x76   : > { %4115 = vrot.lane.b32.xlu0 %v4114_v38, %s6388_s30  ;;  %v4328_v38 = vld [vmem:[%s6416_s6 + $0x30] sm:$0xff]   ;;  %s4524_s6 = smov 4  }
  0x77   : > { %3768 = vmatpush3.bf16.msra.mxu0 %v4328_v38 }
  0x78   : > { %3769 = vmatprep.subr.bf16.mxu0 %v4329_v39 }
  0x7a   : > { %4125 = vrot.lane.b32.xlu0 %v4825_v41, %s6386_s27  ;;  %s4527_s27 = smov 12  }
  0x7b   : > { %3770 = vmatpush3.bf16.msra.mxu0 %v4331_v43 }
  0x7e   : > { %4135 = vrot.lane.b32.xlu0 %v4134_v46, %s6391_s29  ;;  %s6419_s29 = smov 64   ;;  %v4069_v46 = vpack.i.bf16 %v4812_v36, %v4787_v26 }
  0x82   : > { %4145 = vrot.lane.b32.xlu0 %v4144_v49, %s6417_s25  ;;  %v3715_v49 = vpack.c.bf16 %v4776_v21, %v4760_v13  ;;  %v4099_v13 = vpack.i.bf16 %v4840_v47, %v4815_v37 }
  0x84   : > { %3939 = vmatprep.mubr.msk.bf16.mxu1 %vm531_vm0, %v3715_v49 }
  0x85   : > { %3940 = vmatmul.mubr.msk.bf16.vlgmr.msra.gmra.mrb[0].mxu1 %vm531_vm0, %v3718_v50 }
  0x97   : > { %v632_v57 = vpop.permute.xlu1 %631 }
  0xd1   : > { %v591_v54 = vpop.xlane.xlu0 %590 }
  0xd5   : > { %v606_v56 = vpop.xlane.xlu0 %605 }
  0xd6   : > { %v609_v59 = vadd.f32 %v606_v56, %v591_v54  ;;  %v4969_v56 = vld [vmem:[%s6379_s10 + $0x80] sm:$0xff]  }
  0xd7   : > { %3947 = vmatprep.subr.bf16.mxu0 %v4969_v56 }
  0xd8   : > { %v638_v60 = vadd.f32 %v632_v57, %v609_v59  ;;  %v4339_v57 = vld [vmem:[%s6379_s10 + $0x50] sm:$0xff]  }
  0xd9   : > { %v4031_v59 = vpop.permute.xlu0 %4030 }
  0xda   : > { %v641_v62 = vmax.f32 %v638_v60, 0.0  ;;  %v4032_v29 = vunpack.i.l.bf16 %v4031_v59  ;;  %v4033_v12 = vunpack.i.h.bf16 %v4031_v59 }
  0xdc   : > { %657 = vperm.xlu1 %4028, %v641_v62   ;;  %v947_v43 = vsel %vm531_vm0, %v4682_v5, %v4032_v29  ;;  %v948_v49 = vsel %vm531_vm0, %v4685_v6, %v4033_v12 }
  0xdd   : > { %v4989_v60 = vpop.permute.xlu0 %4065 }
  0xe0   : > { %4035 = vrot.lane.b32.xlu1 %v4034_v1, %s6418_s21 }
  0xe1   : > { %v4994_v1 = vpop.permute.xlu0 %4075 }
  0xe4   : > { %4040 = vrot.lane.b32.xlu1 %v4039_v16, %s6419_s29 }
  0xe5   : > { %v4997_v23 = vpop.permute.xlu0 %4085 }
  0xe8   : > { %4045 = vrot.lane.b32.xlu1 %v4044_v24, %s6419_s29  ;;  %v684_v24 = vld [vmem:[%s6374_s5] sm:$0x7] }
  0xe9   : > { %v5006_v50 = vpop.permute.xlu0 %4095 }
  0xec   : > { %4050 = vrot.lane.b32.xlu1 %v4770_v18, %s6417_s25  ;;  %v4059_v18 = vpack.i.bf16 %v4800_v31, %v4776_v21  ;;  %v748_v21 = vrot.slane %v4719_v22, 1  ;;  %v4335_v22 = vld [vmem:[%s6379_s10 + $0x40] sm:$0xff]  }
  0xed   : > { %3801 = vmatprep.subr.bf16.mxu1 %v4335_v22 }
  0xee   : > { %v749_v31 = vmul.f32 %v748_v21, %v4752_v2 }
  0xf0   : > { %4055 = vrot.lane.b32.xlu1 %v4054_v35, %s6417_s25  ;;  %v4119_v52 = vpack.i.bf16 %v749_v31, %v4832_v44  ;;  %v3724_v54 = vpack.c.bf16 %v4880_v17, %v749_v31  ;;  %v687_v35 = vrot.slane %v684_v24, 2 }
  0xf4   : > { %4060 = vrot.lane.b32.xlu1 %v4059_v18, %s6418_s21 }
  0xf8   : > { %4070 = vrot.lane.b32.xlu1 %v4069_v46, %s6419_s29 }
  0xfc   : > { %4080 = vrot.lane.b32.xlu1 %v4797_v30, %s6417_s25  ;;  %v4954_v30 = vmul.f32 0.0, %v4772_v19 }
  0xfe   : > { %v4129_v33 = vpack.i.bf16 %v4954_v30, %v4843_v48  ;;  %v4338_v48 = vld [vmem:[%s6379_s10 + $0x8] sm:$0xff]  }
 0x100   : > { %4090 = vrot.lane.b32.xlu1 %v4089_v51, %s6418_s21 }
 0x104   : > { %4100 = vrot.lane.b32.xlu1 %v4099_v13, %s6419_s29 }
 0x108   : > { %4110 = vrot.lane.b32.xlu1 %v4825_v41, %s6417_s25  ;;  %v3721_v41 = vpack.c.bf16 %v4832_v44, %v4828_v42  ;;  %v4336_v42 = vld [vmem:[%s6379_s10] sm:$0xff]   ;;  %v4337_v44 = vld [vmem:[%s6379_s10 + $0x48] sm:$0xff]  }
 0x109   : > { %3802 = vmatpush3.bf16.msra.mxu1 %v4336_v42 }
 0x10a   : > { %3943 = vmatprep.mubr.msk.bf16.mxu1 %vm531_vm0, %v3721_v41  ;;  %3803 = vmatprep.subr.bf16.mxu1 %v4337_v44 }
 0x10b   : > { %3944 = vmatmul.mubr.msk.bf16.gmra.mrb[4].mxu1 %vm531_vm0, %v3724_v54 }
 0x10c   : > { %4120 = vrot.lane.b32.xlu1 %v4119_v52, %s6418_s21 }
 0x10d   : > { %3804 = vmatpush3.bf16.msra.mxu1 %v4338_v48  ;;  %v4067_v48 = vunpack.i.l.bf16 %v4989_v60 }
 0x10e   : > { %3805 = vmatprep.subr.bf16.mxu1 %v4339_v57 }
 0x10f   : > { %v923_v12 = vsel %vm531_vm0, %v4868_v4, %v4067_v48  ;;  %v4097_v4 = vunpack.i.l.bf16 %v5006_v50 }
 0x110   : > { %4130 = vrot.lane.b32.xlu1 %v4129_v33, %s6419_s29 }
 0x114   : > { %4140 = vrot.lane.b32.xlu1 %v4139_v53, %s6417_s25 }
 0x15b   : > { %v658_v62 = vpop.permute.xlu1 %657 }
 0x15c   : > { %v662_v63 = vmul.f32 %v658_v62, %v644_v61  ;;  %v5017_v61 = vpop.permute.xlu0 %4105 }
 0x15e   : > { %v677_v8 = vsel %vm582_vm1, %v662_v63, 0.0 }
 0x15f   : > { %v678_v14 = vrot.slane %v677_v8, 4  ;;  %v4036_v16 = vpop.permute.xlu1 %4035 }
 0x160   : > { %v4038_v45 = vunpack.i.h.bf16 %v4036_v16  ;;  %v4037_v46 = vunpack.i.l.bf16 %v4036_v16 }
 0x161   : > { %v679_v20 = vadd.f32 %v678_v14, %v677_v8 }
 0x162   : > { %v922_v41 = vsel %vm531_vm0, %v4900_v32, %v4038_v45  ;;  %v921_v54 = vsel %vm531_vm0, %v4954_v30, %v4037_v46  ;;  %v4088_v45 = vunpack.i.h.bf16 %v4997_v23 }
 0x163   : > { %v680_v27 = vrot.slane %v679_v20, 2  ;;  %v4041_v28 = vpop.permute.xlu1 %4040 }
 0x164   : > { %v4042_v38 = vunpack.i.l.bf16 %v4041_v28  ;;  %v4043_v40 = vunpack.i.h.bf16 %v4041_v28  ;;  %v4077_v28 = vunpack.i.l.bf16 %v4994_v1 }
 0x165   : > { %v681_v34 = vadd.f32 %v680_v27, %v679_v20  ;;  %v4068_v20 = vunpack.i.h.bf16 %v4989_v60 }
 0x166   : > { %v955_v13 = vsel %vm929_vm4, %v947_v43, %v4042_v38  ;;  %v956_v53 = vsel %vm929_vm4, %v948_v49, %v4043_v40  ;;  %v4334_v38 = vld [vmem:[%s6379_s10 + $0x88] sm:$0xff]   ;;  %v4087_v43 = vunpack.i.l.bf16 %v4997_v23  ;;  %v4098_v49 = vunpack.i.h.bf16 %v5006_v50  ;;  %v4341_v23 = vld [vmem:[%s6379_s10 + $0x58] sm:$0xff]  }
 0x167   : > { %v682_v39 = vrot.slane %v681_v34, 1  ;;  %v4046_v18 = vpop.permute.xlu1 %4045  ;;  %v924_v40 = vsel %vm531_vm0, %v4784_v25, %v4068_v20  ;;  %v4340_v25 = vld [vmem:[%s6379_s10 + $0x10] sm:$0xff]  }
 0x168   : > { %v4048_v31 = vunpack.i.h.bf16 %v4046_v18  ;;  %v4047_v52 = vunpack.i.l.bf16 %v4046_v18  ;;  %v5036_v18 = vpop.permute.xlu0 %4115  ;;  %3806 = vmatpush3.bf16.msra.mxu1 %v4340_v25 }
 0x169   : > { %v683_v51 = vadd.f32 %v682_v39, %v681_v34  ;;  %3807 = vmatprep.subr.bf16.mxu1 %v4341_v23  ;;  %v4117_v20 = vunpack.i.l.bf16 %v5036_v18 }
 0x16a   : > { %v5020_v8 = vsel %vm929_vm4, %v921_v54, %v4047_v52  ;;  %v931_v32 = vsel %vm929_vm4, %v922_v41, %v4048_v31  ;;  %v5056_v52 = vsub.s32 0, %v4673_v3  ;;  %v925_v54 = vsel %vm531_vm0, %v4787_v26, %v4097_v4 }
 0x16b   : > { %v693_v21 = vadd.f32 %v687_v35, %v683_v51  ;;  %v4051_v33 = vpop.permute.xlu1 %4050  ;;  %v4078_v35 = vunpack.i.h.bf16 %v4994_v1  ;;  %v932_v1 = vsel %vm929_vm4, %v923_v12, %v4077_v28 }
 0x16c   : > { %v4053_v22 = vunpack.i.h.bf16 %v4051_v33  ;;  %v4052_v42 = vunpack.i.l.bf16 %v4051_v33  ;;  %6420 = vst [vmem:[#allocation13_spill] sm:$0xff] %v5056_v52  ;;  %v941_v33 = vsel %vm938_vm5, %v932_v1, %v4087_v43 }
 0x16d   : > { %v696_v44 = vmul.f32 0.5, %v693_v21  ;;  %v933_v51 = vsel %vm929_vm4, %v924_v40, %v4078_v35 }
 0x16e   : > { %v963_v57 = vsel %vm938_vm5, %v955_v13, %v4052_v42  ;;  %v964_v59 = vsel %vm938_vm5, %v956_v53, %v4053_v22  ;;  %v4107_v53 = vunpack.i.l.bf16 %v5017_v61  ;;  %v942_v22 = vsel %vm938_vm5, %v933_v51, %v4088_v45 }
 0x16f   : > { %4387 = vtanh.f32 %v696_v44  ;;  %v4056_v62 = vpop.permute.xlu1 %4055  ;;  %v3714_v63 = vpack.c.bf16 %v964_v59, %v963_v57  ;;  %v4108_v42 = vunpack.i.h.bf16 %v5017_v61  ;;  %v5064_v44 = vpop.permute.xlu0 %4125  ;;  %v926_v57 = vsel %vm531_vm0, %v4812_v36, %v4098_v49  ;;  %v4342_v36 = vld [vmem:[%s6379_s10 + $0x18] sm:$0xff]  }
 0x170   : > { %v4058_v14 = vunpack.i.h.bf16 %v4056_v62  ;;  %v4057_v16 = vunpack.i.l.bf16 %v4056_v62  ;;  %v4118_v61 = vunpack.i.h.bf16 %v5036_v18  ;;  %3808 = vmatpush3.bf16.msra.mxu1 %v4342_v36 }
 0x171   : > { %1257 = vmatprep.mubr.bf16.mxu0 %v3714_v63  ;;  %v4128_v63 = vunpack.i.h.bf16 %v5064_v44 }
 0x172   : > { %v939_v24 = vsel %vm938_vm5, %v5020_v8, %v4057_v16  ;;  %v940_v27 = vsel %vm938_vm5, %v931_v32, %v4058_v14  ;;  %v3716_v16 = vpack.c.bf16 %v942_v22, %v941_v33 }
 0x173   : > { %v4061_v29 = vpop.permute.xlu1 %4060  ;;  %v3713_v34 = vpack.c.bf16 %v940_v27, %v939_v24  ;;  %v934_v24 = vsel %vm929_vm4, %v925_v54, %v4107_v53  ;;  %v4343_v27 = vld [vmem:[%s6379_s10 + $0x60] sm:$0xff]   ;;  %v4136_v25 = vpop.permute.xlu0 %4135 }
 0x174   : > { %v4063_v60 = vunpack.i.h.bf16 %v4061_v29  ;;  %v4062_v39 = vunpack.i.l.bf16 %v4061_v29  ;;  %3809 = vmatprep.subr.bf16.mxu1 %v4343_v27  ;;  %v5108_v1 = vsel %vm938_vm5, %v934_v24, %v4117_v20  ;;  %v4137_v20 = vunpack.i.l.bf16 %v4136_v25 }
 0x175   : > { %1258 = vmatmul.mubr.bf16.vlgmr.msra.gmra.mrb[0].mxu0 %v3713_v34  ;;  %v935_v34 = vsel %vm929_vm4, %v926_v57, %v4108_v42  ;;  %v4346_v57 = vld [vmem:[%s6379_s10 + $0x28] sm:$0xff]  }
 0x176   : > { %3948 = vmatpush3.bf16.msra.mxu0 %v4969_v56  ;;  %v950_v13 = vsel %vm531_vm0, %v4691_v9, %v4063_v60  ;;  %v949_v56 = vsel %vm531_vm0, %v4688_v7, %v4062_v39  ;;  %v5088_v60 = vsel %vm531_vm0, %v4840_v47, %v4128_v63  ;;  %v4127_v39 = vunpack.i.l.bf16 %v5064_v44 }
 0x177   : > { %v4071_v46 = vpop.permute.xlu1 %4070  ;;  %3949 = vmatprep.subr.bf16.mxu0 %v4334_v38  ;;  %v4138_v63 = vunpack.i.h.bf16 %v4136_v25  ;;  %v4146_v24 = vpop.permute.xlu0 %4145 }
 0x178   : > { %v4073_v21 = vunpack.i.h.bf16 %v4071_v46  ;;  %v4072_v31 = vunpack.i.l.bf16 %v4071_v46  ;;  %v4345_v46 = vld [vmem:[%s6379_s10 + $0x68] sm:$0xff]  }
 0x179   : > { %v4388_v50 = vpop.eup %4387 }
 0x17a   : > { %v702_v41 = vmul.f32 0.5, %v4388_v50  ;;  %3950 = vmatpush3.bf16.msra.mxu0 %v4334_v38  ;;  %v957_v59 = vsel %vm929_vm4, %v949_v56, %v4072_v31  ;;  %v958_v62 = vsel %vm929_vm4, %v950_v13, %v4073_v21 }
 0x17b   : > { %v4081_v48 = vpop.permute.xlu1 %4080 }
 0x17c   : > { %v705_v32 = vadd.f32 0.5, %v702_v41  ;;  %v4083_v26 = vunpack.i.h.bf16 %v4081_v48  ;;  %v4082_v14 = vunpack.i.l.bf16 %v4081_v48 }
 0x17e   : > { %v5081_v28 = vrot.slane %v705_v32, %v5056_v52  ;;  %v965_v29 = vsel %vm938_vm5, %v957_v59, %v4082_v14  ;;  %v966_v12 = vsel %vm938_vm5, %v958_v62, %v4083_v26  ;;  %v4347_v59 = vld [vmem:[%s6379_s10 + $0x70] sm:$0xff]  }
 0x17f   : > { %v4091_v35 = vpop.permute.xlu1 %4090  ;;  %v3717_v38 = vpack.c.bf16 %v966_v12, %v965_v29 }
 0x180   : > { %v4093_v40 = vunpack.i.h.bf16 %v4091_v35  ;;  %v4092_v18 = vunpack.i.l.bf16 %v4091_v35  ;;  %v5093_v43 = vmul.f32 %v5081_v28, %v4685_v6  ;;  %v5097_v45 = vmul.f32 %v5081_v28, %v4688_v7  ;;  %v4344_v7 = vld [vmem:[%s6379_s10 + $0x20] sm:$0xff]  }
 0x181   : > { %1265 = vmatprep.mubr.bf16.mxu0 %v3717_v38  ;;  %v5101_v4 = vmul.f32 %v5081_v28, %v4691_v9  ;;  %v5105_v47 = vmul.f32 %v5081_v28, %v4682_v5  ;;  %v5111_v6 = vsel %vm938_vm5, %v935_v34, %v4118_v61  ;;  %v5123_v5 = vmul.f32 %v5081_v28, %v4694_v10 }
 0x182   : > { %1266 = vmatmul.mubr.bf16.gmra.mrb[4].mxu0 %v3716_v16  ;;  %v4149_v9 = vpack.i.bf16 %v5097_v45, %v5093_v43  ;;  %v1798_v49 = vrot.slane %v5097_v45, 1  ;;  %v5128_v51 = vmul.f32 %v5081_v28, %v4697_v11  ;;  %v952_v23 = vsel %vm531_vm0, %v4697_v11, %v4093_v40  ;;  %3810 = vmatpush3.bf16.msra.mxu1 %v4344_v7 }
 0x183   : > { %v951_v13 = vsel %vm531_vm0, %v4694_v10, %v4092_v18  ;;  %v4101_v56 = vpop.permute.xlu1 %4100  ;;  %v1785_v21 = vrot.slane %v5101_v4, 7  ;;  %v1796_v31 = vrot.slane %v5105_v47, 1  ;;  %v5142_v41 = vmul.f32 %v5081_v28, %v4706_v15  ;;  %3811 = vmatprep.subr.bf16.mxu1 %v4345_v46 }
 0x184   : > { %v4103_v50 = vunpack.i.h.bf16 %v4101_v56  ;;  %v4102_v33 = vunpack.i.l.bf16 %v4101_v56  ;;  %4150 = vrot.lane.b32.xlu1 %v4149_v9, %s6417_s25  ;;  %v5138_v53 = vmul.f32 %v1798_v49, %v4752_v2  ;;  %v1797_v54 = vrot.slane %v5093_v43, 1  ;;  %v4349_v56 = vld [vmem:[%s6379_s10 + $0x78] sm:$0xff]  }
 0x185   : > { %v5145_v10 = vmul.f32 %v1785_v21, %v4772_v19  ;;  %v1803_v11 = vmul.f32 %v1796_v31, %v4752_v2  ;;  %v1782_v22 = vrot.slane %v5105_v47, 7  ;;  %v4154_v42 = vpack.i.bf16 %v5123_v5, %v5101_v4 }
 0x186   : > { %v4169_v44 = vpack.i.bf16 %v5138_v53, %v5105_v47  ;;  %v927_v15 = vsel %vm531_vm0, %v4815_v37, %v4127_v39  ;;  %v1783_v48 = vrot.slane %v5093_v43, 7  ;;  %v959_v32 = vsel %vm929_vm4, %v951_v13, %v4102_v33  ;;  %3812 = vmatpush3.bf16.msra.mxu1 %v4346_v57 }
 0x187   : > { %v4111_v62 = vpop.permute.xlu1 %4110  ;;  %v960_v26 = vsel %vm929_vm4, %v952_v23, %v4103_v50  ;;  %v3719_v14 = vpack.c.bf16 %v5111_v6, %v5108_v1  ;;  %v4159_v61 = vpack.i.bf16 %v5142_v41, %v5128_v51  ;;  %v4179_v36 = vpack.i.bf16 %v5145_v10, %v1803_v11  ;;  %3813 = vmatprep.subr.bf16.mxu1 %v4347_v59  ;;  %v4348_v6 = vld [vmem:[%s6379_s10 + $0x30] sm:$0xff]  }
 0x188   : > { %v4113_v37 = vunpack.i.h.bf16 %v4111_v62  ;;  %v4112_v16 = vunpack.i.l.bf16 %v4111_v62  ;;  %4155 = vrot.lane.b32.xlu1 %v4154_v42, %s6417_s25  ;;  %4170 = vrot.lane.b32.xlu0 %v4169_v44, %s6418_s21  ;;  %v5173_v27 = vmul.f32 %v1797_v54, %v4752_v2  ;;  %v5176_v29 = vmul.f32 %v1782_v22, %v4772_v19  ;;  %v4350_v22 = vld [vmem:[%s6379_s10 + $0x38] sm:$0xff]   ;;  %v4442_v44 = vld [vmem:[%s4679_s0 + $0x30] sm:$0xff] }
 0x189   : > { %v1784_v12 = vrot.slane %v5097_v45, 7  ;;  %v5180_v34 = vmul.f32 %v1783_v48, %v4772_v19  ;;  %v1800_v39 = vrot.slane %v5123_v5, 1  ;;  %v4147_v1 = vunpack.i.l.bf16 %v4146_v24 }
 0x18a   : > { %v967_v35 = vsel %vm938_vm5, %v959_v32, %v4112_v16  ;;  %v968_v38 = vsel %vm938_vm5, %v960_v26, %v4113_v37  ;;  %v936_v9 = vsel %vm929_vm4, %v927_v15, %v4137_v20  ;;  %v4148_v49 = vunpack.i.h.bf16 %v4146_v24  ;;  %3814 = vmatpush3.bf16.msra.mxu1 %v4348_v6 }
 0x18b   : > { %v4121_v40 = vpop.permute.xlu1 %4120  ;;  %v3720_v18 = vpack.c.bf16 %v968_v38, %v967_v35  ;;  %v1799_v25 = vrot.slane %v5101_v4, 1  ;;  %v1787_v23 = vrot.slane %v5128_v51, 7  ;;  %v937_v13 = vsel %vm929_vm4, %v5088_v60, %v4138_v63  ;;  %3815 = vmatprep.subr.bf16.mxu1 %v4349_v56 }
 0x18c   : > { %v4123_v7 = vunpack.i.h.bf16 %v4121_v40  ;;  %v4122_v46 = vunpack.i.l.bf16 %v4121_v40  ;;  %4160 = vrot.lane.b32.xlu1 %v4159_v61, %s6417_s25  ;;  %4180 = vrot.lane.b32.xlu0 %v4179_v36, %s6419_s29  ;;  %v4164_v21 = vpack.i.bf16 %v5173_v27, %v1803_v11  ;;  %v4184_v31 = vpack.i.bf16 %v5180_v34, %v5176_v29  ;;  %v4441_v11 = vld [vmem:[%s4679_s0 + $0x38] sm:$0xff] }
 0x18d   : > { %1273 = vmatprep.mubr.bf16.mxu0 %v3720_v18  ;;  %v5202_v50 = vmul.f32 %v1784_v12, %v4772_v19  ;;  %v5205_v33 = vmul.f32 %v1800_v39, %v4752_v2  ;;  %v945_v60 = vsel %vm938_vm5, %v936_v9, %v4147_v1  ;;  %v1806_v59 = vmul.f32 %v1799_v25, %v4752_v2 }
 0x18e   : > { %1274 = vmatmul.mubr.bf16.gmra.mrb[8].mxu0 %v3719_v14  ;;  %v954_v42 = vsel %vm531_vm0, %v4441_v11, %v4123_v7  ;;  %v953_v15 = vsel %vm531_vm0, %v4442_v44, %v4122_v46  ;;  %v5223_v62 = vmul.f32 %v1787_v23, %v4772_v19  ;;  %v946_v63 = vsel %vm938_vm5, %v937_v13, %v4148_v49 }
 0x18f   : > { %v5207_v54 = vpop.permute.xlu1 %4130  ;;  %v1786_v32 = vrot.slane %v5123_v5, 7  ;;  %v4174_v26 = vpack.i.bf16 %v5202_v50, %v5180_v34  ;;  %v4194_v14 = vpack.i.bf16 %v5205_v33, %v5097_v45  ;;  %3816 = vmatpush3.bf16.msra.mxu1 %v4350_v22  ;;  %v3722_v36 = vpack.c.bf16 %v946_v63, %v945_v60 }
 0x190   : > { %v4133_v48 = vunpack.i.h.bf16 %v5207_v54  ;;  %v4132_v57 = vunpack.i.l.bf16 %v5207_v54  ;;  %4165 = vrot.lane.b32.xlu1 %v4164_v21, %s6418_s21  ;;  %4185 = vrot.lane.b32.xlu0 %v4184_v31, %s6417_s25  ;;  %v4189_v12 = vpack.i.bf16 %v5093_v43, %v1806_v59  ;;  %v4204_v35 = vpack.i.bf16 %v5223_v62, %v5138_v53 }
 0x191   : > { %v5245_v38 = vmul.f32 %v1786_v32, %v4772_v19  ;;  %v1801_v39 = vrot.slane %v5128_v51, 1  ;;  %v1802_v1 = vrot.slane %v5142_v41, 1  ;;  %v5254_v6 = vmul.f32 %v4441_v11, %v5081_v28  ;;  %v576_v32 = vld [vmem:[%s6370_s1] sm:$0x3] }
 0x192   : > { %v961_v16 = vsel %vm929_vm4, %v953_v15, %v4132_v57  ;;  %v962_v61 = vsel %vm929_vm4, %v954_v42, %v4133_v48  ;;  %v3727_v46 = vpack.c.bf16 %v5138_v53, %v5173_v27  ;;  %v4209_v9 = vpack.i.bf16 %v5145_v10, %v5202_v50 }
 0x193   : > { %v5231_v37 = vpop.permute.xlu1 %4140  ;;  %v1788_v49 = vrot.slane %v5142_v41, 7  ;;  %v4199_v25 = vpack.i.bf16 %v5173_v27, %v5245_v38  ;;  %v1808_v28 = vmul.f32 %v1801_v39, %v4752_v2  ;;  %v1809_v23 = vmul.f32 %v1802_v1, %v4752_v2 }
 0x194   : > { %v4143_v20 = vunpack.i.h.bf16 %v5231_v37  ;;  %v4142_v24 = vunpack.i.l.bf16 %v5231_v37  ;;  %4175 = vrot.lane.b32.xlu1 %v4174_v26, %s6419_s29  ;;  %4195 = vrot.lane.b32.xlu0 %v4194_v14, %s6418_s21  ;;  %v1810_v13 = vrot.slane %v5254_v6, 7  ;;  %v1812_v31 = vrot.slane %v5254_v6, 1  ;;  %v5305_v26 = vpop.f32.mrb[0].mxu1 }
 0x195   : > { %v5272_v53 = vmul.f32 %v1788_v49, %v4772_v19  ;;  %v4214_v56 = vpack.i.bf16 %v5101_v4, %v1808_v28  ;;  %v4219_v21 = vpack.i.bf16 %v1809_v23, %v5123_v5  ;;  %v3730_v60 = vpack.c.bf16 %v5205_v33, %v1806_v59 }
 0x196   : > { %v969_v40 = vsel %vm938_vm5, %v961_v16, %v4142_v24  ;;  %v970_v18 = vsel %vm938_vm5, %v962_v61, %v4143_v20  ;;  %v1811_v27 = vmul.f32 %v1810_v13, %v4772_v19  ;;  %v3733_v22 = vpack.c.bf16 %v1809_v23, %v1808_v28  ;;  %v5308_v16 = vpop.f32.mrb[1].mxu1 }
 0x197   : > { %v3723_v7 = vpack.c.bf16 %v970_v18, %v969_v40  ;;  %v4224_v11 = vpack.i.bf16 %v1806_v59, %v5272_v53  ;;  %v1813_v44 = vmul.f32 %v1812_v31, %v4752_v2  ;;  %v4234_v57 = vpack.i.bf16 %v5223_v62, %v5245_v38  ;;  %v5310_v61 = vpop.f32.mrb[2].mxu1 }
 0x198   : > { %4190 = vrot.lane.b32.xlu1 %v4189_v12, %s6418_s21  ;;  %4205 = vrot.lane.b32.xlu0 %v4204_v35, %s6419_s29  ;;  %v4229_v42 = vpack.i.bf16 %v1811_v27, %v5205_v33  ;;  %v4244_v33 = vpack.i.bf16 %v1809_v23, %v1808_v28  ;;  %v4249_v63 = vpack.i.bf16 %v5272_v53, %v5254_v6 }
 0x199   : > { %1281 = vmatprep.mubr.bf16.mxu0 %v3723_v7  ;;  %v4239_v15 = vpack.i.bf16 %v5128_v51, %v1813_v44  ;;  %v3736_v59 = vpack.c.bf16 %v4880_v17, %v1813_v44  ;;  %v579_v14 = vmul.f32 %v576_v32, %v4745_v58 }
 0x19a   : > { %1282 = vmatmul.mubr.bf16.gmra.mrb[12].mxu0 %v3722_v36  ;;  %v5315_v36 = vpop.f32.mrb[3].mxu1 }
 0x19b   : > { %3951 = vmatprep.mubr.msk.bf16.mxu0 %vm531_vm0, %v3727_v46  ;;  %v583_v24 = vsel %vm582_vm1, %v579_v14, 0.0 }
 0x19c   : > { %4200 = vrot.lane.b32.xlu1 %v4199_v25, %s6419_s29  ;;  %4210 = vrot.lane.b32.xlu0 %v4209_v9, %s6417_s25 }
 0x1a0   : > { %4215 = vrot.lane.b32.xlu1 %v4214_v56, %s6418_s21  ;;  %4220 = vrot.lane.b32.xlu0 %v4219_v21, %s6418_s21 }
 0x1a2   : > { %3952 = vmatmul.mubr.msk.bf16.vlgmr.msra.gmra.mrb[16].mxu0 %vm531_vm0, %v3730_v60 }
 0x1a3   : > { %3955 = vmatprep.mubr.msk.bf16.mxu0 %vm531_vm0, %v3733_v22 }
 0x1a4   : > { %4225 = vrot.lane.b32.xlu1 %v4224_v11, %s6419_s29  ;;  %4230 = vrot.lane.b32.xlu0 %v4229_v42, %s6419_s29 }
 0x1a8   : > { %4240 = vrot.lane.b32.xlu1 %v4239_v15, %s6418_s21  ;;  %4235 = vrot.lane.b32.xlu0 %v4234_v57, %s6417_s25 }
 0x1aa   : > { %3956 = vmatmul.mubr.msk.bf16.gmra.mrb[20].mxu0 %vm531_vm0, %v3736_v59 }
 0x1ac   : > { %4245 = vrot.lane.b32.xlu1 %v4244_v33, %s6419_s29  ;;  %1833 = vrot.lane.b32.xlu0 %v5142_v41, %s6418_s21  ;;  %s4522_s21 = smov 2  }
 0x1b0   : > { %1892 = vrot.lane.b32.xlu1 %v1811_v27, %s6417_s25  ;;  %4250 = vrot.lane.b32.xlu0 %v4249_v63, %s6417_s25 }
 0x1b4   : > { %1404 = vrot.lane.b32.xlu0 %v6398_v0, %s4522_s21 }
 0x1d4   : > { %584 = vadd.xlane.f32.xlu1 %v583_v24 }
 0x1de   : > { %v5317_v12 = vpop.f32.mrb[4].mxu1 }
 0x1df   : > { %v5319_v35 = vpop.f32.mrb[5].mxu1 }
 0x1e0   : > { %v5321_v39 = vpop.f32.mrb[6].mxu1 }
 0x1e1   : > { %v5323_v18 = vpop.f32.mrb[7].mxu1 }
 0x1f6   : > { %v4151_v40 = vpop.permute.xlu1 %4150 }
 0x1f7   : > { %v4153_v22 = vunpack.i.h.bf16 %v4151_v40  ;;  %v4152_v11 = vunpack.i.l.bf16 %v4151_v40 }
 0x1fa   : > { %v5325_v1 = vpop.permute.xlu1 %4155  ;;  %v4171_v7 = vpop.permute.xlu0 %4170 }
 0x1fb   : > { %v4172_v28 = vunpack.i.l.bf16 %v4171_v7  ;;  %v4173_v15 = vunpack.i.h.bf16 %v4171_v7 }
 0x1fd   : > { %v1970_v57 = vsel %vm531_vm0, %v5176_v29, %v4172_v28 }
 0x1fe   : > { %v5327_v46 = vpop.permute.xlu1 %4160  ;;  %v4181_v9 = vpop.permute.xlu0 %4180 }
 0x1ff   : > { %v4182_v56 = vunpack.i.l.bf16 %v4181_v9  ;;  %v4183_v28 = vunpack.i.h.bf16 %v4181_v9 }
 0x201   : > { %v1977_v63 = vsel %vm929_vm4, %v1970_v57, %v4182_v56 }
 0x202   : > { %v4166_v49 = vpop.permute.xlu1 %4165  ;;  %v4186_v25 = vpop.permute.xlu0 %4185 }
 0x203   : > { %v4168_v23 = vunpack.i.h.bf16 %v4166_v49  ;;  %v4167_v13 = vunpack.i.l.bf16 %v4166_v49  ;;  %v4187_v21 = vunpack.i.l.bf16 %v4186_v25  ;;  %v4188_v27 = vunpack.i.h.bf16 %v4186_v25 }
 0x205   : > { %v1993_v59 = vsel %vm531_vm0, %v5093_v43, %v4168_v23  ;;  %v1992_v33 = vsel %vm531_vm0, %v5105_v47, %v4167_v13  ;;  %v1984_v32 = vsel %vm938_vm5, %v5020_v8, %v4187_v21  ;;  %v1985_v40 = vsel %vm938_vm5, %v1977_v63, %v4188_v27 }
 0x206   : > { %v4176_v31 = vpop.permute.xlu1 %4175  ;;  %v4196_v60 = vpop.permute.xlu0 %4195  ;;  %v4158_v8 = vunpack.i.h.bf16 %v5325_v1  ;;  %v1994_v21 = vsel %vm531_vm0, %v5097_v45, %v4173_v15 }
 0x207   : > { %v4178_v42 = vunpack.i.h.bf16 %v4176_v31  ;;  %v4177_v44 = vunpack.i.l.bf16 %v4176_v31  ;;  %v4197_v7 = vunpack.i.l.bf16 %v4196_v60  ;;  %v3725_v31 = vpack.c.bf16 %v1985_v40, %v1984_v32 }
 0x208   : > { %v2002_v63 = vsel %vm929_vm4, %v1994_v21, %v4183_v28 }
 0x209   : > { %v2000_v14 = vsel %vm929_vm4, %v1992_v33, %v4177_v44  ;;  %v2001_v24 = vsel %vm929_vm4, %v1993_v59, %v4178_v42  ;;  %v1972_v27 = vsel %vm531_vm0, %v5202_v50, %v4197_v7  ;;  %v4157_v50 = vunpack.i.l.bf16 %v5325_v1 }
 0x20a   : > { %v4191_v49 = vpop.permute.xlu1 %4190  ;;  %v4206_v29 = vpop.permute.xlu0 %4205  ;;  %v2008_v25 = vsel %vm938_vm5, %v2000_v14, %v4152_v11  ;;  %v2009_v43 = vsel %vm938_vm5, %v2001_v24, %v4153_v22  ;;  %v4198_v24 = vunpack.i.h.bf16 %v4196_v60  ;;  %v4163_v60 = vunpack.i.h.bf16 %v5327_v46 }
 0x20b   : > { %v4193_v47 = vunpack.i.h.bf16 %v4191_v49  ;;  %v4192_v23 = vunpack.i.l.bf16 %v4191_v49  ;;  %v4207_v13 = vunpack.i.l.bf16 %v4206_v29  ;;  %v3726_v56 = vpack.c.bf16 %v2009_v43, %v2008_v25 }
 0x20c   : > { %v2010_v25 = vsel %vm938_vm5, %v2002_v63, %v4157_v50  ;;  %v1996_v1 = vsel %vm531_vm0, %v5123_v5, %v4198_v24 }
 0x20d   : > { %2293 = vmatprep.mubr.bf16.mxu1 %v3726_v56  ;;  %v1971_v59 = vsel %vm531_vm0, %v5180_v34, %v4193_v47  ;;  %v1995_v33 = vsel %vm531_vm0, %v5101_v4, %v4192_v23  ;;  %v1979_v45 = vsel %vm929_vm4, %v1972_v27, %v4207_v13  ;;  %v4208_v4 = vunpack.i.h.bf16 %v4206_v29 }
 0x20e   : > { %v4201_v42 = vpop.permute.xlu1 %4200  ;;  %v4211_v44 = vpop.permute.xlu0 %4210  ;;  %2294 = vmatmul.mubr.bf16.vlgmr.msra.gmra.mrb[8].mxu1 %v3725_v31  ;;  %v4162_v29 = vunpack.i.l.bf16 %v5327_v46 }
 0x20f   : > { %v4203_v11 = vunpack.i.h.bf16 %v4201_v42  ;;  %v4202_v57 = vunpack.i.l.bf16 %v4201_v42  ;;  %v4213_v22 = vunpack.i.h.bf16 %v4211_v44  ;;  %v4212_v9 = vunpack.i.l.bf16 %v4211_v44 }
 0x211   : > { %v2003_v15 = vsel %vm929_vm4, %v1995_v33, %v4202_v57  ;;  %v1978_v32 = vsel %vm929_vm4, %v1971_v59, %v4203_v11  ;;  %v1987_v14 = vsel %vm938_vm5, %v1979_v45, %v4213_v22 }
 0x212   : > { %v4216_v40 = vpop.permute.xlu1 %4215  ;;  %v4221_v7 = vpop.permute.xlu0 %4220  ;;  %v2011_v34 = vsel %vm938_vm5, %v2003_v15, %v4158_v8  ;;  %v1986_v49 = vsel %vm938_vm5, %v1978_v32, %v4212_v9  ;;  %v2004_v8 = vsel %vm929_vm4, %v1996_v1, %v4208_v4 }
 0x213   : > { %v4217_v43 = vunpack.i.l.bf16 %v4216_v40  ;;  %v3729_v28 = vpack.c.bf16 %v2011_v34, %v2010_v25  ;;  %v3728_v47 = vpack.c.bf16 %v1987_v14, %v1986_v49  ;;  %v4218_v23 = vunpack.i.h.bf16 %v4216_v40 }
 0x214   : > { %v4222_v31 = vunpack.i.l.bf16 %v4221_v7  ;;  %v2012_v9 = vsel %vm938_vm5, %v2004_v8, %v4162_v29  ;;  %v4223_v14 = vunpack.i.h.bf16 %v4221_v7 }
 0x215   : > { %2301 = vmatprep.mubr.bf16.mxu1 %v3729_v28  ;;  %v1997_v27 = vsel %vm531_vm0, %v5128_v51, %v4217_v43  ;;  %v1973_v11 = vsel %vm531_vm0, %v5145_v10, %v4218_v23 }
 0x216   : > { %v4226_v13 = vpop.permute.xlu1 %4225  ;;  %v4231_v56 = vpop.permute.xlu0 %4230  ;;  %2302 = vmatmul.mubr.bf16.gmra.mrb[12].mxu1 %v3728_v47  ;;  %v1974_v33 = vsel %vm531_vm0, %v5245_v38, %v4222_v31 }
 0x217   : > { %v4227_v21 = vunpack.i.l.bf16 %v4226_v13  ;;  %v4228_v42 = vunpack.i.h.bf16 %v4226_v13  ;;  %v4232_v44 = vunpack.i.l.bf16 %v4231_v56  ;;  %v4233_v43 = vunpack.i.h.bf16 %v4231_v56 }
 0x218   : > { %v1998_v13 = vsel %vm531_vm0, %v5142_v41, %v4223_v14 }
 0x219   : > { %v2005_v5 = vsel %vm929_vm4, %v1997_v27, %v4227_v21  ;;  %v1980_v50 = vsel %vm929_vm4, %v1973_v11, %v4228_v42  ;;  %v1981_v15 = vsel %vm929_vm4, %v1974_v33, %v4232_v44  ;;  %v5402_v42 = vld [vmem:[%s6376_s7] ss:$0 sm:$0xff] }
 0x21a   : > { %v4241_v57 = vpop.permute.xlu1 %4240  ;;  %v4236_v22 = vpop.permute.xlu0 %4235  ;;  %v2013_v59 = vsel %vm938_vm5, %v2005_v5, %v4163_v60 }
 0x21b   : > { %v4242_v46 = vunpack.i.l.bf16 %v4241_v57  ;;  %v4238_v63 = vunpack.i.h.bf16 %v4236_v22  ;;  %v4237_v45 = vunpack.i.l.bf16 %v4236_v22  ;;  %v3732_v51 = vpack.c.bf16 %v2013_v59, %v2012_v9 }
 0x21c   : > { %v4243_v49 = vunpack.i.h.bf16 %v4241_v57 }
 0x21d   : > { %v1988_v32 = vsel %vm938_vm5, %v1980_v50, %v4237_v45  ;;  %v1989_v10 = vsel %vm938_vm5, %v1981_v15, %v4238_v63  ;;  %2309 = vmatprep.mubr.bf16.mxu1 %v3732_v51  ;;  %v1999_v38 = vsel %vm531_vm0, %v5254_v6, %v4242_v46 }
 0x21e   : > { %v4246_v24 = vpop.permute.xlu1 %4245  ;;  %v1834_v40 = vpop.permute.xlu0 %1833  ;;  %v3731_v34 = vpack.c.bf16 %v1989_v10, %v1988_v32  ;;  %v2007_v7 = vsel %vm929_vm4, %v1999_v38, %v4133_v48  ;;  %v1975_v6 = vsel %vm531_vm0, %v5223_v62, %v4243_v49 }
 0x21f   : > { %v4248_v4 = vunpack.i.h.bf16 %v4246_v24  ;;  %v1976_v25 = vsel %vm531_vm0, %v5272_v53, %v1834_v40  ;;  %v4247_v28 = vunpack.i.l.bf16 %v4246_v24  ;;  %v2006_v53 = vsel %vm929_vm4, %v1998_v13, %v4233_v43 }
 0x220   : > { %2310 = vmatmul.mubr.bf16.gmra.mrb[16].mxu1 %v3731_v34  ;;  %v2015_v54 = vsel %vm938_vm5, %v2007_v7, %v4143_v20 }
 0x221   : > { %v1983_v1 = vsel %vm929_vm4, %v1976_v25, %v4248_v4  ;;  %v1982_v56 = vsel %vm929_vm4, %v1975_v6, %v4247_v28 }
 0x222   : > { %v1893_v47 = vpop.permute.xlu1 %1892  ;;  %v4251_v23 = vpop.permute.xlu0 %4250 }
 0x223   : > { %v4253_v60 = vunpack.i.h.bf16 %v4251_v23  ;;  %v4252_v31 = vunpack.i.l.bf16 %v4251_v23  ;;  %v1991_v21 = vsel %vm938_vm5, %v1983_v1, %v1893_v47 }
 0x225   : > { %v2014_v8 = vsel %vm938_vm5, %v2006_v53, %v4252_v31  ;;  %v1990_v48 = vsel %vm938_vm5, %v1982_v56, %v4253_v60  ;;  %vm1658_vm5 = vcmask 97280  }
 0x226   : > { %v3735_v41 = vpack.c.bf16 %v2015_v54, %v2014_v8  ;;  %v3734_v29 = vpack.c.bf16 %v1991_v21, %v1990_v48 }
 0x228   : > { %2317 = vmatprep.mubr.bf16.mxu1 %v3735_v41 }
 0x229   : > { %2318 = vmatmul.mubr.bf16.gmra.mrb[20].mxu1 %v3734_v29 }
 0x248   : > { %v3771_v62 = vpop.f32.mrb[0].mxu0 }
 0x249   : > { %v3772_v27 = vpop.f32.mrb[1].mxu0 }
 0x24a   : > { %v3773_v44 = vadd.f32 %v3772_v27, %v3771_v62  ;;  %v3774_v5 = vpop.f32.mrb[2].mxu0 }
 0x24b   : > { %v3775_v11 = vpop.f32.mrb[3].mxu0 }
 0x24c   : > { %v3776_v57 = vadd.f32 %v3775_v11, %v3774_v5  ;;  %v1260_v37 = vadd.f32 %v3773_v44, %v5402_v42 }
 0x24e   : > { %v1325_v20 = vadd.f32 %v5308_v16, %v1260_v37  ;;  %v1263_v22 = vadd.f32 %v3776_v57, %v5402_v42 }
 0x250   : > { %v1355_v9 = vmax.f32 %v1325_v20, 0.0  ;;  %v1328_v59 = vadd.f32 %v5315_v36, %v1263_v22 }
 0x252   : > { %v5408_v33 = vmax.f32 %v1328_v59, 0.0  ;;  %1406 = vrot.lane.b32.xlu0 %v1355_v9, %s4522_s21  ;;  %1492 = vrot.lane.b32.xlu1 %v1355_v9, %s4523_s28  ;;  %v1379_v46 = vrot.slane %v1355_v9, 1  ;;  %v1365_v63 = vrot.slane %v1355_v9, 7 }
 0x254   : > { %v5413_v45 = vmul.f32 %v1379_v46, %v4752_v2  ;;  %v5420_v16 = vmul.f32 %v1365_v63, %v4772_v19  ;;  %v1380_v24 = vrot.slane %v5408_v33, 1  ;;  %v1366_v25 = vrot.slane %v5408_v33, 7 }
 0x255   : > { %v3777_v51 = vpop.f32.mrb[4].mxu0 }
 0x256   : > { %v3778_v50 = vpop.f32.mrb[5].mxu0  ;;  %1408 = vrot.lane.b32.xlu0 %v5408_v33, %s4522_s21  ;;  %1437 = vrot.lane.b32.xlu1 %v5413_v45, %s4524_s6  ;;  %6421 = vst [vmem:[#allocation14_spill] sm:$0xff] %v5420_v16  ;;  %v5436_v4 = vmul.f32 %v1380_v24, %v4752_v2  ;;  %v5446_v47 = vmul.f32 %v1366_v25, %v4772_v19 }
 0x257   : > { %v3779_v36 = vadd.f32 %v3778_v50, %v3777_v51  ;;  %v3780_v15 = vpop.f32.mrb[6].mxu0 }
 0x258   : > { %v3781_v32 = vpop.f32.mrb[7].mxu0 }
 0x259   : > { %v1268_v10 = vadd.f32 %v3779_v36, %v5402_v42  ;;  %v3782_v14 = vadd.f32 %v3781_v32, %v3780_v15 }
 0x25a   : > { %1435 = vrot.lane.b32.xlu0 %v4880_v17, %s4524_s6  ;;  %1467 = vrot.lane.b32.xlu1 %v5420_v16, %s4525_s26 }
 0x25b   : > { %v1333_v40 = vadd.f32 %v5305_v26, %v1268_v10  ;;  %v1271_v34 = vadd.f32 %v3782_v14, %v5402_v42 }
 0x25d   : > { %v5430_v49 = vmax.f32 %v1333_v40, 0.0  ;;  %v1336_v38 = vadd.f32 %v5310_v61, %v1271_v34 }
 0x25e   : > { %1494 = vrot.lane.b32.xlu0 %v5408_v33, %s4523_s28 }
 0x25f   : > { %v1367_v43 = vrot.slane %v5430_v49, 7  ;;  %v5458_v21 = vmax.f32 %v1336_v38, 0.0  ;;  %v1381_v8 = vrot.slane %v5430_v49, 1 }
 0x261   : > { %v5441_v28 = vmul.f32 %v1367_v43, %v4772_v19  ;;  %v3783_v26 = vpop.f32.mrb[8].mxu0  ;;  %v5473_v62 = vmul.f32 %v1381_v8, %v4752_v2  ;;  %v1382_v27 = vrot.slane %v5458_v21, 1  ;;  %v1368_v9 = vrot.slane %v5458_v21, 7 }
 0x262   : > { %1439 = vrot.lane.b32.xlu0 %v5436_v4, %s4524_s6  ;;  %v3784_v61 = vpop.f32.mrb[9].mxu0 }
 0x263   : > { %1471 = vrot.lane.b32.xlu1 %v5441_v28, %s4525_s26  ;;  %v3785_v1 = vadd.f32 %v3784_v61, %v3783_v26  ;;  %v3786_v23 = vpop.f32.mrb[10].mxu0  ;;  %v5485_v22 = vmul.f32 %v1382_v27, %v4752_v2  ;;  %v5500_v15 = vmul.f32 %v1368_v9, %v4772_v19 }
 0x264   : > { %v3787_v7 = vpop.f32.mrb[11].mxu0 }
 0x265   : > { %v1276_v13 = vadd.f32 %v3785_v1, %v5402_v42  ;;  %v3788_v6 = vadd.f32 %v3787_v7, %v3786_v23 }
 0x266   : > { %1469 = vrot.lane.b32.xlu0 %v5446_v47, %s4525_s26 }
 0x267   : > { %v1341_v60 = vadd.f32 %v5319_v35, %v1276_v13  ;;  %v1279_v31 = vadd.f32 %v3788_v6, %v5402_v42  ;;  %v5554_v13 = vpop.permute.xlu0 %1404 }
 0x268   : > { %6422 = vst [vmem:[#allocation15_spill] sm:$0xff] %v5554_v13 }
 0x269   : > { %v5455_v53 = vmax.f32 %v1341_v60, 0.0  ;;  %v1344_v56 = vadd.f32 %v5323_v18, %v1279_v31 }
 0x26a   : > { %1410 = vrot.lane.b32.xlu0 %v5430_v49, %s4522_s21 }
 0x26b   : > { %v5463_v54 = vmax.f32 %v1344_v56, 0.0  ;;  %v1369_v48 = vrot.slane %v5455_v53, 7  ;;  %v1383_v24 = vrot.slane %v5455_v53, 1  ;;  %v5562_v56 = vpop.xlane.xlu1 %584 }
 0x26c   : > { %6425 = vst [vmem:[#allocation18_spill] sm:$0xff] %v5562_v56  ;;  %v5607_v56 = vld [vmem:[%s6381_s12] ss:$0 sm:$0xff] }
 0x26d   : > { %v3789_v41 = vpop.f32.mrb[12].mxu0  ;;  %v5467_v35 = vmul.f32 %v1369_v48, %v4772_v19  ;;  %v1384_v29 = vrot.slane %v5463_v54, 1  ;;  %v5528_v38 = vmul.f32 %v1383_v24, %v4752_v2  ;;  %v1370_v25 = vrot.slane %v5463_v54, 7  ;;  %v4356_v24 = vld [vmem:[%s6382_s13 + $0x8] sm:$0xff]  }
 0x26e   : > { %1412 = vrot.lane.b32.xlu0 %v5458_v21, %s4522_s21  ;;  %v3790_v18 = vpop.f32.mrb[13].mxu0 }
 0x26f   : > { %v3791_v44 = vadd.f32 %v3790_v18, %v3789_v41  ;;  %v3792_v5 = vpop.f32.mrb[14].mxu0  ;;  %1475 = vrot.lane.b32.xlu1 %v5467_v35, %s4525_s26  ;;  %v5479_v11 = vmul.f32 %v1384_v29, %v4752_v2  ;;  %v5534_v43 = vmul.f32 %v1370_v25, %v4772_v19 }
 0x270   : > { %v3793_v57 = vpop.f32.mrb[15].mxu0 }
 0x271   : > { %v1284_v37 = vadd.f32 %v3791_v44, %v5402_v42  ;;  %v3794_v20 = vadd.f32 %v3793_v57, %v3792_v5  ;;  %v4351_v5 = vld [vmem:[%s6382_s13 + $0x40] sm:$0xff]  }
 0x272   : > { %1441 = vrot.lane.b32.xlu0 %v5473_v62, %s4524_s6  ;;  %v4352_v57 = vld [vmem:[%s6382_s13] sm:$0xff]   ;;  %3847 = vmatprep.subr.bf16.mxu1 %v4351_v5  ;;  %v4357_v5 = vld [vmem:[%s6382_s13 + $0xc8] sm:$0xff]  }
 0x273   : > { %v1349_v59 = vadd.f32 %v5317_v12, %v1284_v37  ;;  %v1287_v46 = vadd.f32 %v3794_v20, %v5402_v42  ;;  %1447 = vrot.lane.b32.xlu1 %v5479_v11, %s4524_s6  ;;  %v4353_v37 = vld [vmem:[%s6382_s13 + $0xc0] sm:$0xff]   ;;  %3848 = vmatpush3.bf16.msra.mxu1 %v4352_v57 }
 0x274   : > { %3887 = vmatprep.subr.bf16.mxu0 %v4353_v37  ;;  %v5602_v57 = vld [vmem:[%s6380_s11] ss:$0 sm:$0xff] }
 0x275   : > { %v5492_v63 = vmax.f32 %v1349_v59, 0.0  ;;  %v5494_v51 = vpop.f32.mrb[16].mxu0  ;;  %v1352_v50 = vadd.f32 %v5321_v39, %v1287_v46 }
 0x276   : > { %v2360_v36 = vpop.f32.mrb[17].mxu0  ;;  %1443 = vrot.lane.b32.xlu0 %v5485_v22, %s4524_s6 }
 0x277   : > { %v5502_v32 = vpop.f32.mrb[18].mxu0  ;;  %v1371_v12 = vrot.slane %v5492_v63, 7  ;;  %v5536_v26 = vmax.f32 %v1352_v50, 0.0  ;;  %v1385_v61 = vrot.slane %v5492_v63, 1  ;;  %v4354_v50 = vld [vmem:[%s6382_s13 + $0x48] sm:$0xff]  }
 0x278   : > { %v5505_v42 = vpop.f32.mrb[19].mxu0  ;;  %3849 = vmatprep.subr.bf16.mxu1 %v4354_v50  ;;  %v4359_v50 = vld [vmem:[%s6382_s13 + $0x88] sm:$0xff]  }
 0x279   : > { %v5508_v10 = vmul.f32 %v1371_v12, %v4772_v19  ;;  %v5544_v1 = vmul.f32 %v1385_v61, %v4752_v2  ;;  %v1393_v23 = vrot.slane %v5536_v26, 7  ;;  %v4355_v12 = vld [vmem:[%s6382_s13 + $0x80] sm:$0xff]   ;;  %3850 = vmatpush3.bf16.msra.mxu1 %v4356_v24 }
 0x27a   : > { %1473 = vrot.lane.b32.xlu0 %v5500_v15, %s4525_s26  ;;  %3888 = vmatpush3.bf16.msra.mxu0 %v4355_v12 }
 0x27b   : > { %1479 = vrot.lane.b32.xlu1 %v5508_v10, %s4525_s26  ;;  %v5550_v7 = vmul.f32 %v1393_v23, %v4772_v19  ;;  %3889 = vmatprep.subr.bf16.mxu0 %v4357_v5  ;;  %v4361_v5 = vld [vmem:[%s6382_s13 + $0xd0] sm:$0xff]  }
 0x27d   : > { %v5514_v39 = vpop.f32.mrb[20].mxu0 }
 0x27e   : > { %v5516_v14 = vpop.f32.mrb[21].mxu0  ;;  %1414 = vrot.lane.b32.xlu0 %v5455_v53, %s4522_s21  ;;  %3890 = vmatpush3.bf16.msra.mxu0 %v4359_v50  ;;  %v4363_v50 = vld [vmem:[%s6382_s13 + $0x90] sm:$0xff]  }
 0x27f   : > { %v5521_v40 = vpop.f32.mrb[22].mxu0  ;;  %3891 = vmatprep.subr.bf16.mxu0 %v4361_v5  ;;  %v4365_v5 = vld [vmem:[%s6382_s13 + $0xd8] sm:$0xff]  }
 0x280   : > { %v5523_v34 = vpop.f32.mrb[23].mxu0 }
 0x282   : > { %1416 = vrot.lane.b32.xlu0 %v5463_v54, %s4522_s21  ;;  %3892 = vmatpush3.bf16.msra.mxu0 %v4363_v50 }
 0x283   : > { %3893 = vmatprep.subr.bf16.mxu0 %v4365_v5 }
 0x286   : > { %1445 = vrot.lane.b32.xlu0 %v5528_v38, %s4524_s6 }
 0x28a   : > { %1477 = vrot.lane.b32.xlu0 %v5534_v43, %s4525_s26 }
 0x28e   : > { %1418 = vrot.lane.b32.xlu0 %v5492_v63, %s4522_s21  ;;  %s4529_s21 = smov 16  }
 0x292   : > { %1449 = vrot.lane.b32.xlu0 %v5544_v1, %s4524_s6  ;;  %s514_s6 = sand.u32 1, %s4507_s24  }
 0x293   : > { %s6327_s9 = scalar_lea.sflag [#allocation4], %s514_s6 }
 0x296   : > { %1481 = vrot.lane.b32.xlu0 %v5550_v7, %s4525_s26  ;;  %s3556_s26 = sshll.u32 %s514_s6, 6 }
 0x297   : > { %s6263_s18 = scalar_lea.vmem [#allocation3], %s3556_s26 }
 0x298   : > { %s3490_s20 = sshll.u32 %s6263_s18, 4  ;;  %s6321_s20 = int_to_ptr.vmem [resolvable:$true] %s3490_s20 }
 0x2c4   : > { %v5556_v6 = vpop.permute.xlu0 %1406  ;;  %v5566_v48 = vpop.permute.xlu1 %1492 }
 0x2c5   : > { %6423 = vst [vmem:[#allocation16_spill] sm:$0xff] %v5556_v6  ;;  %6427 = vst [vmem:[#allocation20_spill] sm:$0xff] %v5566_v48  ;;  %v4358_v48 = vld [vmem:[%s6382_s13 + $0x50] sm:$0xff]  }
 0x2c6   : > { %3851 = vmatprep.subr.bf16.mxu1 %v4358_v48  ;;  %v4362_v48 = vld [vmem:[%s6382_s13 + $0x58] sm:$0xff]  }
 0x2c8   : > { %v5558_v60 = vpop.permute.xlu0 %1408  ;;  %v5572_v18 = vpop.permute.xlu1 %1437 }
 0x2c9   : > { %6429 = vst [vmem:[#allocation22_spill] sm:$0xff] %v5572_v18 }
 0x2cc   : > { %v5560_v31 = vpop.permute.xlu0 %1435  ;;  %v5574_v44 = vpop.permute.xlu1 %1467 }
 0x2cd   : > { %6424 = vst [vmem:[#allocation17_spill] sm:$0xff] %v5560_v31  ;;  %6430 = vst [vmem:[#allocation23_spill] sm:$0xff] %v5574_v44 }
 0x2d0   : > { %v5564_v8 = vpop.permute.xlu0 %1494 }
 0x2d1   : > { %6426 = vst [vmem:[#allocation19_spill] sm:$0xff] %v5564_v8 }
 0x2d4   : > { %v5568_v41 = vpop.permute.xlu0 %1439 }
 0x2d5   : > { %v5585_v59 = vpop.permute.xlu1 %1471 }
 0x2d8   : > { %v5570_v29 = vpop.permute.xlu0 %1469 }
 0x2d9   : > { %6428 = vst [vmem:[#allocation21_spill] sm:$0xff] %v5570_v29 }
 0x2dc   : > { %v1411_v27 = vpop.permute.xlu0 %1410 }
 0x2e0   : > { %v1413_v20 = vpop.permute.xlu0 %1412 }
 0x2e1   : > { %v3817_v9 = vpop.f32.mrb[8].mxu1  ;;  %v1618_v12 = vsel %vm1613_vm6, %v5500_v15, %v1413_v20 }
 0x2e2   : > { %v3818_v46 = vpop.f32.mrb[9].mxu1 }
 0x2e3   : > { %v3819_v25 = vadd.f32 %v3818_v46, %v3817_v9  ;;  %v3820_v61 = vpop.f32.mrb[10].mxu1  ;;  %v1476_v46 = vpop.permute.xlu1 %1475 }
 0x2e4   : > { %v1442_v23 = vpop.permute.xlu0 %1441  ;;  %v3821_v37 = vpop.f32.mrb[11].mxu1 }
 0x2e5   : > { %v2361_v0 = vadd.f32 %v3819_v25, %v2360_v36  ;;  %v3822_v9 = vadd.f32 %v3821_v37, %v3820_v61  ;;  %v4360_v36 = vld [vmem:[%s6382_s13 + $0x10] sm:$0xff]  }
 0x2e6   : > { %3852 = vmatpush3.bf16.msra.mxu1 %v4360_v36 }
 0x2e7   : > { %v2398_v24 = vmul.f32 %v5602_v57, %v2361_v0  ;;  %v2364_v25 = vadd.f32 %v3822_v9, %v5505_v42  ;;  %v1617_v42 = vsel %vm1613_vm6, %v5441_v28, %v1411_v27  ;;  %3853 = vmatprep.subr.bf16.mxu1 %v4362_v48  ;;  %v4369_v48 = vld [vmem:[%s6382_s13 + $0xe0] sm:$0xff]  }
 0x2e8   : > { %v1444_v61 = vpop.permute.xlu0 %1443  ;;  %v1626_v27 = vsel %vm1622_vm7, %v1617_v42, %v1442_v23 }
 0x2e9   : > { %v1627_v37 = vsel %vm1622_vm7, %v1618_v12, %v1444_v61  ;;  %v5627_v8 = vadd.f32 %v5607_v56, %v2398_v24  ;;  %v2399_v29 = vmul.f32 %v5602_v57, %v2364_v25  ;;  %v3823_v20 = vpop.f32.mrb[12].mxu1  ;;  %v4364_v12 = vld [vmem:[%s6382_s13 + $0x18] sm:$0xff]  }
 0x2ea   : > { %v5631_v0 = vsel %vm1631_vm8, %v1627_v37, %v1476_v46  ;;  %v3824_v9 = vpop.f32.mrb[13].mxu1  ;;  %v4366_v37 = vld [vmem:[%s6382_s13 + $0x60] sm:$0xff]   ;;  %3854 = vmatpush3.bf16.msra.mxu1 %v4364_v12 }
 0x2eb   : > { %v2429_v46 = vmin.f32 %v5627_v8, 0.0  ;;  %v5646_v36 = vadd.f32 %v5607_v56, %v2399_v29  ;;  %v3825_v24 = vadd.f32 %v3824_v9, %v3823_v20  ;;  %v3826_v25 = vpop.f32.mrb[14].mxu1  ;;  %v4367_v29 = vld [vmem:[%s6382_s13 + $0x98] sm:$0xff]   ;;  %v4368_v9 = vld [vmem:[%s6382_s13 + $0x20] sm:$0xff]   ;;  %3855 = vmatprep.subr.bf16.mxu1 %v4366_v37  ;;  %vm2421_vm9 = vcmp.gt.f32.partialorder %v5627_v8, 0.0 }
 0x2ec   : > { %v1474_v61 = vpop.permute.xlu0 %1473  ;;  %v3827_v44 = vpop.f32.mrb[15].mxu1  ;;  %3894 = vmatpush3.bf16.msra.mxu0 %v4367_v29 }
 0x2ed   : > { %v5656_v18 = vsel %vm1631_vm8, %v1626_v27, %v1474_v61  ;;  %v2437_v23 = vmul.f32 1.442695, %v2429_v46  ;;  %v2430_v20 = vmin.f32 %v5646_v36, 0.0  ;;  %v2369_v42 = vadd.f32 %v5494_v51, %v3825_v24  ;;  %3895 = vmatprep.subr.bf16.mxu0 %v4369_v48 }
 0x2ee   : > { %v3828_v50 = vadd.f32 %v3827_v44, %v3826_v25  ;;  %3856 = vmatpush3.bf16.msra.mxu1 %v4368_v9  ;;  %vm2422_vm10 = vcmp.gt.f32.partialorder %v5646_v36, 0.0 }
 0x2ef   : > { %4389 = vpow2.f32 %v2437_v23  ;;  %v2439_v27 = vmul.f32 1.442695, %v2430_v20  ;;  %v2400_v46 = vmul.f32 %v5602_v57, %v2369_v42  ;;  %v1448_v23 = vpop.permute.xlu1 %1447 }
 0x2f0   : > { %v1415_v61 = vpop.permute.xlu0 %1414  ;;  %v2372_v16 = vadd.f32 %v5502_v32, %v3828_v50 }
 0x2f1   : > { %4391 = vpow2.f32 %v2439_v27  ;;  %v5672_v51 = vadd.f32 %v5607_v56, %v2400_v46  ;;  %v1619_v46 = vsel %vm1613_vm6, %v5467_v35, %v1415_v61 }
 0x2f2   : > { %v2401_v12 = vmul.f32 %v5602_v57, %v2372_v16 }
 0x2f3   : > { %v3829_v24 = vpop.f32.mrb[16].mxu1  ;;  %v2431_v44 = vmin.f32 %v5672_v51, 0.0  ;;  %vm2423_vm11 = vcmp.gt.f32.partialorder %v5672_v51, 0.0 }
 0x2f4   : > { %v3830_v25 = vpop.f32.mrb[17].mxu1  ;;  %v1417_v5 = vpop.permute.xlu0 %1416  ;;  %v5677_v37 = vadd.f32 %v5607_v56, %v2401_v12 }
 0x2f5   : > { %v3831_v20 = vadd.f32 %v3830_v25, %v3829_v24  ;;  %v1620_v32 = vsel %vm1613_vm6, %v5534_v43, %v1417_v5  ;;  %v3832_v29 = vpop.f32.mrb[18].mxu1  ;;  %v2441_v42 = vmul.f32 1.442695, %v2431_v44  ;;  %v4370_v24 = vld [vmem:[%s6382_s13 + $0x68] sm:$0xff]   ;;  %v4371_v44 = vld [vmem:[%s6382_s13 + $0xa0] sm:$0xff]  }
 0x2f6   : > { %v3833_v50 = vpop.f32.mrb[19].mxu1  ;;  %v5682_v9 = vsel %vm1622_vm7, %v1620_v32, %v1448_v23  ;;  %v2432_v16 = vmin.f32 %v5677_v37, 0.0  ;;  %v4372_v25 = vld [vmem:[%s6382_s13 + $0x28] sm:$0xff]   ;;  %v4374_v32 = vld [vmem:[%s6382_s13 + $0x70] sm:$0xff]   ;;  %3857 = vmatprep.subr.bf16.mxu1 %v4370_v24  ;;  %3896 = vmatpush3.bf16.msra.mxu0 %v4371_v44  ;;  %v4378_v44 = vld [vmem:[%s6382_s13 + $0x78] sm:$0xff]   ;;  %vm2424_vm12 = vcmp.gt.f32.partialorder %v5677_v37, 0.0 }
 0x2f7   : > { %6431 = vst [vmem:[#allocation24_spill] sm:$0xff] %v5682_v9  ;;  %v2377_v48 = vadd.f32 %v3831_v20, %v5516_v14  ;;  %v3834_v27 = vadd.f32 %v3833_v50, %v3832_v29  ;;  %4393 = vpow2.f32 %v2441_v42  ;;  %v4373_v20 = vld [vmem:[%s6382_s13 + $0xe8] sm:$0xff]   ;;  %3858 = vmatpush3.bf16.msra.mxu1 %v4372_v25 }
 0x2f8   : > { %v1446_v12 = vpop.permute.xlu0 %1445  ;;  %v2443_v5 = vmul.f32 1.442695, %v2432_v16  ;;  %v4375_v42 = vld [vmem:[%s6382_s13 + $0xa8] sm:$0xff]   ;;  %3897 = vmatprep.subr.bf16.mxu0 %v4373_v20  ;;  %3859 = vmatprep.subr.bf16.mxu1 %v4374_v32 }
 0x2f9   : > { %v2402_v14 = vmul.f32 %v5602_v57, %v2377_v48  ;;  %v2380_v23 = vadd.f32 %v3834_v27, %v5523_v34  ;;  %v1628_v61 = vsel %vm1622_vm7, %v1619_v46, %v1446_v12  ;;  %v4390_v29 = vpop.eup %4389  ;;  %v4376_v48 = vld [vmem:[%s6382_s13 + $0x30] sm:$0xff]  }
 0x2fa   : > { %4395 = vpow2.f32 %v2443_v5  ;;  %v3632_v16 = vadd.f32 -1.0, %v4390_v29  ;;  %v4377_v27 = vld [vmem:[%s6382_s13 + $0xf0] sm:$0xff]   ;;  %3898 = vmatpush3.bf16.msra.mxu0 %v4375_v42 }
 0x2fb   : > { %v5710_v34 = vadd.f32 %v5607_v56, %v2402_v14  ;;  %v2403_v50 = vmul.f32 %v5602_v57, %v2380_v23  ;;  %v4392_v46 = vpop.eup %4391  ;;  %3860 = vmatpush3.bf16.msra.mxu1 %v4376_v48  ;;  %3899 = vmatprep.subr.bf16.mxu0 %v4377_v27  ;;  %v4381_v48 = vld [vmem:[%s6382_s13 + $0xf8] sm:$0xff]  }
 0x2fc   : > { %v3835_v12 = vpop.f32.mrb[20].mxu1  ;;  %v1478_v24 = vpop.permute.xlu0 %1477  ;;  %v3633_v25 = vadd.f32 -1.0, %v4392_v46  ;;  %v5732_v32 = vsel %vm2421_vm9, %v5627_v8, %v3632_v16  ;;  %v4379_v46 = vld [vmem:[%s6382_s13 + $0xb0] sm:$0xff]   ;;  %v6432_v16 = vmov 0.0   ;;  %3861 = vmatprep.subr.bf16.mxu1 %v4378_v44 }
 0x2fd   : > { %v2433_v5 = vmin.f32 %v5710_v34, 0.0  ;;  %v5725_v14 = vadd.f32 %v5607_v56, %v2403_v50  ;;  %v5728_v23 = vsel %vm1631_vm8, %v1628_v61, %v1478_v24  ;;  %v3836_v20 = vpop.f32.mrb[21].mxu1  ;;  %v2483_v44 = vrot.slane %v5732_v32, 1 }
 0x2fe   : > { %v3837_v29 = vadd.f32 %v3836_v20, %v3835_v12  ;;  %v3838_v6 = vpop.f32.mrb[22].mxu1  ;;  %v5738_v31 = vsel %vm2422_vm10, %v5646_v36, %v3633_v25  ;;  %v4380_v12 = vld [vmem:[%s6382_s13 + $0x38] sm:$0xff]   ;;  %v4254_v20 = vpack.i.bf16 %v5732_v32, %v6432_v16  ;;  %v2469_v36 = vrot.slane %v5732_v32, 7  ;;  %3900 = vmatpush3.bf16.msra.mxu0 %v4379_v46 }
 0x2ff   : > { %v2445_v50 = vmul.f32 1.442695, %v2433_v5  ;;  %v2434_v61 = vmin.f32 %v5725_v14, 0.0  ;;  %v3839_v24 = vpop.f32.mrb[23].mxu1  ;;  %v2470_v5 = vrot.slane %v5738_v31, 7  ;;  %3862 = vmatpush3.bf16.msra.mxu1 %v4380_v12  ;;  %3901 = vmatprep.subr.bf16.mxu0 %v4381_v48  ;;  %vm2425_vm13 = vcmp.gt.f32.partialorder %v5710_v34, 0.0 }
 0x300   : > { %v2385_v8 = vadd.f32 %v5514_v39, %v3837_v29  ;;  %v3840_v42 = vadd.f32 %v3839_v24, %v3838_v6  ;;  %v1419_v13 = vpop.permute.xlu0 %1418  ;;  %4255 = vrot.lane.b32.xlu1 %v4254_v20, %s6419_s29  ;;  %v5756_v6 = vmul.f32 %v2469_v36, %v4772_v19  ;;  %v4382_v29 = vld [vmem:[%s6382_s13 + $0xb8] sm:$0xff]   ;;  %v2484_v24 = vrot.slane %v5738_v31, 1 }
 0x301   : > { %4397 = vpow2.f32 %v2445_v50  ;;  %v2447_v25 = vmul.f32 1.442695, %v2434_v61  ;;  %v4394_v27 = vpop.eup %4393  ;;  %v5763_v50 = vmul.f32 %v2470_v5, %v4772_v19  ;;  %v1621_v46 = vsel %vm1613_vm6, %v5508_v10, %v1419_v13 }
 0x302   : > { %v2404_v52 = vmul.f32 %v5602_v57, %v2385_v8  ;;  %v2388_v39 = vadd.f32 %v5521_v40, %v3840_v42  ;;  %v3634_v61 = vadd.f32 -1.0, %v4394_v27  ;;  %3902 = vmatpush3.bf16.msra.mxu0 %v4382_v29  ;;  %v5791_v27 = vmul.f32 %v2483_v44, %v4752_v2 }
 0x303   : > { %4399 = vpow2.f32 %v2447_v25  ;;  %v4259_v25 = vpack.i.bf16 %v5763_v50, %v5756_v6  ;;  %vm2426_vm14 = vcmp.gt.f32.partialorder %v5725_v14, 0.0 }
 0x304   : > { %v5767_v40 = vadd.f32 %v5607_v56, %v2404_v52  ;;  %v2405_v8 = vmul.f32 %v5602_v57, %v2388_v39  ;;  %v1450_v42 = vpop.permute.xlu0 %1449  ;;  %v4396_v20 = vpop.eup %4395  ;;  %v5779_v12 = vsel %vm2423_vm11, %v5672_v51, %v3634_v61  ;;  %v5782_v52 = vmul.f32 %v2484_v24, %v4752_v2 }
 0x305   : > { %v5774_v36 = vsel %vm1622_vm7, %v1621_v46, %v1450_v42  ;;  %v3635_v57 = vadd.f32 -1.0, %v4396_v20  ;;  %v4269_v48 = vpack.i.bf16 %v5779_v12, %v5738_v31  ;;  %4260 = vrot.lane.b32.xlu0 %v4259_v25, %s6419_s29  ;;  %v2471_v51 = vrot.slane %v5779_v12, 7 }
 0x306   : > { %v2435_v5 = vmin.f32 %v5767_v40, 0.0  ;;  %v2420_v13 = vadd.f32 %v5607_v56, %v2405_v8  ;;  %v2485_v39 = vrot.slane %v5779_v12, 1  ;;  %v4264_v29 = vpack.i.bf16 %v5782_v52, %v5791_v27 }
 0x307   : > { %v5796_v61 = vsel %vm2424_vm12, %v5677_v37, %v3635_v57  ;;  %4270 = vrot.lane.b32.xlu1 %v4269_v48, %s6419_s29  ;;  %v5805_v20 = vmul.f32 %v2471_v51, %v4772_v19  ;;  %vm2427_vm2 = vcmp.gt.f32.partialorder %v5767_v40, 0.0 }
 0x308   : > { %v2449_v24 = vmul.f32 1.442695, %v2435_v5  ;;  %v2436_v56 = vmin.f32 %v2420_v13, 0.0  ;;  %v2472_v8 = vrot.slane %v5796_v61, 7  ;;  %v2486_v46 = vrot.slane %v5796_v61, 1 }
 0x309   : > { %4265 = vrot.lane.b32.xlu0 %v4264_v29, %s6419_s29  ;;  %v5811_v25 = vmul.f32 %v2485_v39, %v4752_v2  ;;  %vm2428_vm15 = vcmp.gt.f32.partialorder %v2420_v13, 0.0 }
 0x30a   : > { %v2451_v44 = vmul.f32 1.442695, %v2436_v56  ;;  %v5808_v37 = vmul.f32 %v2472_v8, %v4772_v19  ;;  %v5814_v57 = vmul.f32 %v2486_v46, %v4752_v2  ;;  %4401 = vpow2.f32 %v2449_v24 }
 0x30b   : > { %v4398_v42 = vpop.eup %4397 }
 0x30c   : > { %v3636_v5 = vadd.f32 -1.0, %v4398_v42  ;;  %4403 = vpow2.f32 %v2451_v44  ;;  %v4274_v56 = vpack.i.bf16 %v5808_v37, %v5805_v20  ;;  %v4279_v51 = vpack.i.bf16 %v5814_v57, %v5811_v25 }
 0x30d   : > { %v4400_v48 = vpop.eup %4399 }
 0x30e   : > { %v3637_v29 = vadd.f32 -1.0, %v4400_v48  ;;  %v5822_v8 = vsel %vm2425_vm13, %v5710_v34, %v3636_v5  ;;  %4275 = vrot.lane.b32.xlu0 %v4274_v56, %s6419_s29  ;;  %4280 = vrot.lane.b32.xlu1 %v4279_v51, %s6419_s29 }
 0x30f   : > { %v4284_v39 = vpack.i.bf16 %v5822_v8, %v5796_v61  ;;  %v2473_v24 = vrot.slane %v5822_v8, 7 }
 0x310   : > { %v5831_v46 = vsel %vm2426_vm14, %v5725_v14, %v3637_v29  ;;  %v2487_v14 = vrot.slane %v5822_v8, 1 }
 0x311   : > { %v2474_v44 = vrot.slane %v5831_v46, 7  ;;  %v5836_v34 = vmul.f32 %v2473_v24, %v4772_v19  ;;  %v2488_v48 = vrot.slane %v5831_v46, 1 }
 0x312   : > { %4285 = vrot.lane.b32.xlu0 %v4284_v39, %s6419_s29 }
 0x313   : > { %v5839_v42 = vmul.f32 %v2474_v44, %v4772_v19  ;;  %v5849_v29 = vmul.f32 %v2488_v48, %v4752_v2  ;;  %v5854_v44 = vld [vmem:[%s6382_s13 + $0x100] sm:$0xff]  }
 0x314   : > { %v4402_v56 = vpop.eup %4401  ;;  %3959 = vmatprep.subr.bf16.mxu1 %v5854_v44 }
 0x315   : > { %v4289_v5 = vpack.i.bf16 %v5839_v42, %v5836_v34  ;;  %v3638_v24 = vadd.f32 -1.0, %v4402_v56 }
 0x316   : > { %v4404_v51 = vpop.eup %4403  ;;  %1498 = vrot.lane.b32.xlu0 %v5458_v21, %s4523_s28 }
 0x317   : > { %4290 = vrot.lane.b32.xlu1 %v4289_v5, %s6419_s29  ;;  %v3639_v39 = vadd.f32 -1.0, %v4404_v51  ;;  %v5861_v5 = vmul.f32 %v2487_v14, %v4752_v2  ;;  %v5870_v51 = vsel %vm2427_vm2, %v5767_v40, %v3638_v24 }
 0x318   : > { %v4299_v14 = vpack.i.bf16 %v5870_v51, %v5831_v46  ;;  %v2489_v3 = vrot.slane %v5870_v51, 1  ;;  %v2475_v40 = vrot.slane %v5870_v51, 7 }
 0x319   : > { %v4294_v48 = vpack.i.bf16 %v5849_v29, %v5861_v5  ;;  %v5867_v56 = vsel %vm2428_vm15, %v2420_v13, %v3639_v39 }
 0x31a   : > { %1502 = vrot.lane.b32.xlu0 %v5463_v54, %s4523_s28  ;;  %v2497_v9 = vrot.slane %v5867_v56, 7  ;;  %v5887_v39 = vmul.f32 %v2489_v3, %v4752_v2  ;;  %v5893_v24 = vmul.f32 %v2475_v40, %v4772_v19  ;;  %v2499_v3 = vrot.slane %v5867_v56, 1 }
 0x31b   : > { %1496 = vrot.lane.b32.xlu1 %v5430_v49, %s4523_s28 }
 0x31c   : > { %v5884_v13 = vmul.f32 %v2497_v9, %v4772_v19  ;;  %v1395_v19 = vrot.slane %v5536_v26, 1  ;;  %v5908_v9 = vmul.f32 %v2499_v3, %v4752_v2 }
 0x31e   : > { %4295 = vrot.lane.b32.xlu0 %v4294_v48, %s6419_s29  ;;  %v4309_v48 = vpack.i.bf16 %v5884_v13, %v5893_v24  ;;  %v1396_v40 = vmul.f32 %v1395_v19, %v4752_v2  ;;  %v5938_v2 = vpop.permute.xlu1 %1479 }
 0x31f   : > { %1500 = vrot.lane.b32.xlu1 %v5455_v53, %s4523_s28 }
 0x322   : > { %1506 = vrot.lane.b32.xlu0 %v5536_v26, %s4523_s28 }
 0x323   : > { %4300 = vrot.lane.b32.xlu1 %v4299_v14, %s6419_s29  ;;  %v4304_v14 = vpack.i.bf16 %v5887_v39, %v5867_v56 }
 0x326   : > { %1519 = vrot.lane.b32.xlu0 %v5436_v4, %s4526_s23 }
 0x327   : > { %1504 = vrot.lane.b32.xlu1 %v5492_v63, %s4523_s28 }
 0x32a   : > { %4310 = vrot.lane.b32.xlu0 %v4309_v48, %s6419_s29  ;;  %v4384_v48 = vld [vmem:[%s6382_s13 + $0x108] sm:$0xff]  }
 0x32b   : > { %4305 = vrot.lane.b32.xlu1 %v4304_v14, %s6419_s29 }
 0x32e   : > { %1523 = vrot.lane.b32.xlu0 %v5485_v22, %s4526_s23 }
 0x32f   : > { %1517 = vrot.lane.b32.xlu1 %v5413_v45, %s4526_s23  ;;  %v5940_v45 = vpop.permute.xlu0 %1481 }
 0x332   : > { %1527 = vrot.lane.b32.xlu0 %v5479_v11, %s4526_s23 }
 0x333   : > { %1521 = vrot.lane.b32.xlu1 %v5473_v62, %s4526_s23 }
 0x336   : > { %2586 = vrot.lane.b32.xlu0 %v5908_v9, %s6419_s29  ;;  %s4528_s29 = smov 14  }
 0x337   : > { %1525 = vrot.lane.b32.xlu1 %v5528_v38, %s4526_s23 }
 0x33a   : > { %1531 = vrot.lane.b32.xlu0 %v1396_v40, %s4526_s23 }
 0x33b   : > { %1529 = vrot.lane.b32.xlu1 %v5544_v1, %s4526_s23 }
 0x33e   : > { %1543 = vrot.lane.b32.xlu0 %v5441_v28, %s4527_s27 }
 0x33f   : > { %1541 = vrot.lane.b32.xlu1 %v5446_v47, %s4527_s27 }
 0x342   : > { %1547 = vrot.lane.b32.xlu0 %v5467_v35, %s4527_s27 }
 0x343   : > { %1545 = vrot.lane.b32.xlu1 %v5500_v15, %s4527_s27 }
 0x346   : > { %1551 = vrot.lane.b32.xlu0 %v5508_v10, %s4527_s27 }
 0x347   : > { %1549 = vrot.lane.b32.xlu1 %v5534_v43, %s4527_s27 }
 0x34a   : > { %1555 = vrot.lane.b32.xlu0 %v4954_v30, %s4527_s27 }
 0x34b   : > { %1553 = vrot.lane.b32.xlu1 %v5550_v7, %s4527_s27  ;;  %s6319_s27 = scalar_lea.hbm %s6385_s16, %s3754_s19 }
 0x34e   : > { %1567 = vrot.lane.b32.xlu0 %v5430_v49, %s4528_s29 }
 0x34f   : > { %1565 = vrot.lane.b32.xlu1 %v5408_v33, %s4528_s29 }
 0x352   : > { %1571 = vrot.lane.b32.xlu0 %v5455_v53, %s4528_s29 }
 0x353   : > { %1569 = vrot.lane.b32.xlu1 %v5458_v21, %s4528_s29 }
 0x356   : > { %1575 = vrot.lane.b32.xlu0 %v5492_v63, %s4528_s29 }
 0x357   : > { %1573 = vrot.lane.b32.xlu1 %v5463_v54, %s4528_s29 }
 0x35a   : > { %1579 = vrot.lane.b32.xlu0 %v6432_v16, %s4528_s29 }
 0x35b   : > { %1577 = vrot.lane.b32.xlu1 %v5536_v26, %s4528_s29  ;;  %s4453_s29 = scalar_lea.vmem %s6321_s20, 1024 }
 0x35c   : > { %p4454_p11 = scmp.ne.s32.totalorder %s6321_s20, %s4453_s29 }
 0x35e   : > { %1591 = vrot.lane.b32.xlu0 %v5473_v62, %s4529_s21  ;;  %p4455_p12 = pnand %p4454_p11, %p4658_p5 }
 0x35f   : > { %1589 = vrot.lane.b32.xlu1 %v5436_v4, %s4529_s21 }
 0x360   : > { %p4456_p13 = pneg %p4455_p12 }
 0x362   : > { %1595 = vrot.lane.b32.xlu0 %v5528_v38, %s4529_s21 }
 0x363   : > { %1593 = vrot.lane.b32.xlu1 %v5485_v22, %s4529_s21 }
 0x366   : > { %1599 = vrot.lane.b32.xlu0 %v5544_v1, %s4529_s21 }
 0x367   : > { %1597 = vrot.lane.b32.xlu1 %v5479_v11, %s4529_s21 }
 0x36a   : > { %1603 = vrot.lane.b32.xlu0 %v4880_v17, %s4529_s21 }
 0x36b   : > { %1601 = vrot.lane.b32.xlu1 %v1396_v40, %s4529_s21 }
 0x372   : > { %v4256_v33 = vpop.permute.xlu1 %4255 }
 0x373   : > { %v4258_v49 = vunpack.i.h.bf16 %v4256_v33  ;;  %v4257_v28 = vunpack.i.l.bf16 %v4256_v33 }
 0x375   : > { %v2601_v35 = vsel %vm929_vm4, %v5756_v6, %v4258_v49  ;;  %v5946_v62 = vsel %vm929_vm4, %v4954_v30, %v4257_v28 }
 0x376   : > { %v3737_v1 = vpack.c.bf16 %v2601_v35, %v5946_v62  ;;  %v577_v35 = vld [vmem:[%s6370_s1 + $0x2] sm:$0x3] }
 0x377   : > { %v4261_v53 = vpop.permute.xlu0 %4260 }
 0x378   : > { %v4263_v4 = vunpack.i.h.bf16 %v4261_v53  ;;  %v4262_v21 = vunpack.i.l.bf16 %v4261_v53 }
 0x379   : > { %v4271_v54 = vpop.permute.xlu1 %4270 }
 0x37a   : > { %v4273_v11 = vunpack.i.h.bf16 %v4271_v54  ;;  %v4272_v22 = vunpack.i.l.bf16 %v4271_v54  ;;  %v2608_v63 = vsel %vm929_vm4, %v4880_v17, %v4262_v21  ;;  %v2609_v15 = vsel %vm929_vm4, %v5791_v27, %v4263_v4 }
 0x37b   : > { %v4266_v10 = vpop.permute.xlu0 %4265  ;;  %v3738_v38 = vpack.c.bf16 %v2609_v15, %v2608_v63  ;;  %v4386_v63 = vld [vmem:[%s6382_s13 + $0x118] sm:$0xff]  }
 0x37c   : > { %v2602_v43 = vsel %vm929_vm4, %v5763_v50, %v4272_v22  ;;  %v2603_v26 = vsel %vm929_vm4, %v5805_v20, %v4273_v11  ;;  %v4268_v7 = vunpack.i.h.bf16 %v4266_v10  ;;  %v4267_v16 = vunpack.i.l.bf16 %v4266_v10  ;;  %v592_v50 = vld [vmem:[%s6371_s2] sm:$0x3] }
 0x37d   : > { %v3740_v6 = vpack.c.bf16 %v2603_v26, %v2602_v43  ;;  %3083 = vmatprep.mubr.bf16.mxu1 %v3738_v38  ;;  %v595_v28 = vmul.f32 %v592_v50, %v4740_v55  ;;  %v1616_v26 = vsel %vm1613_vm6, %v5446_v47, %v5558_v60 }
 0x37e   : > { %v2617_v27 = vsel %vm929_vm4, %v5738_v31, %v4268_v7  ;;  %v2616_v14 = vsel %vm929_vm4, %v5732_v32, %v4267_v16  ;;  %3084 = vmatmul.mubr.bf16.vlgmr.msra.gmra.mrb[24].mxu1 %v3737_v1  ;;  %v4385_v31 = vld [vmem:[%s6382_s13 + $0x110] sm:$0xff]   ;;  %v580_v16 = vmul.f32 %v577_v35, %v4745_v58 }
 0x37f   : > { %3148 = vmatprep.mubr.bf16.mxu0 %v3740_v6  ;;  %v3739_v20 = vpack.c.bf16 %v2617_v27, %v2616_v14  ;;  %3960 = vmatpush3.bf16.msra.mxu1 %v5854_v44  ;;  %v593_v44 = vld [vmem:[%s6371_s2 + $0x2] sm:$0x3]  ;;  %v598_v15 = vsel %vm582_vm1, %v595_v28, 0.0 }
 0x380   : > { %v4276_v3 = vpop.permute.xlu0 %4275  ;;  %v4281_v19 = vpop.permute.xlu1 %4280  ;;  %3961 = vmatprep.subr.bf16.mxu1 %v4384_v48  ;;  %v596_v43 = vmul.f32 %v593_v44, %v4740_v55 }
 0x381   : > { %v4278_v40 = vunpack.i.h.bf16 %v4276_v3  ;;  %v4277_v33 = vunpack.i.l.bf16 %v4276_v3  ;;  %v4283_v49 = vunpack.i.h.bf16 %v4281_v19  ;;  %v4282_v32 = vunpack.i.l.bf16 %v4281_v19  ;;  %3149 = vmatmul.mubr.bf16.vlgmr.msra.gmra.mrb[24].mxu0 %v3739_v20 }
 0x382   : > { %v601_v58 = vsel %vm582_vm1, %v596_v43, 0.0 }
 0x383   : > { %v2610_v53 = vsel %vm929_vm4, %v5782_v52, %v4277_v33  ;;  %v2611_v4 = vsel %vm929_vm4, %v5811_v25, %v4278_v40  ;;  %3962 = vmatpush3.bf16.msra.mxu1 %v4384_v48  ;;  %v2618_v10 = vsel %vm929_vm4, %v5779_v12, %v4282_v32  ;;  %v2619_v38 = vsel %vm929_vm4, %v5796_v61, %v4283_v49 }
 0x384   : > { %v4286_v21 = vpop.permute.xlu0 %4285  ;;  %v3742_v54 = vpack.c.bf16 %v2611_v4, %v2610_v53  ;;  %3963 = vmatprep.subr.bf16.mxu1 %v4385_v31  ;;  %v1625_v12 = vsel %vm1622_vm7, %v1616_v26, %v5568_v41  ;;  %v586_v41 = vsel %vm582_vm1, %v580_v16, 0.0 }
 0x385   : > { %v4288_v11 = vunpack.i.h.bf16 %v4286_v21  ;;  %v4287_v22 = vunpack.i.l.bf16 %v4286_v21 }
 0x386   : > { %3091 = vmatprep.mubr.bf16.mxu1 %v3742_v54 }
 0x387   : > { %3092 = vmatmul.mubr.bf16.gmra.mrb[28].mxu1 %v3740_v6  ;;  %v2604_v1 = vsel %vm929_vm4, %v5808_v37, %v4287_v22  ;;  %v2605_v7 = vsel %vm929_vm4, %v5836_v34, %v4288_v11  ;;  %v3743_v6 = vpack.c.bf16 %v2619_v38, %v2618_v10  ;;  %v6434_v11 = vld [vmem:[#allocation24_spill] sm:$0xff] }
 0x388   : > { %v1499_v61 = vpop.permute.xlu0 %1498  ;;  %v3744_v55 = vpack.c.bf16 %v2605_v7, %v2604_v1  ;;  %3964 = vmatpush3.bf16.msra.mxu1 %v4385_v31  ;;  %v1638_v22 = vsel %vm1631_vm8, %v6434_v11, %v5938_v2  ;;  %v6440_v11 = vld [vmem:[#allocation22_spill] sm:$0xff] }
 0x389   : > { %v4291_v48 = vpop.permute.xlu1 %4290  ;;  %v6003_v47 = vsel %vm1640_vm3, %v5656_v18, %v1499_v61  ;;  %599 = vadd.xlane.f32.xlu0 %v598_v15  ;;  %3965 = vmatprep.subr.bf16.mxu1 %v4386_v63  ;;  %v1634_v18 = vsel %vm1631_vm8, %v1625_v12, %v5585_v59  ;;  %v6435_v61 = vld [vmem:[#allocation13_spill] sm:$0xff] }
 0x38a   : > { %v4293_v60 = vunpack.i.h.bf16 %v4291_v48  ;;  %v4292_v37 = vunpack.i.l.bf16 %v4291_v48  ;;  %3156 = vmatprep.mubr.bf16.mxu0 %v3744_v55 }
 0x38b   : > { %3157 = vmatmul.mubr.bf16.gmra.mrb[28].mxu0 %v3743_v6 }
 0x38c   : > { %v2612_v34 = vsel %vm929_vm4, %v5814_v57, %v4292_v37  ;;  %v2613_v27 = vsel %vm929_vm4, %v5861_v5, %v4293_v60  ;;  %v1503_v14 = vpop.permute.xlu0 %1502  ;;  %3966 = vmatpush3.bf16.msra.mxu1 %v4386_v63 }
 0x38d   : > { %v1497_v50 = vpop.permute.xlu1 %1496  ;;  %v3746_v20 = vpack.c.bf16 %v2613_v27, %v2612_v34  ;;  %v6015_v3 = vsel %vm1640_vm3, %v5728_v23, %v1503_v14  ;;  %602 = vadd.xlane.f32.xlu0 %v601_v58  ;;  %v1639_v23 = vsel %vm1631_vm8, %v5774_v36, %v5940_v45  ;;  %v6433_v36 = vld [vmem:[#allocation12_spill] sm:$0xff]  ;;  %v3741_v58 = vpack.c.bf16 %v5811_v25, %v5782_v52 }
 0x38e   : > { %v6018_v19 = vsel %vm1640_vm3, %v1634_v18, %v1497_v50  ;;  %v621_v45 = vsub.s32 1, %v6433_v36  ;;  %v3745_v14 = vpack.c.bf16 %v5861_v5, %v5814_v57  ;;  %v3749_v50 = vpack.c.bf16 %v5887_v39, %v5849_v29 }
 0x38f   : > { %587 = vadd.xlane.f32.xlu1 %v586_v41  ;;  %3099 = vmatprep.mubr.bf16.mxu1 %v3746_v20 }
 0x390   : > { %3100 = vmatmul.mubr.bf16.gmra.mrb[32].mxu1 %v3744_v55  ;;  %v4296_v40 = vpop.permute.xlu0 %4295 }
 0x391   : > { %v1501_v33 = vpop.permute.xlu1 %1500  ;;  %v4298_v31 = vunpack.i.h.bf16 %v4296_v40  ;;  %v4297_v49 = vunpack.i.l.bf16 %v4296_v40 }
 0x392   : > { %v6022_v59 = vsel %vm1640_vm3, %v5631_v0, %v1501_v33 }
 0x393   : > { %v2620_v21 = vsel %vm929_vm4, %v5822_v8, %v4297_v49  ;;  %v2621_v0 = vsel %vm929_vm4, %v5831_v46, %v4298_v31 }
 0x394   : > { %v1507_v32 = vpop.permute.xlu0 %1506  ;;  %v3747_v46 = vpack.c.bf16 %v2621_v0, %v2620_v21  ;;  %v6437_v0 = vld [vmem:[#allocation17_spill] sm:$0xff] }
 0x395   : > { %v4301_v28 = vpop.permute.xlu1 %4300  ;;  %v6028_v53 = vsel %vm1640_vm3, %v1639_v23, %v1507_v32 }
 0x396   : > { %v4303_v4 = vunpack.i.h.bf16 %v4301_v28  ;;  %v4302_v44 = vunpack.i.l.bf16 %v4301_v28  ;;  %v6436_v28 = vld [vmem:[#allocation15_spill] sm:$0xff] }
 0x398   : > { %v2606_v54 = vsel %vm929_vm4, %v5839_v42, %v4302_v44  ;;  %v2607_v35 = vsel %vm929_vm4, %v5893_v24, %v4303_v4  ;;  %v6042_v63 = vpop.permute.xlu0 %1519  ;;  %v4443_v42 = vld [vmem:[%s6372_s3] sm:$0x7]  ;;  %v1614_v4 = vsel %vm1613_vm6, %v4954_v30, %v6436_v28 }
 0x399   : > { %v1505_v15 = vpop.permute.xlu1 %1504  ;;  %v3748_v10 = vpack.c.bf16 %v2607_v35, %v2606_v54  ;;  %v622_v24 = vrot.slane %v4443_v42, %v621_v45  ;;  %v615_v48 = vrot.slane %v4443_v42, %v6435_v61  ;;  %v6439_v54 = vld [vmem:[#allocation14_spill] sm:$0xff] }
 0x39a   : > { %v6045_v8 = vsel %vm1640_vm3, %v1638_v22, %v1505_v15  ;;  %v6441_v15 = vld [vmem:[#allocation23_spill] sm:$0xff] }
 0x39b   : > { %3164 = vmatprep.mubr.bf16.mxu0 %v3748_v10 }
 0x39c   : > { %3165 = vmatmul.mubr.bf16.gmra.mrb[32].mxu0 %v3747_v46  ;;  %v4311_v38 = vpop.permute.xlu0 %4310  ;;  %v6442_v46 = vld [vmem:[#allocation21_spill] sm:$0xff] }
 0x39d   : > { %v4306_v43 = vpop.permute.xlu1 %4305  ;;  %v4313_v26 = vunpack.i.h.bf16 %v4311_v38  ;;  %v4312_v1 = vunpack.i.l.bf16 %v4311_v38  ;;  %v6443_v38 = vld [vmem:[#allocation19_spill] sm:$0xff] }
 0x39e   : > { %v4307_v2 = vunpack.i.l.bf16 %v4306_v43  ;;  %v4308_v34 = vunpack.i.h.bf16 %v4306_v43 }
 0x39f   : > { %v2614_v7 = vsel %vm929_vm4, %v5849_v29, %v4312_v1  ;;  %v2615_v16 = vsel %vm929_vm4, %v5887_v39, %v4313_v26  ;;  %v6444_v26 = vld [vmem:[#allocation20_spill] sm:$0xff] }
 0x3a0   : > { %v2624_v12 = vsel %vm929_vm4, %v5884_v13, %v4307_v2  ;;  %624 = vbcast.lane.b32.xlu1 %v622_v24, 256  ;;  %v6057_v55 = vpop.permute.xlu0 %1523  ;;  %v3750_v37 = vpack.c.bf16 %v2615_v16, %v2614_v7 }
 0x3a1   : > { %v1518_v60 = vpop.permute.xlu1 %1517  ;;  %v3752_v6 = vpack.c.bf16 %v5946_v62, %v2624_v12  ;;  %v2622_v62 = vsel %vm929_vm4, %v5870_v51, %v4308_v34  ;;  %v3753_v51 = vpack.c.bf16 %v4880_v17, %v5908_v9  ;;  %v1623_v17 = vsel %vm1622_vm7, %v1614_v4, %v6437_v0  ;;  %v6438_v9 = vld [vmem:[#allocation16_spill] sm:$0xff] }
 0x3a2   : > { %3107 = vmatprep.mubr.bf16.mxu1 %v3750_v37  ;;  %v1615_v35 = vsel %vm1613_vm6, %v6439_v54, %v6438_v9  ;;  %vm1667_vm6 = vcmask 113664  }
 0x3a3   : > { %3172 = vmatprep.mubr.bf16.mxu0 %v3752_v6  ;;  %3108 = vmatmul.mubr.bf16.gmra.mrb[36].mxu1 %v3748_v10  ;;  %v1624_v22 = vsel %vm1622_vm7, %v1615_v35, %v6440_v11  ;;  %v1632_v10 = vsel %vm1631_vm8, %v1623_v17, %v6441_v15  ;;  %vm1676_vm7 = vcmask 130048  }
 0x3a4   : > { %617 = vbcast.lane.b32.xlu0 %v615_v48, 256  ;;  %v6062_v41 = vpop.permute.xlu0 %1527  ;;  %3967 = vmatprep.mubr.msk.bf16.mxu1 %vm929_vm4, %v3741_v58  ;;  %v1633_v30 = vsel %vm1631_vm8, %v1624_v22, %v6442_v46  ;;  %v1641_v1 = vsel %vm1640_vm3, %v1632_v10, %v6444_v26  ;;  %v3594_v48 = vld [vmem:[%s6377_s8] ss:$0 sm:$0xff]  ;;  %vm1699_vm8 = vcmask 146432   ;;  %v6445_v26 = vld [vmem:[#allocation18_spill] sm:$0xff] }
 0x3a5   : > { %v1522_v13 = vpop.permute.xlu1 %1521  ;;  %v1642_v43 = vsel %vm1640_vm3, %v1633_v30, %v6443_v38 }
 0x3a8   : > { %v2587_v27 = vpop.permute.xlu0 %2586 }
 0x3a9   : > { %v6065_v18 = vpop.permute.xlu1 %1525  ;;  %v2623_v52 = vsel %vm929_vm4, %v5867_v56, %v2587_v27 }
 0x3aa   : > { %v3751_v25 = vpack.c.bf16 %v2623_v52, %v2622_v62 }
 0x3ab   : > { %3968 = vmatmul.mubr.msk.bf16.vlgmr.msra.gmra.mrb[40].mxu1 %vm929_vm4, %v3745_v14 }
 0x3ac   : > { %v6076_v20 = vpop.permute.xlu0 %1531  ;;  %3173 = vmatmul.mubr.bf16.gmra.mrb[36].mxu0 %v3751_v25  ;;  %3971 = vmatprep.mubr.msk.bf16.mxu1 %vm929_vm4, %v3749_v50 }
 0x3ad   : > { %v6079_v40 = vpop.permute.xlu1 %1529 }
 0x3b0   : > { %v1544_v57 = vpop.permute.xlu0 %1543 }
 0x3b1   : > { %v1542_v5 = vpop.permute.xlu1 %1541 }
 0x3b3   : > { %3972 = vmatmul.mubr.msk.bf16.gmra.mrb[44].mxu1 %vm929_vm4, %v3753_v51  ;;  %vm1649_vm4 = vcmask 80896  }
 0x3b4   : > { %v1548_v56 = vpop.permute.xlu0 %1547  ;;  %v1651_v2 = vsel %vm1649_vm4, %v1642_v43, %v6042_v63  ;;  %v1650_v7 = vsel %vm1649_vm4, %v1641_v1, %v1518_v60  ;;  %v1653_v60 = vsel %vm1649_vm4, %v6003_v47, %v6057_v55  ;;  %v1652_v14 = vsel %vm1649_vm4, %v6018_v19, %v1522_v13 }
 0x3b5   : > { %v1546_v33 = vpop.permute.xlu1 %1545  ;;  %v1660_v16 = vsel %vm1658_vm5, %v1651_v2, %v1544_v57  ;;  %v1659_v12 = vsel %vm1658_vm5, %v1650_v7, %v1542_v5  ;;  %v1662_v25 = vsel %vm1658_vm5, %v1653_v60, %v1548_v56  ;;  %v1655_v55 = vsel %vm1649_vm4, %v6015_v3, %v6062_v41 }
 0x3b6   : > { %v1661_v50 = vsel %vm1658_vm5, %v1652_v14, %v1546_v33  ;;  %v1654_v13 = vsel %vm1649_vm4, %v6022_v59, %v6065_v18  ;;  %v1657_v18 = vsel %vm1649_vm4, %v6028_v53, %v6076_v20 }
 0x3b8   : > { %v1552_v31 = vpop.permute.xlu0 %1551 }
 0x3b9   : > { %v1550_v29 = vpop.permute.xlu1 %1549  ;;  %v1664_v4 = vsel %vm1658_vm5, %v1655_v55, %v1552_v31  ;;  %v1656_v31 = vsel %vm1649_vm4, %v6045_v8, %v6079_v40 }
 0x3bc   : > { %v6084_v39 = vpop.permute.xlu0 %1555 }
 0x3bd   : > { %v6086_v49 = vpop.permute.xlu1 %1553 }
 0x3c0   : > { %v1568_v23 = vpop.permute.xlu0 %1567 }
 0x3c1   : > { %v1566_v32 = vpop.permute.xlu1 %1565  ;;  %v1669_v37 = vsel %vm1667_vm6, %v1660_v16, %v1568_v23 }
 0x3c2   : > { %v1668_v6 = vsel %vm1667_vm6, %v1659_v12, %v1566_v32 }
 0x3c4   : > { %v1572_v44 = vpop.permute.xlu0 %1571 }
 0x3c5   : > { %v1570_v21 = vpop.permute.xlu1 %1569  ;;  %v1671_v57 = vsel %vm1667_vm6, %v1662_v25, %v1572_v44  ;;  %v1663_v44 = vsel %vm1658_vm5, %v1654_v13, %v1550_v29 }
 0x3c6   : > { %v1670_v5 = vsel %vm1667_vm6, %v1661_v50, %v1570_v21 }
 0x3c8   : > { %v1576_v36 = vpop.permute.xlu0 %1575 }
 0x3c9   : > { %v1574_v45 = vpop.permute.xlu1 %1573  ;;  %v1673_v21 = vsel %vm1667_vm6, %v1664_v4, %v1576_v36  ;;  %v1666_v36 = vsel %vm1658_vm5, %v1657_v18, %v6084_v39 }
 0x3ca   : > { %v1672_v0 = vsel %vm1667_vm6, %v1663_v44, %v1574_v45  ;;  %v1665_v45 = vsel %vm1658_vm5, %v1656_v31, %v6086_v49  ;;  %v3595_v44 = vld [vmem:[#allocation2] ss:$0 sm:$0xff] }
 0x3cc   : > { %v1580_v42 = vpop.permute.xlu0 %1579 }
 0x3cd   : > { %v1578_v24 = vpop.permute.xlu1 %1577  ;;  %v1675_v11 = vsel %vm1667_vm6, %v1666_v36, %v1580_v42 }
 0x3ce   : > { %v1674_v22 = vsel %vm1667_vm6, %v1665_v45, %v1578_v24 }
 0x3d0   : > { %v1592_v58 = vpop.permute.xlu0 %1591 }
 0x3d1   : > { %v1590_v34 = vpop.permute.xlu1 %1589  ;;  %v1678_v27 = vsel %vm1676_vm7, %v1669_v37, %v1592_v58 }
 0x3d2   : > { %v1677_v63 = vsel %vm1676_vm7, %v1668_v6, %v1590_v34  ;;  %v1692_v62 = vmul.f32 %v3594_v48, %v1678_v27 }
 0x3d3   : > { %v1691_v52 = vmul.f32 %v3594_v48, %v1677_v63 }
 0x3d4   : > { %v1596_v51 = vpop.permute.xlu0 %1595  ;;  %v1703_v23 = vsel %vm1699_vm8, %v1692_v62, 0.0 }
 0x3d5   : > { %v1594_v32 = vpop.permute.xlu1 %1593  ;;  %v1700_v28 = vsel %vm1699_vm8, %v1691_v52, 0.0  ;;  %v1680_v47 = vsel %vm1676_vm7, %v1671_v57, %v1596_v51  ;;  %1704 = vadd.xlane.f32.xlu0 %v1703_v23 }
 0x3d6   : > { %v1679_v19 = vsel %vm1676_vm7, %v1670_v5, %v1594_v32  ;;  %1701 = vadd.xlane.f32.xlu1 %v1700_v28  ;;  %v1694_v56 = vmul.f32 %v3594_v48, %v1680_v47 }
 0x3d7   : > { %v1693_v33 = vmul.f32 %v3594_v48, %v1679_v19 }
 0x3d8   : > { %v1600_v17 = vpop.permute.xlu0 %1599  ;;  %v1709_v54 = vsel %vm1699_vm8, %v1694_v56, 0.0 }
 0x3d9   : > { %v1598_v9 = vpop.permute.xlu1 %1597  ;;  %v1706_v3 = vsel %vm1699_vm8, %v1693_v33, 0.0  ;;  %v1682_v41 = vsel %vm1676_vm7, %v1673_v21, %v1600_v17 }
 0x3da   : > { %v1681_v59 = vsel %vm1676_vm7, %v1672_v0, %v1598_v9  ;;  %1710 = vadd.xlane.f32.xlu1 %v1709_v54  ;;  %1707 = vadd.xlane.f32.xlu0 %v1706_v3  ;;  %v1696_v29 = vmul.f32 %v3594_v48, %v1682_v41 }
 0x3db   : > { %v1695_v35 = vmul.f32 %v3594_v48, %v1681_v59 }
 0x3dc   : > { %v1604_v15 = vpop.permute.xlu0 %1603  ;;  %v1715_v53 = vsel %vm1699_vm8, %v1696_v29, 0.0 }
 0x3dd   : > { %v1602_v10 = vpop.permute.xlu1 %1601  ;;  %v1712_v20 = vsel %vm1699_vm8, %v1695_v35, 0.0  ;;  %v1684_v8 = vsel %vm1676_vm7, %v1675_v11, %v1604_v15 }
 0x3de   : > { %v1683_v40 = vsel %vm1676_vm7, %v1674_v22, %v1602_v10  ;;  %1716 = vadd.xlane.f32.xlu1 %v1715_v53  ;;  %1713 = vadd.xlane.f32.xlu0 %v1712_v20  ;;  %v1698_v39 = vmul.f32 %v3594_v48, %v1684_v8 }
 0x3df   : > { %v1697_v46 = vmul.f32 %v3594_v48, %v1683_v40 }
 0x3e0   : > { %v1721_v49 = vsel %vm1699_vm8, %v1698_v39, 0.0 }
 0x3e1   : > { %v1718_v30 = vsel %vm1699_vm8, %v1697_v46, 0.0 }
 0x3e2   : > { %1722 = vadd.xlane.f32.xlu1 %v1721_v49  ;;  %1719 = vadd.xlane.f32.xlu0 %v1718_v30 }
 0x416   : > { %v600_v42 = vpop.xlane.xlu0 %599 }
 0x417   : > { %v607_v1 = vadd.f32 %v600_v42, %v6445_v26 }
 0x41a   : > { %v603_v24 = vpop.xlane.xlu0 %602 }
 0x41c   : > { %v588_v38 = vpop.xlane.xlu1 %587 }
 0x41d   : > { %v608_v43 = vadd.f32 %v603_v24, %v588_v38 }
 0x41e   : > { %v618_v2 = vpop.permute.xlu0 %617 }
 0x41f   : > { %v636_v7 = vadd.f32 %v618_v2, %v607_v1 }
 0x420   : > { %v625_v16 = vpop.permute.xlu1 %624 }
 0x421   : > { %v637_v12 = vadd.f32 %v625_v16, %v608_v43  ;;  %v639_v37 = vmax.f32 %v636_v7, 0.0 }
 0x423   : > { %v640_v6 = vmax.f32 %v637_v12, 0.0  ;;  %647 = vperm.xlu0 %4314, %v639_v37  }
 0x425   : > { %652 = vperm.xlu1 %4028, %v640_v6  }
 0x451   : > { %v3863_v48 = vpop.f32.mrb[24].mxu1 }
 0x452   : > { %v3864_v58 = vpop.f32.mrb[25].mxu1 }
 0x453   : > { %v3865_v34 = vadd.f32 %v3864_v58, %v3863_v48  ;;  %v3866_v27 = vpop.f32.mrb[26].mxu1 }
 0x454   : > { %v3867_v63 = vpop.f32.mrb[27].mxu1  ;;  %v3903_v60 = vpop.f32.mrb[24].mxu0 }
 0x455   : > { %v3868_v14 = vadd.f32 %v3867_v63, %v3866_v27  ;;  %v3904_v62 = vpop.f32.mrb[25].mxu0 }
 0x456   : > { %v3905_v52 = vadd.f32 %v3904_v62, %v3903_v60  ;;  %v3906_v25 = vpop.f32.mrb[26].mxu0 }
 0x457   : > { %v3907_v50 = vpop.f32.mrb[27].mxu0 }
 0x458   : > { %v3908_v57 = vadd.f32 %v3907_v50, %v3906_v25  ;;  %v6164_v5 = vadd.f32 %v3905_v52, %v3865_v34 }
 0x45a   : > { %v3869_v51 = vpop.f32.mrb[28].mxu1  ;;  %v6166_v32 = vadd.f32 %v3908_v57, %v3868_v14 }
 0x45b   : > { %v3870_v23 = vpop.f32.mrb[29].mxu1 }
 0x45c   : > { %v3871_v28 = vadd.f32 %v3870_v23, %v3869_v51  ;;  %v3872_v47 = vpop.f32.mrb[30].mxu1 }
 0x45d   : > { %v3873_v19 = vpop.f32.mrb[31].mxu1 }
 0x45e   : > { %v3874_v55 = vadd.f32 %v3873_v19, %v3872_v47  ;;  %v3909_v13 = vpop.f32.mrb[28].mxu0 }
 0x45f   : > { %v3910_v56 = vpop.f32.mrb[29].mxu0 }
 0x460   : > { %v3911_v33 = vadd.f32 %v3910_v56, %v3909_v13  ;;  %v3912_v4 = vpop.f32.mrb[30].mxu0 }
 0x461   : > { %v3913_v21 = vpop.f32.mrb[31].mxu0 }
 0x462   : > { %v3914_v0 = vadd.f32 %v3913_v21, %v3912_v4  ;;  %v1705_v17 = vpop.xlane.xlu0 %1704  ;;  %v6168_v54 = vadd.f32 %v3911_v33, %v3871_v28 }
 0x463   : > { %v1702_v9 = vpop.xlane.xlu1 %1701  ;;  %v1731_v3 = vadd.f32 %v3595_v44, %v1705_v17  ;;  %v3875_v59 = vpop.f32.mrb[32].mxu1 }
 0x464   : > { %v1730_v41 = vadd.f32 %v3595_v44, %v1702_v9  ;;  %v3876_v18 = vpop.f32.mrb[33].mxu1  ;;  %v6170_v31 = vadd.f32 %v3914_v0, %v3874_v55 }
 0x465   : > { %v1739_v29 = vmul.f32 0.5, %v1731_v3  ;;  %v3877_v36 = vadd.f32 %v3876_v18, %v3875_v59  ;;  %v3878_v45 = vpop.f32.mrb[34].mxu1 }
 0x466   : > { %v1738_v35 = vmul.f32 0.5, %v1730_v41  ;;  %v3879_v11 = vpop.f32.mrb[35].mxu1 }
 0x467   : > { %v1708_v22 = vpop.xlane.xlu0 %1707  ;;  %4405 = vtanh.f32 %v1739_v29  ;;  %v3880_v15 = vadd.f32 %v3879_v11, %v3878_v45  ;;  %v1711_v53 = vpop.xlane.xlu1 %1710 }
 0x468   : > { %v1732_v10 = vadd.f32 %v3595_v44, %v1708_v22  ;;  %4407 = vtanh.f32 %v1738_v35  ;;  %v1733_v20 = vadd.f32 %v3595_v44, %v1711_v53 }
 0x46a   : > { %v1740_v8 = vmul.f32 0.5, %v1732_v10  ;;  %v1741_v40 = vmul.f32 0.5, %v1733_v20 }
 0x46b   : > { %v1714_v39 = vpop.xlane.xlu0 %1713  ;;  %v1717_v49 = vpop.xlane.xlu1 %1716 }
 0x46c   : > { %4409 = vtanh.f32 %v1740_v8  ;;  %v1734_v46 = vadd.f32 %v3595_v44, %v1714_v39  ;;  %v1735_v42 = vadd.f32 %v3595_v44, %v1717_v49 }
 0x46d   : > { %4411 = vtanh.f32 %v1741_v40 }
 0x46e   : > { %v1742_v30 = vmul.f32 0.5, %v1734_v46  ;;  %v1743_v12 = vmul.f32 0.5, %v1735_v42 }
 0x46f   : > { %v1720_v24 = vpop.xlane.xlu0 %1719  ;;  %v3915_v38 = vpop.f32.mrb[32].mxu0 }
 0x470   : > { %v1723_v43 = vpop.xlane.xlu1 %1722  ;;  %v3916_v26 = vpop.f32.mrb[33].mxu0  ;;  %4413 = vtanh.f32 %v1742_v30  ;;  %v1736_v48 = vadd.f32 %v3595_v44, %v1720_v24 }
 0x471   : > { %v1737_v1 = vadd.f32 %v3595_v44, %v1723_v43  ;;  %v3917_v2 = vadd.f32 %v3916_v26, %v3915_v38  ;;  %v3918_v7 = vpop.f32.mrb[34].mxu0  ;;  %v4406_v16 = vpop.eup %4405 }
 0x472   : > { %v3919_v37 = vpop.f32.mrb[35].mxu0  ;;  %v4408_v6 = vpop.eup %4407  ;;  %v1755_v63 = vmul.f32 0.5, %v4406_v16  ;;  %v1744_v25 = vmul.f32 0.5, %v1736_v48 }
 0x473   : > { %v1745_v58 = vmul.f32 0.5, %v1737_v1  ;;  %v3920_v34 = vadd.f32 %v3919_v37, %v3918_v7  ;;  %v6172_v27 = vadd.f32 %v3917_v2, %v3877_v36  ;;  %v1754_v60 = vmul.f32 0.5, %v4408_v6 }
 0x474   : > { %v1763_v51 = vadd.f32 0.5, %v1755_v63 }
 0x475   : > { %4415 = vtanh.f32 %v1745_v58  ;;  %v6174_v14 = vadd.f32 %v3920_v34, %v3880_v15  ;;  %v6176_v52 = vadd.f32 0.5, %v1754_v60  ;;  %v643_v60 = vld [vmem:[%s6373_s4 + $0x2] sm:$0x3] }
 0x476   : > { %v4410_v62 = vpop.eup %4409  ;;  %4417 = vtanh.f32 %v1743_v12  ;;  %v3881_v50 = vpop.f32.mrb[36].mxu1  ;;  %v3325_v44 = vsub.f32 1.0, %v1763_v51 }
 0x477   : > { %v4412_v57 = vpop.eup %4411  ;;  %v3324_v23 = vsub.f32 1.0, %v6176_v52  ;;  %v1756_v28 = vmul.f32 0.5, %v4410_v62  ;;  %v3882_v47 = vpop.f32.mrb[37].mxu1  ;;  %4419 = vtanh.f32 %v1744_v25 }
 0x478   : > { %v3883_v19 = vadd.f32 %v3882_v47, %v3881_v50  ;;  %v3884_v55 = vpop.f32.mrb[38].mxu1  ;;  %v1757_v56 = vmul.f32 0.5, %v4412_v57 }
 0x479   : > { %v3885_v13 = vpop.f32.mrb[39].mxu1  ;;  %3338 = vperm.xlu1 %4028, %v3324_v23   ;;  %v1764_v21 = vadd.f32 0.5, %v1756_v28 }
 0x47a   : > { %v3886_v33 = vadd.f32 %v3885_v13, %v3884_v55  ;;  %v4414_v4 = vpop.eup %4413  ;;  %v1765_v17 = vadd.f32 0.5, %v1757_v56 }
 0x47b   : > { %v3326_v3 = vsub.f32 1.0, %v1764_v21  ;;  %v1758_v41 = vmul.f32 0.5, %v4414_v4 }
 0x47c   : > { %v3327_v40 = vsub.f32 1.0, %v1765_v17 }
 0x47d   : > { %3343 = vperm.xlu1 %4028, %v3325_v44   ;;  %v1766_v46 = vadd.f32 0.5, %v1758_v41  ;;  %v4444_v44 = vld [vmem:[%s6374_s5] sm:$0x7] }
 0x47e   : > { %v3969_v9 = vpop.f32.mrb[40].mxu1 }
 0x47f   : > { %v4416_v0 = vpop.eup %4415  ;;  %v6180_v18 = vadd.f32 %v3969_v9, %v6168_v54  ;;  %v3921_v29 = vpop.f32.mrb[36].mxu0  ;;  %v3328_v26 = vsub.f32 1.0, %v1766_v46  ;;  %v3697_v9 = vld [vmem:[%s6383_s14] ss:$0 sm:$0xff] }
 0x480   : > { %v1761_v59 = vmul.f32 0.5, %v4416_v0  ;;  %v3215_v35 = vpop.f32.mrb[41].mxu1  ;;  %v4418_v36 = vpop.eup %4417 }
 0x481   : > { %v6183_v45 = vadd.f32 %v3215_v35, %v6164_v5  ;;  %v3922_v11 = vpop.f32.mrb[37].mxu0  ;;  %v3970_v22 = vpop.f32.mrb[42].mxu1  ;;  %3348 = vperm.xlu1 %4028, %v3326_v3   ;;  %v1759_v49 = vmul.f32 0.5, %v4418_v36 }
 0x482   : > { %v1769_v15 = vadd.f32 0.5, %v1761_v59  ;;  %v3923_v10 = vadd.f32 %v3922_v11, %v3921_v29  ;;  %v6186_v53 = vadd.f32 %v3970_v22, %v6170_v31  ;;  %v3924_v20 = vpop.f32.mrb[38].mxu0  ;;  %v3218_v8 = vpop.f32.mrb[43].mxu1  ;;  %v3698_v29 = vld [vmem:[%s6384_s15] ss:$0 sm:$0xff] }
 0x483   : > { %v3219_v54 = vadd.f32 %v3218_v8, %v6166_v32  ;;  %v3925_v39 = vpop.f32.mrb[39].mxu0  ;;  %v4420_v5 = vpop.eup %4419  ;;  %v1767_v31 = vadd.f32 0.5, %v1759_v49 }
 0x484   : > { %v3331_v30 = vsub.f32 1.0, %v1769_v15  ;;  %v3926_v42 = vadd.f32 %v3925_v39, %v3924_v20  ;;  %v3175_v24 = vadd.f32 %v3923_v10, %v3883_v19  ;;  %v1760_v1 = vmul.f32 0.5, %v4420_v5 }
 0x485   : > { %3353 = vperm.xlu1 %4028, %v3327_v40   ;;  %v3329_v48 = vsub.f32 1.0, %v1767_v31  ;;  %v3254_v41 = vmul.f32 %v3697_v9, %v3219_v54  ;;  %v3256_v36 = vmul.f32 %v3697_v9, %v6186_v53  ;;  %v3253_v20 = vmul.f32 %v3697_v9, %v6183_v45 }
 0x486   : > { %3373 = vperm.xlu0 %4314, %v3331_v30   ;;  %v3178_v38 = vadd.f32 %v3926_v42, %v3886_v33  ;;  %v3973_v43 = vpop.f32.mrb[44].mxu1  ;;  %v1768_v58 = vadd.f32 0.5, %v1760_v1  ;;  %v3255_v53 = vmul.f32 %v3697_v9, %v6180_v18 }
 0x487   : > { %v6189_v2 = vadd.f32 %v3973_v43, %v3175_v24  ;;  %v3231_v7 = vpop.f32.mrb[45].mxu1  ;;  %v3269_v11 = vadd.f32 %v3698_v29, %v3254_v41  ;;  %v6214_v22 = vadd.f32 %v3698_v29, %v3256_v36  ;;  %v6222_v49 = vadd.f32 %v3698_v29, %v3253_v20 }
 0x488   : > { %v6192_v16 = vadd.f32 %v3231_v7, %v6172_v27  ;;  %v3974_v32 = vpop.f32.mrb[46].mxu1  ;;  %v3330_v34 = vsub.f32 1.0, %v1768_v58  ;;  %v642_v27 = vld [vmem:[%s6373_s4] sm:$0x3] }
 0x489   : > { %v3243_v12 = vadd.f32 %v3974_v32, %v3178_v38  ;;  %v3234_v37 = vpop.f32.mrb[47].mxu1  ;;  %3358 = vperm.xlu1 %4028, %v3328_v26   ;;  %v3287_v40 = vmin.f32 %v6214_v22, 0.0  ;;  %v3284_v43 = vmin.f32 %v6222_v49, 0.0  ;;  %v6229_v26 = vadd.f32 %v3698_v29, %v3255_v53 }
 0x48a   : > { %3395 = vperm.xlu0 %4314, %v1763_v51   ;;  %v3235_v6 = vadd.f32 %v3234_v37, %v6174_v14  ;;  %vm3279_vm9 = vcmp.gt.f32.partialorder %v6214_v22, 0.0  ;;  %vm3276_vm12 = vcmp.gt.f32.partialorder %v6222_v49, 0.0 }
 0x48b   : > { %v3260_v8 = vmul.f32 %v3697_v9, %v3243_v12  ;;  %v3298_v5 = vmul.f32 1.442695, %v3287_v40  ;;  %v3292_v37 = vmul.f32 1.442695, %v3284_v43  ;;  %v4446_v40 = vld [vmem:[%s4679_s0 + $0x18] sm:$0xff]  ;;  %vm3278_vm13 = vcmp.gt.f32.partialorder %v6229_v26, 0.0 }
 0x48c   : > { %v3258_v10 = vmul.f32 %v3697_v9, %v3235_v6  ;;  %v3286_v6 = vmin.f32 %v6229_v26, 0.0 }
 0x48d   : > { %3363 = vperm.xlu1 %4028, %v3329_v48   ;;  %v6225_v30 = vadd.f32 %v3698_v29, %v3260_v8  ;;  %v3259_v48 = vmul.f32 %v3697_v9, %v6189_v2 }
 0x48e   : > { %3405 = vperm.xlu0 %4314, %v1765_v17   ;;  %v6218_v39 = vadd.f32 %v3698_v29, %v3258_v10 }
 0x48f   : > { %v3291_v1 = vmin.f32 %v6225_v30, 0.0  ;;  %vm3283_vm11 = vcmp.gt.f32.partialorder %v6225_v30, 0.0 }
 0x490   : > { %v3289_v24 = vmin.f32 %v6218_v39, 0.0  ;;  %vm3281_vm10 = vcmp.gt.f32.partialorder %v6218_v39, 0.0 }
 0x491   : > { %3368 = vperm.xlu1 %4028, %v3330_v34  }
 0x492   : > { %3415 = vperm.xlu0 %4314, %v1767_v31   ;;  %v3257_v31 = vmul.f32 %v3697_v9, %v6192_v16  ;;  %v3302_v7 = vmul.f32 1.442695, %v3289_v24 }
 0x494   : > { %v6237_v34 = vadd.f32 %v3698_v29, %v3257_v31 }
 0x495   : > { %3390 = vperm.xlu1 %4028, %v6176_v52  }
 0x496   : > { %3425 = vperm.xlu0 %4314, %v1769_v15   ;;  %v3285_v15 = vmin.f32 %v3269_v11, 0.0  ;;  %vm3280_vm14 = vcmp.gt.f32.partialorder %v6237_v34, 0.0 }
 0x498   : > { %v3294_v54 = vmul.f32 1.442695, %v3285_v15 }
 0x499   : > { %3400 = vperm.xlu1 %4028, %v1764_v21   ;;  %v686_v21 = vrot.slane %v4444_v44, 1 }
 0x49d   : > { %3410 = vperm.xlu1 %4028, %v1766_v46  }
 0x4a1   : > { %3420 = vperm.xlu1 %4028, %v1768_v58   ;;  %v3306_v58 = vmul.f32 1.442695, %v3291_v1 }
 0x4a2   : > { %v648_v63 = vpop.permute.xlu0 %647 }
 0x4a3   : > { %v660_v62 = vmul.f32 %v648_v63, %v642_v27 }
 0x4a4   : > { %v653_v14 = vpop.permute.xlu1 %652 }
 0x4a5   : > { %v661_v25 = vmul.f32 %v653_v14, %v643_v60  ;;  %v663_v50 = vsel %vm582_vm1, %v660_v62, 0.0  ;;  %v3296_v62 = vmul.f32 1.442695, %v3286_v6 }
 0x4a6   : > { %v664_v57 = vrot.slane %v663_v50, 4 }
 0x4a7   : > { %v670_v52 = vsel %vm582_vm1, %v661_v25, 0.0  ;;  %v6239_v25 = vadd.f32 %v3698_v29, %v3259_v48  ;;  %vm3277_vm1 = vcmp.gt.f32.partialorder %v3269_v11, 0.0 }
 0x4a8   : > { %v671_v51 = vrot.slane %v670_v52, 4  ;;  %v665_v23 = vadd.f32 %v664_v57, %v663_v50  ;;  %v3288_v50 = vmin.f32 %v6237_v34, 0.0 }
 0x4a9   : > { %vm3282_vm15 = vcmp.gt.f32.partialorder %v6239_v25, 0.0 }
 0x4aa   : > { %v672_v28 = vadd.f32 %v671_v51, %v670_v52  ;;  %v666_v47 = vrot.slane %v665_v23, 2 }
 0x4ac   : > { %v673_v19 = vrot.slane %v672_v28, 2  ;;  %v667_v55 = vadd.f32 %v666_v47, %v665_v23 }
 0x4ae   : > { %v674_v13 = vadd.f32 %v673_v19, %v672_v28  ;;  %v668_v56 = vrot.slane %v667_v55, 1 }
 0x4b0   : > { %v675_v33 = vrot.slane %v674_v13, 1  ;;  %v669_v4 = vadd.f32 %v668_v56, %v667_v55  ;;  %v3290_v55 = vmin.f32 %v6239_v25, 0.0 }
 0x4b2   : > { %v676_v0 = vadd.f32 %v675_v33, %v674_v13  ;;  %v691_v17 = vadd.f32 %v4444_v44, %v669_v4  ;;  %v3300_v13 = vmul.f32 1.442695, %v3288_v50  ;;  %v3304_v36 = vmul.f32 1.442695, %v3290_v55 }
 0x4b4   : > { %v692_v3 = vadd.f32 %v686_v21, %v676_v0  ;;  %v694_v59 = vmul.f32 0.5, %v691_v17  ;;  %v4445_v17 = vld [vmem:[%s4679_s0 + $0x8] sm:$0xff] }
 0x4b6   : > { %v695_v35 = vmul.f32 0.5, %v692_v3  ;;  %4421 = vtanh.f32 %v694_v59 }
 0x4b8   : > { %4423 = vtanh.f32 %v695_v35 }
 0x4b9   : > { %4425 = vpow2.f32 %v3294_v54 }
 0x4ba   : > { %4427 = vpow2.f32 %v3298_v5 }
 0x4bb   : > { %4429 = vpow2.f32 %v3302_v7 }
 0x4bc   : > { %4431 = vpow2.f32 %v3292_v37  ;;  %v4447_v37 = vld [vmem:[%s4679_s0 + $0x28] sm:$0xff] }
 0x4bd   : > { %4433 = vpow2.f32 %v3306_v58 }
 0x4be   : > { %4435 = vpow2.f32 %v3296_v62 }
 0x4bf   : > { %4437 = vpow2.f32 %v3300_v13 }
 0x4c0   : > { %v4422_v42 = vpop.eup %4421  ;;  %4439 = vpow2.f32 %v3304_v36  ;;  %v4451_v36 = vld [vmem:[%s4679_s0 + $0x20] sm:$0xff] }
 0x4c1   : > { %v700_v32 = vmul.f32 0.5, %v4422_v42 }
 0x4c2   : > { %v4424_v45 = vpop.eup %4423 }
 0x4c3   : > { %v701_v18 = vmul.f32 0.5, %v4424_v45  ;;  %v703_v27 = vadd.f32 0.5, %v700_v32  ;;  %v4426_v14 = vpop.eup %4425 }
 0x4c4   : > { %v3700_v51 = vadd.f32 -1.0, %v4426_v14  ;;  %v4428_v28 = vpop.eup %4427 }
 0x4c5   : > { %v704_v63 = vadd.f32 0.5, %v701_v18  ;;  %v6243_v2 = vrot.slane %v703_v27, %v6435_v61  ;;  %v3702_v4 = vadd.f32 -1.0, %v4428_v28  ;;  %v4430_v21 = vpop.eup %4429  ;;  %v4448_v28 = vld [vmem:[%s4679_s0 + $0x38] sm:$0xff] }
 0x4c6   : > { %v4432_v59 = vpop.eup %4431  ;;  %v3704_v20 = vadd.f32 -1.0, %v4430_v21 }
 0x4c7   : > { %v6246_v52 = vrot.slane %v704_v63, %v6435_v61  ;;  %v3317_v61 = vsel %vm3277_vm1, %v3269_v11, %v3700_v51  ;;  %v4434_v11 = vpop.eup %4433  ;;  %v3319_v15 = vsel %vm3279_vm9, %v6214_v22, %v3702_v4  ;;  %v3699_v32 = vadd.f32 -1.0, %v4432_v59 }
 0x4c8   : > { %v3706_v45 = vadd.f32 -1.0, %v4434_v11  ;;  %v3321_v31 = vsel %vm3281_vm10, %v6218_v39, %v3704_v20  ;;  %v4436_v18 = vpop.eup %4435 }
 0x4c9   : > { %v3316_v62 = vsel %vm3276_vm12, %v6222_v49, %v3699_v32  ;;  %v4438_v51 = vpop.eup %4437 }
 0x4ca   : > { %v3703_v4 = vadd.f32 -1.0, %v4438_v51 }
 0x4cc   : > { %v3320_v59 = vsel %vm3280_vm14, %v6237_v34, %v3703_v4 }
 0x4f8   : > { %v6220_v46 = vpop.permute.xlu1 %3338 }
 0x4fc   : > { %v3344_v38 = vpop.permute.xlu1 %3343 }
 0x4fd   : > { %v3377_v47 = vmul.f32 %v3344_v38, %v6243_v2  ;;  %v3376_v38 = vmul.f32 %v6220_v46, %v6243_v2  ;;  %v3323_v46 = vsel %vm3283_vm11, %v6225_v30, %v3706_v45 }
 0x500   : > { %v6233_v12 = vpop.permute.xlu1 %3348 }
 0x504   : > { %v3354_v60 = vpop.permute.xlu1 %3353 }
 0x505   : > { %v3374_v16 = vpop.permute.xlu0 %3373  ;;  %v3379_v0 = vmul.f32 %v3354_v60, %v6243_v2  ;;  %v3378_v60 = vmul.f32 %v6233_v12, %v6243_v2 }
 0x506   : > { %v3383_v43 = vmul.f32 %v3374_v16, %v6243_v2 }
 0x508   : > { %v6249_v23 = vpop.permute.xlu1 %3358 }
 0x509   : > { %v3396_v57 = vpop.permute.xlu0 %3395  ;;  %v3380_v21 = vmul.f32 %v6249_v23, %v6243_v2 }
 0x50a   : > { %v3429_v19 = vmul.f32 %v3396_v57, %v6246_v52  ;;  %v3453_v3 = vmul.f32 %v3396_v57, %v3317_v61  ;;  %v3701_v57 = vadd.f32 -1.0, %v4436_v18 }
 0x50c   : > { %v3437_v56 = vadd.f32 %v3429_v19, %v3377_v47  ;;  %v3364_v44 = vpop.permute.xlu1 %3363  ;;  %v4449_v19 = vld [vmem:[%s4679_s0] sm:$0xff]  ;;  %v3318_v61 = vsel %vm3278_vm13, %v6229_v26, %v3701_v57 }
 0x50d   : > { %v3406_v33 = vpop.permute.xlu0 %3405  ;;  %v3381_v42 = vmul.f32 %v3364_v44, %v6243_v2  ;;  %v4440_v44 = vpop.eup %4439 }
 0x50e   : > { %v3445_v9 = vmul.f32 %v4445_v17, %v3437_v56  ;;  %v3431_v41 = vmul.f32 %v3406_v33, %v6246_v52  ;;  %v3455_v53 = vmul.f32 %v3406_v33, %v3319_v15 }
 0x510   : > { %v3461_v29 = vadd.f32 %v3453_v3, %v3445_v9  ;;  %v3439_v35 = vadd.f32 %v3431_v41, %v3379_v0  ;;  %v6261_v8 = vpop.permute.xlu1 %3368  ;;  %v4450_v0 = vld [vmem:[%s4679_s0 + $0x10] sm:$0xff] }
 0x511   : > { %v3416_v10 = vpop.permute.xlu0 %3415 }
 0x512   : > { %3469 = vst.msk [vmem:[%s6263_s18 + $0x8] sm:$0xff] %vm531_vm0, %v3461_v29  ;;  %v3447_v54 = vmul.f32 %v4446_v40, %v3439_v35  ;;  %v3433_v5 = vmul.f32 %v3416_v10, %v6246_v52  ;;  %v3457_v48 = vmul.f32 %v3416_v10, %v3321_v31  ;;  %v3705_v29 = vadd.f32 -1.0, %v4440_v44 }
 0x513   : > { %v3382_v35 = vmul.f32 %v6261_v8, %v6243_v2  ;;  %v4452_v2 = vld [vmem:[%s4679_s0 + $0x30] sm:$0xff]  ;;  %s4530_s0 = smov [#allocation3]  }
 0x514   : > { %v3463_v22 = vadd.f32 %v3455_v53, %v3447_v54  ;;  %v3441_v24 = vadd.f32 %v3433_v5, %v3381_v42  ;;  %v3391_v7 = vpop.permute.xlu1 %3390  ;;  %v3322_v40 = vsel %vm3282_vm15, %v6239_v25, %v3705_v29  ;;  %s4457_s21 = sshll.u32 %s4530_s0, 4  ;;  %s4458_s21 = int_to_ptr.vmem [resolvable:$false] %s4457_s21 }
 0x515   : > { %v3426_v1 = vpop.permute.xlu0 %3425  ;;  %v3428_v27 = vmul.f32 %v3391_v7, %v6246_v52  ;;  %v3452_v55 = vmul.f32 %v3391_v7, %v3316_v62  ;;  %s4459_s25 = scalar_lea.vmem %s4458_s21, 2048  ;;  %p4460_p0 = scmp.lt.s32.totalorder %s6321_s20, %s4458_s21 }
 0x516   : > { %3471 = vst.msk [vmem:[%s6263_s18 + $0x18] sm:$0xff] %vm531_vm0, %v3463_v22  ;;  %v3449_v6 = vmul.f32 %v4447_v37, %v3441_v24  ;;  %v3435_v58 = vmul.f32 %v3426_v1, %v6246_v52  ;;  %v3459_v14 = vmul.f32 %v3426_v1, %v3323_v46  ;;  %p4461_p1 = scmp.lt.s32.totalorder %s4459_s25, %s4453_s29 }
 0x517   : > { %v3436_v16 = vadd.f32 %v3428_v27, %v3376_v38 }
 0x518   : > { %v3465_v39 = vadd.f32 %v3457_v48, %v3449_v6  ;;  %v3443_v63 = vadd.f32 %v3435_v58, %v3383_v43  ;;  %v3401_v50 = vpop.permute.xlu1 %3400  ;;  %p4462_p2 = por %p4461_p1, %p4460_p0 }
 0x519   : > { %v3444_v30 = vmul.f32 %v4449_v19, %v3436_v16  ;;  %v3430_v13 = vmul.f32 %v3401_v50, %v6246_v52  ;;  %v3454_v9 = vmul.f32 %v3401_v50, %v3318_v61 }
 0x51a   : > { %3473 = vst.msk [vmem:[%s6263_s18 + $0x28] sm:$0xff] %vm531_vm0, %v3465_v39  ;;  %v3451_v47 = vmul.f32 %v4448_v28, %v3443_v63  ;;  %p4463_p3 = pnand %p4462_p2, %p4456_p13 }
 0x51b   : > { %v3460_v12 = vadd.f32 %v3452_v55, %v3444_v30  ;;  %v3438_v49 = vadd.f32 %v3430_v13, %v3378_v60 }
 0x51c   : > { %v3467_v56 = vadd.f32 %v3459_v14, %v3451_v47  ;;  %v3411_v33 = vpop.permute.xlu1 %3410 }
 0x51d   : > { %3468 = vst.msk [vmem:[%s6263_s18] sm:$0xff] %vm531_vm0, %v3460_v12  ;;  %v3446_v17 = vmul.f32 %v4450_v0, %v3438_v49  ;;  %v3432_v3 = vmul.f32 %v3411_v33, %v6246_v52  ;;  %v3456_v15 = vmul.f32 %v3411_v33, %v3320_v59 }
 0x51e   : > { %3475 = vst.msk [vmem:[%s6263_s18 + $0x38] sm:$0xff] %vm531_vm0, %v3467_v56 }
 0x51f   : > { %v3462_v41 = vadd.f32 %v3454_v9, %v3446_v17  ;;  %v3440_v26 = vadd.f32 %v3432_v3, %v3380_v21 }
 0x520   : > { %v3421_v23 = vpop.permute.xlu1 %3420 }
 0x521   : > { %3470 = vst.msk [vmem:[%s6263_s18 + $0x10] sm:$0xff] %vm531_vm0, %v3462_v41  ;;  %v3448_v11 = vmul.f32 %v4451_v36, %v3440_v26  ;;  %v3434_v10 = vmul.f32 %v3421_v23, %v6246_v52  ;;  %v3458_v54 = vmul.f32 %v3421_v23, %v3322_v40 }
 0x523   : > { %v3464_v20 = vadd.f32 %v3456_v15, %v3448_v11  ;;  %v3442_v34 = vadd.f32 %v3434_v10, %v3382_v35 }
 0x525   : > { %3472 = vst.msk [vmem:[%s6263_s18 + $0x20] sm:$0xff] %vm531_vm0, %v3464_v20  ;;  %v3450_v8 = vmul.f32 %v4452_v2, %v3442_v34 }
 0x527   : > { %v3466_v52 = vadd.f32 %v3458_v54, %v3450_v8 }
 0x529   : > { %3474 = vst.msk [vmem:[%s6263_s18 + $0x30] sm:$0xff] %vm531_vm0, %v3466_v52 }
 0x52a   : > { %4466 = shalt.err (!%p4463_p3)
}
 0x52b   : > { %s4467_s30 = scalar_lea.hbm %s6319_s27, 1024  ;;  %s4471_s18 = scalar_lea.hbm %s6385_s16, 2048 }
 0x52c   : > { %p4468_p4 = scmp.ne.s32.totalorder %s6319_s27, %s4467_s30  ;;  %p4472_p9 = scmp.lt.u32.totalorder %s6319_s27, %s6385_s16 }
 0x52d   : > { %p4473_p10 = scmp.lt.u32.totalorder %s4471_s18, %s4467_s30  ;;  %p4475_p12 = scmp.lt.u32.totalorder %s4467_s30, %s6319_s27 }
 0x52e   : > { %p4469_p7 = pnand %p4468_p4, %p4658_p5 }
 0x52f   : > { %p4474_p11 = por %p4473_p10, %p4472_p9 }
 0x530   : > { %p4470_p8 = pneg %p4469_p7 }
 0x531   : > { %p4476_p13 = por %p4475_p12, %p4474_p11 }
 0x533   : > { %p4477_p0 = pnand %p4476_p13, %p4470_p8 }
 0x535   : > { %4480 = shalt.err (!%p4477_p0)
}
 0x536   : > { %s4531_s23 = smov 128  }
 0x537   : > { %3975 = dma.vmem_to_hbm [thread:$0]  (%p4658_p5), %s6321_s20, 1024, %s6319_s27, %s6327_s9, %s4531_s23, %s4531_s23, %s4523_s28  }
 0x538 PF: > { %s6446_s29 = sld [smem:[#allocation8_spill]]  ;;  %s6447_s0 = sld [smem:[#allocation6_spill]] }
 0x53e   : > { %p3981_p1 = scmp.ge.s32.totalorder %s6446_s29, 2  ;;  %s3505_s25 = sand.u32 1, %s6447_s0  }
 0x53f   : > { %s3506_s30 = scalar_lea.sflag [#allocation4], %s3505_s25 }
 0x540   : > { %p3978_p2 = pnand %p3981_p1, %p4662_p6 }
 0x542   : > { %4498 = dma.done.wait (!%p3978_p2), %s3506_s30, 1024  }
 0x543   : > { %4500 = vsyncadd (!%p3978_p2), %s3506_s30, 4294966272  ;;  %s6449_s26 = sld [smem:[#allocation9_spill]]  ;;  %s6450_s6 = sld [smem:[#allocation7_spill]] }
 0x544   : > { %s6451_s25 = sld [smem:[#allocation10_spill]]  ;;  %s6452_s23 = smov %s4507_s24 }
 0x549   : > { %p28_p3 = scmp.ge.s32.totalorder %s6449_s26, 4   ;;  %s6453_s24 = smov %s6450_s6 }
 0x54b   :  { %30 = sbr.rel (!%p28_p3) target bundleno = 6 (0x6), region = 119 }
 0x552   :  { %3511 = vsyncpa [#allocation4], 1 }
 0x553   :  { %3513 = vsyncpa [#allocation4 + $0x1], 1 }

</bundles_post_ra>
